<compile_context>
chip_gen: v5e
topology: v5e:2x2
jax: 0.10.0
libtpu: 0.0.40
codegen_flags: <defaults>
</compile_context>

<pallas_src>
import jax
import jax.numpy as jnp
from jax.experimental import pallas as pl
from jax.experimental.pallas import tpu as pltpu


# ----------------------------- fused Pallas kernel ------------------------------

def _fused_kernel(xt_ref, xc_ref, xb_ref, w1_ref, b1_ref, w3_ref, b3_ref, o_ref):
    i = pl.program_id(1)
    n_row_tiles = pl.num_programs(1)
    _, tj, W, Cin = xc_ref.shape
    Cout = w1_ref.shape[1]
    f32, bf16 = jnp.float32, jnp.bfloat16
    rows = tj + 2
    S = 2 * tj * W                       # output pixels per column phase

    # ---- gather tj+2 input rows; halo rows are edge-clamped by the index_map ----
    x = jnp.concatenate([xt_ref[0], xc_ref[0], xb_ref[0]], axis=0)   # (rows, W, Cin)

    # ---- conv1x1 (+ folded BN1) + ReLU: bf16 MXU operands, f32 accumulation ------
    y = jnp.dot(x.reshape(rows * W, Cin).astype(bf16), w1_ref[...],
                preferred_element_type=f32)
    y = jnp.maximum(y + b1_ref[...], 0.0).reshape(rows, W, Cout)

    # ---- vertical bilinear x2 (align_corners=False), incl. 1-row conv halo ------
    #   local up row 2p   = 0.75*y[p] + 0.25*y[p+1]   (global up row 2*j0-1+2p)
    #   local up row 2p+1 = 0.25*y[p] + 0.75*y[p+1]
    ya = y[0:tj + 1]
    yb = y[1:rows]
    ue = 0.75 * ya + 0.25 * yb
    uo = 0.25 * ya + 0.75 * yb
    u = jnp.stack([ue, uo], axis=1).reshape(2 * tj + 2, W, Cout)
    # conv3x3 zero padding at the global top / bottom of the *upsampled* image
    top_keep = jnp.where(i == 0, 0.0, 1.0)
    bot_keep = jnp.where(i == n_row_tiles - 1, 0.0, 1.0)
    u = jnp.concatenate(
        [u[0:1] * top_keep, u[1:2 * tj + 1], u[2 * tj + 1:] * bot_keep], axis=0)

    # ---- horizontal bilinear x2 as even/odd column phases (bf16 for the MXU) ----
    left = jnp.concatenate([u[:, 0:1], u[:, 0:W - 1]], axis=1)     # col q-1 (clamp)
    right = jnp.concatenate([u[:, 1:W], u[:, W - 1:W]], axis=1)    # col q+1 (clamp)
    pe = (0.25 * left + 0.75 * u).astype(bf16)                     # up col 2q
    po = (0.75 * u + 0.25 * right).astype(bf16)                    # up col 2q+1
    zcol = jnp.zeros((2 * tj + 2, 1, Cout), bf16)
    pol = jnp.concatenate([zcol, po[:, 0:W - 1]], axis=1)          # up col 2q-1 (zero)
    per = jnp.concatenate([pe[:, 1:W], zcol], axis=1)              # up col 2q+2 (zero)

    # ---- conv3x3 (+ folded BN3) + ReLU: one tap-concatenated matmul per phase ----
    # operand channel index = ky*3*Cout + kx*Cout + c, matching w3_ref's layout.
    taps_e, taps_o = [], []
    for ky in range(3):
        sl = slice(ky, ky + 2 * tj)
        taps_e += [pol[sl], pe[sl], po[sl]]        # even output cols read 2q-1,2q,2q+1
        taps_o += [pe[sl], po[sl], per[sl]]        # odd  output cols read 2q,2q+1,2q+2
    op_e = jnp.concatenate(taps_e, axis=-1).reshape(S, 9 * Cout)
    op_o = jnp.concatenate(taps_o, axis=-1).reshape(S, 9 * Cout)
    w3 = w3_ref[...]
    b3 = b3_ref[...]
    ze = jnp.maximum(jnp.dot(op_e, w3, preferred_element_type=f32) + b3, 0.0)
    zo = jnp.maximum(jnp.dot(op_o, w3, preferred_element_type=f32) + b3, 0.0)

    # ---- interleave even/odd output columns, emit channels-first (NCHW) directly -
    # (2tj, W, 2, Cout) row-major flatten == (row, 2q+phase) ordering of the tile.
    z = jnp.stack([ze.reshape(2 * tj, W, Cout), zo.reshape(2 * tj, W, Cout)],
                  axis=2).reshape(4 * tj * W, Cout)
    o_ref[0] = z.T.astype(o_ref.dtype)             # (Cout, 4*tj*W): lane-dense store


# --------------------------------- wrapper ---------------------------------------

def _fold_bn(gamma, beta, mean, var, eps=1e-5):
    scale = gamma / jnp.sqrt(var + eps)
    shift = beta - mean * scale
    return scale, shift


def _vmem_limits():
    # generation-aware VMEM limit (v5e/v6e: 128 MiB, v7x: 64 MiB physical).
    cap = 64 * 1024 * 1024
    try:
        info = pltpu.get_tpu_info()
        cap = int(getattr(info, "vmem_capacity_bytes", cap) or cap)
    except Exception:
        pass
    limit = min(max(cap - 16 * 1024 * 1024, 32 * 1024 * 1024), 100 * 1024 * 1024)
    return limit, limit // 2               # (compiler limit, per-tile working-set budget)


def _pick_row_tile(N, H, W, Cin, Cout, budget_bytes):
    # Conservative per-tile footprint: conv1x1 output, blend intermediates, bf16
    # phase copies, the (S, 9*Cout) patch operands, accumulators and the
    # double-buffered I/O blocks (~28 f32 "u"-sized arrays total).
    def footprint(t):
        u = (2 * t + 2) * W * Cout
        return 4 * (28 * u + 4 * (t + 2) * W * Cin)

    legal = [t for t in range(1, H + 1)
             if H % t == 0 and (t == H or (4 * t * W) % 128 == 0)]  # lane-dense out block
    fitting = [t for t in legal if footprint(t) <= budget_bytes] or [min(legal)]
    # keep >=2 row tiles when possible so small batches still feed both v7x cores
    multi = [t for t in fitting if H // t >= 2]
    cands = multi or fitting
    tj = max(cands)
    if (N * (H // tj)) % 2 == 1:           # balance the parallel grid across 2 TCs
        even = [t for t in cands if (N * (H // t)) % 2 == 0]
        if even:
            tj = max(even)
    return tj


def classifier_forward(params, x_nchw):
    # TODO(synk): BatchNorm uses eval-mode running statistics (folded into the conv
    # weights); PyTorch train-mode batch statistics are not reproduced.
    N, Cin, H, W = x_nchw.shape
    w1 = params["w1"]                      # (Cin, Cout)        1x1 conv, HWIO-style
    w3 = params["w3"]                      # (3, 3, Cout, Cout) HWIO
    Cout = w1.shape[1]

    s1, sh1 = _fold_bn(*params["bn1"])
    s3, sh3 = _fold_bn(*params["bn3"])
    w1f = (w1 * s1[None, :]).astype(jnp.bfloat16)
    w3f = (w3 * s3[None, None, None, :]).reshape(9 * Cout, Cout).astype(jnp.bfloat16)
    b1f = sh1.reshape(1, Cout).astype(jnp.float32)
    b3f = sh3.reshape(1, Cout).astype(jnp.float32)

    vmem_limit, budget = _vmem_limits()
    tj = _pick_row_tile(N, H, W, Cin, Cout, budget)
    n_row_tiles = H // tj

    # TODO(synk): for very small Cin a (N, H, Cin, W) input layout would make the
    # input DMAs lane-dense; the NHWC path is kept for simplicity (input is the
    # smallest tensor in this head).
    x_nhwc = jnp.transpose(x_nchw, (0, 2, 3, 1))

    # Output is NCHW with the spatial axes flattened so each row tile is one
    # contiguous, lane-dense (Cout, 4*tj*W) block; the final reshape is metadata-only.
    out_flat = pl.pallas_call(
        _fused_kernel,
        out_shape=jax.ShapeDtypeStruct((N, Cout, 4 * H * W), x_nchw.dtype),
        grid=(N, n_row_tiles),
        in_specs=[
            # input row j0-1 (edge-clamped), rows [j0, j0+tj), row j0+tj (edge-clamped)
            pl.BlockSpec((1, 1, W, Cin),
                         lambda n, i: (n, jnp.maximum(i * tj - 1, 0), 0, 0)),
            pl.BlockSpec((1, tj, W, Cin), lambda n, i: (n, i, 0, 0)),
            pl.BlockSpec((1, 1, W, Cin),
                         lambda n, i: (n, jnp.minimum(i * tj + tj, H - 1), 0, 0)),
            pl.BlockSpec((Cin, Cout), lambda n, i: (0, 0)),
            pl.BlockSpec((1, Cout), lambda n, i: (0, 0)),
            pl.BlockSpec((9 * Cout, Cout), lambda n, i: (0, 0)),
            pl.BlockSpec((1, Cout), lambda n, i: (0, 0)),
        ],
        out_specs=pl.BlockSpec((1, Cout, 4 * tj * W), lambda n, i: (n, 0, i)),
        compiler_params=pltpu.CompilerParams(
            dimension_semantics=("parallel", "parallel"),
            vmem_limit_bytes=vmem_limit,
        ),
    )(x_nhwc, x_nhwc, x_nhwc, w1f, b1f, w3f, b3f)

    return out_flat.reshape(N, Cout, 2 * H, 2 * W)


# ------------------------------ pure-JAX reference -------------------------------

def _upsample2x_ref(z):
    # bilinear, scale factor 2, align_corners=False (matches torch.nn.functional)
    def interp(arr, axis):
        size_in = arr.shape[axis]
        src = (jnp.arange(2 * size_in, dtype=jnp.float32) + 0.5) / 2.0 - 0.5
        src = jnp.clip(src, 0.0, size_in - 1.0)
        lo = jnp.floor(src).astype(jnp.int32)
        hi = jnp.minimum(lo + 1, size_in - 1)
        t = src - lo.astype(jnp.float32)
        shape = [1] * arr.ndim
        shape[axis] = 2 * size_in
        t = t.reshape(shape)
        return jnp.take(arr, lo, axis=axis) * (1.0 - t) + jnp.take(arr, hi, axis=axis) * t

    return interp(interp(z, 1), 2)


def _reference_forward(params, x_nchw):
    s1, sh1 = _fold_bn(*params["bn1"])
    s3, sh3 = _fold_bn(*params["bn3"])
    x = jnp.transpose(x_nchw, (0, 2, 3, 1)).astype(jnp.float32)
    y = jnp.einsum("nhwc,cd->nhwd", x, params["w1"],
                   precision=jax.lax.Precision.HIGHEST)
    y = jnp.maximum(y * s1 + sh1, 0.0)
    y = _upsample2x_ref(y)
    z = jax.lax.conv_general_dilated(
        y, params["w3"], window_strides=(1, 1), padding=((1, 1), (1, 1)),
        dimension_numbers=("NHWC", "HWIO", "NHWC"),
        precision=jax.lax.Precision.HIGHEST)
    z = jnp.maximum(z * s3 + sh3, 0.0)
    return jnp.transpose(z, (0, 3, 1, 2))


# ----------------------------------- params --------------------------------------

def init_params(key, in_channels, out_channels, dtype=jnp.float32):
    ks = jax.random.split(key, 4)
    # ConvModule with a norm layer => conv has no bias.  Weights in HWIO layout.
    w1 = jax.random.normal(ks[0], (in_channels, out_channels), dtype) / jnp.sqrt(
        jnp.asarray(in_channels, dtype))
    w3 = jax.random.normal(ks[1], (3, 3, out_channels, out_channels), dtype) / jnp.sqrt(
        jnp.asarray(9 * out_channels, dtype))

    def bn(k):
        a, b, c, d = jax.random.split(k, 4)
        gamma = 1.0 + 0.1 * jax.random.normal(a, (out_channels,), dtype)
        beta = 0.1 * jax.random.normal(b, (out_channels,), dtype)
        mean = 0.1 * jax.random.normal(c, (out_channels,), dtype)
        var = 1.0 + 0.1 * jax.random.uniform(d, (out_channels,), dtype)
        return gamma, beta, mean, var

    return dict(w1=w1, bn1=bn(ks[2]), w3=w3, bn3=bn(ks[3]))


if __name__ == "__main__":
    key = jax.random.PRNGKey(0)
    kp, kx = jax.random.split(key)
    in_channels, out_channels = 4, 8
    N, H, W = 2, 16, 16

    params = init_params(kp, in_channels, out_channels)
    x = jax.random.normal(kx, (N, in_channels, H, W), jnp.float32)

    out = jax.jit(classifier_forward)(params, x)
    out = jax.block_until_ready(out)

    assert out.shape == (N, out_channels, 2 * H, 2 * W), out.shape
    assert bool(jnp.isfinite(out).all())

    ref = _reference_forward(params, x)
    err = float(jnp.max(jnp.abs(out - ref)))
    # Tolerance sized for bf16 MXU operands (f32 reference); indexing/layout bugs
    # produce O(1) errors and are still caught.
    assert err < 5e-2, f"max |kernel - reference| = {err}"
    print("KERNEL_OK")
</pallas_src>

<mosaic_0001>
module attributes {stable_mosaic.version = 11 : i64} {
  func.func @_fused_kernel(%arg0: i32, %arg1: i32, %arg2: memref<1x1x16x4xf32, #tpu.memory_space<vmem>>, %arg3: memref<1x8x16x4xf32, #tpu.memory_space<vmem>>, %arg4: memref<1x1x16x4xf32, #tpu.memory_space<vmem>>, %arg5: memref<4x8xbf16, #tpu.memory_space<vmem>>, %arg6: memref<1x8xf32, #tpu.memory_space<vmem>>, %arg7: memref<72x8xbf16, #tpu.memory_space<vmem>>, %arg8: memref<1x8xf32, #tpu.memory_space<vmem>>, %arg9: memref<1x8x512xf32, #tpu.memory_space<vmem>>) attributes {dimension_semantics = [#tpu.dimension_semantics<parallel>, #tpu.dimension_semantics<parallel>], iteration_bounds = array<i64: 2, 2>, scalar_prefetch = 0 : i64, scratch_operands = 0 : i64, tpu.core_type = #tpu.core_type<tc>, window_params = [{transform_indices = @transform_0, window_bounds = array<i64: 1, 1, 16, 4>}, {transform_indices = @transform_1, window_bounds = array<i64: 1, 8, 16, 4>}, {transform_indices = @transform_2, window_bounds = array<i64: 1, 1, 16, 4>}, {pipeline_mode = #tpu.pipeline_mode<synchronous>, transform_indices = @transform_3, window_bounds = array<i64: 4, 8>}, {pipeline_mode = #tpu.pipeline_mode<synchronous>, transform_indices = @transform_4, window_bounds = array<i64: 1, 8>}, {pipeline_mode = #tpu.pipeline_mode<synchronous>, transform_indices = @transform_5, window_bounds = array<i64: 72, 8>}, {pipeline_mode = #tpu.pipeline_mode<synchronous>, transform_indices = @transform_6, window_bounds = array<i64: 1, 8>}, {transform_indices = @transform_7, window_bounds = array<i64: 1, 8, 512>}]} {
    %c0 = arith.constant 0 : index
    %c0_0 = arith.constant 0 : index
    %c0_1 = arith.constant 0 : index
    %c0_2 = arith.constant 0 : index
    %0 = vector.load %arg2[%c0, %c0_0, %c0_1, %c0_2] : memref<1x1x16x4xf32, #tpu.memory_space<vmem>>, vector<1x1x16x4xf32>
    %1 = vector.shape_cast %0 : vector<1x1x16x4xf32> to vector<1x16x4xf32>
    %c0_3 = arith.constant 0 : index
    %c0_4 = arith.constant 0 : index
    %c0_5 = arith.constant 0 : index
    %c0_6 = arith.constant 0 : index
    %2 = vector.load %arg3[%c0_3, %c0_4, %c0_5, %c0_6] : memref<1x8x16x4xf32, #tpu.memory_space<vmem>>, vector<1x8x16x4xf32>
    %3 = vector.shape_cast %2 : vector<1x8x16x4xf32> to vector<8x16x4xf32>
    %c0_7 = arith.constant 0 : index
    %c0_8 = arith.constant 0 : index
    %c0_9 = arith.constant 0 : index
    %c0_10 = arith.constant 0 : index
    %4 = vector.load %arg4[%c0_7, %c0_8, %c0_9, %c0_10] : memref<1x1x16x4xf32, #tpu.memory_space<vmem>>, vector<1x1x16x4xf32>
    %5 = vector.shape_cast %4 : vector<1x1x16x4xf32> to vector<1x16x4xf32>
    %6 = tpu.concatenate %1, %3, %5 in 0 : vector<1x16x4xf32>, vector<8x16x4xf32>, vector<1x16x4xf32> -> vector<10x16x4xf32>
    %7 = vector.shape_cast %6 : vector<10x16x4xf32> to vector<160x4xf32>
    %8 = arith.truncf %7 : vector<160x4xf32> to vector<160x4xbf16>
    %c0_11 = arith.constant 0 : index
    %c0_12 = arith.constant 0 : index
    %9 = vector.load %arg5[%c0_11, %c0_12] : memref<4x8xbf16, #tpu.memory_space<vmem>>, vector<4x8xbf16>
    %cst = arith.constant dense<0.000000e+00> : vector<160x8xf32>
    %10 = tpu.matmul %8, %9, %cst {dimension_numbers = #tpu.dot_dimension_numbers<[1], [0], [0], [1], [0, 0, 1, 1], [], []>} : vector<160x4xbf16>, vector<4x8xbf16>, vector<160x8xf32> -> vector<160x8xf32>
    %c0_13 = arith.constant 0 : index
    %c0_14 = arith.constant 0 : index
    %11 = vector.load %arg6[%c0_13, %c0_14] : memref<1x8xf32, #tpu.memory_space<vmem>>, vector<1x8xf32>
    %12 = vector.broadcast %11 : vector<1x8xf32> to vector<160x8xf32>
    %13 = arith.addf %10, %12 : vector<160x8xf32>
    %cst_15 = arith.constant 0.000000e+00 : f32
    %14 = vector.broadcast %cst_15 : f32 to vector<160x8xf32>
    %15 = arith.maximumf %13, %14 : vector<160x8xf32>
    %16 = vector.shape_cast %15 : vector<160x8xf32> to vector<10x16x8xf32>
    %17 = vector.extract_strided_slice %16 {offsets = [0, 0, 0], sizes = [9, 16, 8], strides = [1, 1, 1]} : vector<10x16x8xf32> to vector<9x16x8xf32>
    %18 = vector.extract_strided_slice %16 {offsets = [1, 0, 0], sizes = [9, 16, 8], strides = [1, 1, 1]} : vector<10x16x8xf32> to vector<9x16x8xf32>
    %cst_16 = arith.constant 7.500000e-01 : f32
    %19 = vector.broadcast %cst_16 : f32 to vector<9x16x8xf32>
    %20 = arith.mulf %19, %17 : vector<9x16x8xf32>
    %cst_17 = arith.constant 2.500000e-01 : f32
    %21 = vector.broadcast %cst_17 : f32 to vector<9x16x8xf32>
    %22 = arith.mulf %21, %18 : vector<9x16x8xf32>
    %23 = arith.addf %20, %22 : vector<9x16x8xf32>
    %cst_18 = arith.constant 2.500000e-01 : f32
    %24 = vector.broadcast %cst_18 : f32 to vector<9x16x8xf32>
    %25 = arith.mulf %24, %17 : vector<9x16x8xf32>
    %cst_19 = arith.constant 7.500000e-01 : f32
    %26 = vector.broadcast %cst_19 : f32 to vector<9x16x8xf32>
    %27 = arith.mulf %26, %18 : vector<9x16x8xf32>
    %28 = arith.addf %25, %27 : vector<9x16x8xf32>
    %29 = vector.shape_cast %23 : vector<9x16x8xf32> to vector<9x1x16x8xf32>
    %30 = vector.shape_cast %28 : vector<9x16x8xf32> to vector<9x1x16x8xf32>
    %31 = tpu.concatenate %29, %30 in 1 : vector<9x1x16x8xf32>, vector<9x1x16x8xf32> -> vector<9x2x16x8xf32>
    %32 = vector.shape_cast %31 : vector<9x2x16x8xf32> to vector<18x16x8xf32>
    %c0_i32 = arith.constant 0 : i32
    %33 = arith.cmpi eq, %arg1, %c0_i32 : i32
    %cst_20 = arith.constant 0.000000e+00 : f32
    %cst_21 = arith.constant 1.000000e+00 : f32
    %34 = arith.select %33, %cst_20, %cst_21 : f32
    %c1_i32 = arith.constant 1 : i32
    %35 = arith.cmpi eq, %arg1, %c1_i32 : i32
    %cst_22 = arith.constant 0.000000e+00 : f32
    %cst_23 = arith.constant 1.000000e+00 : f32
    %36 = arith.select %35, %cst_22, %cst_23 : f32
    %37 = vector.extract_strided_slice %32 {offsets = [0, 0, 0], sizes = [1, 16, 8], strides = [1, 1, 1]} : vector<18x16x8xf32> to vector<1x16x8xf32>
    %38 = vector.broadcast %34 : f32 to vector<1x16x8xf32>
    %39 = arith.mulf %37, %38 : vector<1x16x8xf32>
    %40 = vector.extract_strided_slice %32 {offsets = [1, 0, 0], sizes = [16, 16, 8], strides = [1, 1, 1]} : vector<18x16x8xf32> to vector<16x16x8xf32>
    %41 = vector.extract_strided_slice %32 {offsets = [17, 0, 0], sizes = [1, 16, 8], strides = [1, 1, 1]} : vector<18x16x8xf32> to vector<1x16x8xf32>
    %42 = vector.broadcast %36 : f32 to vector<1x16x8xf32>
    %43 = arith.mulf %41, %42 : vector<1x16x8xf32>
    %44 = tpu.concatenate %39, %40, %43 in 0 : vector<1x16x8xf32>, vector<16x16x8xf32>, vector<1x16x8xf32> -> vector<18x16x8xf32>
    %45 = vector.extract_strided_slice %44 {offsets = [0, 0, 0], sizes = [18, 1, 8], strides = [1, 1, 1]} : vector<18x16x8xf32> to vector<18x1x8xf32>
    %46 = vector.extract_strided_slice %44 {offsets = [0, 0, 0], sizes = [18, 15, 8], strides = [1, 1, 1]} : vector<18x16x8xf32> to vector<18x15x8xf32>
    %47 = tpu.concatenate %45, %46 in 1 : vector<18x1x8xf32>, vector<18x15x8xf32> -> vector<18x16x8xf32>
    %48 = vector.extract_strided_slice %44 {offsets = [0, 1, 0], sizes = [18, 15, 8], strides = [1, 1, 1]} : vector<18x16x8xf32> to vector<18x15x8xf32>
    %49 = vector.extract_strided_slice %44 {offsets = [0, 15, 0], sizes = [18, 1, 8], strides = [1, 1, 1]} : vector<18x16x8xf32> to vector<18x1x8xf32>
    %50 = tpu.concatenate %48, %49 in 1 : vector<18x15x8xf32>, vector<18x1x8xf32> -> vector<18x16x8xf32>
    %cst_24 = arith.constant 2.500000e-01 : f32
    %51 = vector.broadcast %cst_24 : f32 to vector<18x16x8xf32>
    %52 = arith.mulf %51, %47 : vector<18x16x8xf32>
    %cst_25 = arith.constant 7.500000e-01 : f32
    %53 = vector.broadcast %cst_25 : f32 to vector<18x16x8xf32>
    %54 = arith.mulf %53, %44 : vector<18x16x8xf32>
    %55 = arith.addf %52, %54 : vector<18x16x8xf32>
    %56 = arith.truncf %55 : vector<18x16x8xf32> to vector<18x16x8xbf16>
    %cst_26 = arith.constant 7.500000e-01 : f32
    %57 = vector.broadcast %cst_26 : f32 to vector<18x16x8xf32>
    %58 = arith.mulf %57, %44 : vector<18x16x8xf32>
    %cst_27 = arith.constant 2.500000e-01 : f32
    %59 = vector.broadcast %cst_27 : f32 to vector<18x16x8xf32>
    %60 = arith.mulf %59, %50 : vector<18x16x8xf32>
    %61 = arith.addf %58, %60 : vector<18x16x8xf32>
    %62 = arith.truncf %61 : vector<18x16x8xf32> to vector<18x16x8xbf16>
    %cst_28 = arith.constant 0.000000e+00 : bf16
    %63 = vector.broadcast %cst_28 : bf16 to vector<18x1x8xbf16>
    %64 = vector.extract_strided_slice %62 {offsets = [0, 0, 0], sizes = [18, 15, 8], strides = [1, 1, 1]} : vector<18x16x8xbf16> to vector<18x15x8xbf16>
    %65 = tpu.concatenate %63, %64 in 1 : vector<18x1x8xbf16>, vector<18x15x8xbf16> -> vector<18x16x8xbf16>
    %66 = vector.extract_strided_slice %56 {offsets = [0, 1, 0], sizes = [18, 15, 8], strides = [1, 1, 1]} : vector<18x16x8xbf16> to vector<18x15x8xbf16>
    %67 = tpu.concatenate %66, %63 in 1 : vector<18x15x8xbf16>, vector<18x1x8xbf16> -> vector<18x16x8xbf16>
    %68 = vector.extract_strided_slice %65 {offsets = [0, 0, 0], sizes = [16, 16, 8], strides = [1, 1, 1]} : vector<18x16x8xbf16> to vector<16x16x8xbf16>
    %69 = vector.extract_strided_slice %56 {offsets = [0, 0, 0], sizes = [16, 16, 8], strides = [1, 1, 1]} : vector<18x16x8xbf16> to vector<16x16x8xbf16>
    %70 = vector.extract_strided_slice %62 {offsets = [0, 0, 0], sizes = [16, 16, 8], strides = [1, 1, 1]} : vector<18x16x8xbf16> to vector<16x16x8xbf16>
    %71 = vector.extract_strided_slice %56 {offsets = [0, 0, 0], sizes = [16, 16, 8], strides = [1, 1, 1]} : vector<18x16x8xbf16> to vector<16x16x8xbf16>
    %72 = vector.extract_strided_slice %62 {offsets = [0, 0, 0], sizes = [16, 16, 8], strides = [1, 1, 1]} : vector<18x16x8xbf16> to vector<16x16x8xbf16>
    %73 = vector.extract_strided_slice %67 {offsets = [0, 0, 0], sizes = [16, 16, 8], strides = [1, 1, 1]} : vector<18x16x8xbf16> to vector<16x16x8xbf16>
    %74 = vector.extract_strided_slice %65 {offsets = [1, 0, 0], sizes = [16, 16, 8], strides = [1, 1, 1]} : vector<18x16x8xbf16> to vector<16x16x8xbf16>
    %75 = vector.extract_strided_slice %56 {offsets = [1, 0, 0], sizes = [16, 16, 8], strides = [1, 1, 1]} : vector<18x16x8xbf16> to vector<16x16x8xbf16>
    %76 = vector.extract_strided_slice %62 {offsets = [1, 0, 0], sizes = [16, 16, 8], strides = [1, 1, 1]} : vector<18x16x8xbf16> to vector<16x16x8xbf16>
    %77 = vector.extract_strided_slice %56 {offsets = [1, 0, 0], sizes = [16, 16, 8], strides = [1, 1, 1]} : vector<18x16x8xbf16> to vector<16x16x8xbf16>
    %78 = vector.extract_strided_slice %62 {offsets = [1, 0, 0], sizes = [16, 16, 8], strides = [1, 1, 1]} : vector<18x16x8xbf16> to vector<16x16x8xbf16>
    %79 = vector.extract_strided_slice %67 {offsets = [1, 0, 0], sizes = [16, 16, 8], strides = [1, 1, 1]} : vector<18x16x8xbf16> to vector<16x16x8xbf16>
    %80 = vector.extract_strided_slice %65 {offsets = [2, 0, 0], sizes = [16, 16, 8], strides = [1, 1, 1]} : vector<18x16x8xbf16> to vector<16x16x8xbf16>
    %81 = vector.extract_strided_slice %56 {offsets = [2, 0, 0], sizes = [16, 16, 8], strides = [1, 1, 1]} : vector<18x16x8xbf16> to vector<16x16x8xbf16>
    %82 = vector.extract_strided_slice %62 {offsets = [2, 0, 0], sizes = [16, 16, 8], strides = [1, 1, 1]} : vector<18x16x8xbf16> to vector<16x16x8xbf16>
    %83 = vector.extract_strided_slice %56 {offsets = [2, 0, 0], sizes = [16, 16, 8], strides = [1, 1, 1]} : vector<18x16x8xbf16> to vector<16x16x8xbf16>
    %84 = vector.extract_strided_slice %62 {offsets = [2, 0, 0], sizes = [16, 16, 8], strides = [1, 1, 1]} : vector<18x16x8xbf16> to vector<16x16x8xbf16>
    %85 = vector.extract_strided_slice %67 {offsets = [2, 0, 0], sizes = [16, 16, 8], strides = [1, 1, 1]} : vector<18x16x8xbf16> to vector<16x16x8xbf16>
    %86 = tpu.concatenate %68, %69, %70, %74, %75, %76, %80, %81, %82 in 2 : vector<16x16x8xbf16>, vector<16x16x8xbf16>, vector<16x16x8xbf16>, vector<16x16x8xbf16>, vector<16x16x8xbf16>, vector<16x16x8xbf16>, vector<16x16x8xbf16>, vector<16x16x8xbf16>, vector<16x16x8xbf16> -> vector<16x16x72xbf16>
    %87 = vector.shape_cast %86 : vector<16x16x72xbf16> to vector<256x72xbf16>
    %88 = tpu.concatenate %71, %72, %73, %77, %78, %79, %83, %84, %85 in 2 : vector<16x16x8xbf16>, vector<16x16x8xbf16>, vector<16x16x8xbf16>, vector<16x16x8xbf16>, vector<16x16x8xbf16>, vector<16x16x8xbf16>, vector<16x16x8xbf16>, vector<16x16x8xbf16>, vector<16x16x8xbf16> -> vector<16x16x72xbf16>
    %89 = vector.shape_cast %88 : vector<16x16x72xbf16> to vector<256x72xbf16>
    %c0_29 = arith.constant 0 : index
    %c0_30 = arith.constant 0 : index
    %90 = vector.load %arg7[%c0_29, %c0_30] : memref<72x8xbf16, #tpu.memory_space<vmem>>, vector<72x8xbf16>
    %c0_31 = arith.constant 0 : index
    %c0_32 = arith.constant 0 : index
    %91 = vector.load %arg8[%c0_31, %c0_32] : memref<1x8xf32, #tpu.memory_space<vmem>>, vector<1x8xf32>
    %cst_33 = arith.constant dense<0.000000e+00> : vector<256x8xf32>
    %92 = tpu.matmul %87, %90, %cst_33 {dimension_numbers = #tpu.dot_dimension_numbers<[1], [0], [0], [1], [0, 0, 1, 1], [], []>} : vector<256x72xbf16>, vector<72x8xbf16>, vector<256x8xf32> -> vector<256x8xf32>
    %93 = vector.broadcast %91 : vector<1x8xf32> to vector<256x8xf32>
    %94 = arith.addf %92, %93 : vector<256x8xf32>
    %cst_34 = arith.constant 0.000000e+00 : f32
    %95 = vector.broadcast %cst_34 : f32 to vector<256x8xf32>
    %96 = arith.maximumf %94, %95 : vector<256x8xf32>
    %cst_35 = arith.constant dense<0.000000e+00> : vector<256x8xf32>
    %97 = tpu.matmul %89, %90, %cst_35 {dimension_numbers = #tpu.dot_dimension_numbers<[1], [0], [0], [1], [0, 0, 1, 1], [], []>} : vector<256x72xbf16>, vector<72x8xbf16>, vector<256x8xf32> -> vector<256x8xf32>
    %98 = vector.broadcast %91 : vector<1x8xf32> to vector<256x8xf32>
    %99 = arith.addf %97, %98 : vector<256x8xf32>
    %cst_36 = arith.constant 0.000000e+00 : f32
    %100 = vector.broadcast %cst_36 : f32 to vector<256x8xf32>
    %101 = arith.maximumf %99, %100 : vector<256x8xf32>
    %102 = vector.shape_cast %96 : vector<256x8xf32> to vector<16x16x8xf32>
    %103 = vector.shape_cast %101 : vector<256x8xf32> to vector<16x16x8xf32>
    %104 = vector.shape_cast %102 : vector<16x16x8xf32> to vector<16x16x1x8xf32>
    %105 = vector.shape_cast %103 : vector<16x16x8xf32> to vector<16x16x1x8xf32>
    %106 = tpu.concatenate %104, %105 in 2 : vector<16x16x1x8xf32>, vector<16x16x1x8xf32> -> vector<16x16x2x8xf32>
    %107 = vector.shape_cast %106 : vector<16x16x2x8xf32> to vector<512x8xf32>
    %108 = tpu.transpose %107, [1, 0] : vector<512x8xf32> -> vector<8x512xf32>
    %c0_37 = arith.constant 0 : index
    %c0_38 = arith.constant 0 : index
    %c0_39 = arith.constant 0 : index
    %109 = vector.load %arg9[%c0_37, %c0_38, %c0_39] : memref<1x8x512xf32, #tpu.memory_space<vmem>>, vector<1x8x512xf32>
    %110 = vector.shape_cast %109 : vector<1x8x512xf32> to vector<8x512xf32>
    %111 = vector.shape_cast %108 : vector<8x512xf32> to vector<1x8x512xf32>
    tpu.vector_store %arg9[%c0_37, %c0_38, %c0_39], %111 {strides = array<i32>} : memref<1x8x512xf32, #tpu.memory_space<vmem>>, vector<1x8x512xf32>,
    return
  }
  func.func @transform_0(%arg0: i32, %arg1: i32) -> (i32, i32, i32, i32) {
    %c8_i32 = arith.constant 8 : i32
    %0 = arith.muli %arg1, %c8_i32 : i32
    %c1_i32 = arith.constant 1 : i32
    %1 = arith.subi %0, %c1_i32 : i32
    %c0_i32 = arith.constant 0 : i32
    %2 = arith.maxsi %1, %c0_i32 : i32
    %c0_i32_0 = arith.constant 0 : i32
    %c0_i32_1 = arith.constant 0 : i32
    %c0_i32_2 = arith.constant 0 : i32
    return %arg0, %2, %c0_i32_0, %c0_i32_1 : i32, i32, i32, i32
  }
  func.func @transform_1(%arg0: i32, %arg1: i32) -> (i32, i32, i32, i32) {
    %c0_i32 = arith.constant 0 : i32
    %c0_i32_0 = arith.constant 0 : i32
    %c0_i32_1 = arith.constant 0 : i32
    return %arg0, %arg1, %c0_i32, %c0_i32_0 : i32, i32, i32, i32
  }
  func.func @transform_2(%arg0: i32, %arg1: i32) -> (i32, i32, i32, i32) {
    %c8_i32 = arith.constant 8 : i32
    %0 = arith.muli %arg1, %c8_i32 : i32
    %c8_i32_0 = arith.constant 8 : i32
    %1 = arith.addi %0, %c8_i32_0 : i32
    %c15_i32 = arith.constant 15 : i32
    %2 = arith.minsi %1, %c15_i32 : i32
    %c0_i32 = arith.constant 0 : i32
    %c0_i32_1 = arith.constant 0 : i32
    %c0_i32_2 = arith.constant 0 : i32
    return %arg0, %2, %c0_i32, %c0_i32_1 : i32, i32, i32, i32
  }
  func.func @transform_3(%arg0: i32, %arg1: i32) -> (i32, i32) {
    %c0_i32 = arith.constant 0 : i32
    %c0_i32_0 = arith.constant 0 : i32
    %c0_i32_1 = arith.constant 0 : i32
    return %c0_i32, %c0_i32_0 : i32, i32
  }
  func.func @transform_4(%arg0: i32, %arg1: i32) -> (i32, i32) {
    %c0_i32 = arith.constant 0 : i32
    %c0_i32_0 = arith.constant 0 : i32
    %c0_i32_1 = arith.constant 0 : i32
    return %c0_i32, %c0_i32_0 : i32, i32
  }
  func.func @transform_5(%arg0: i32, %arg1: i32) -> (i32, i32) {
    %c0_i32 = arith.constant 0 : i32
    %c0_i32_0 = arith.constant 0 : i32
    %c0_i32_1 = arith.constant 0 : i32
    return %c0_i32, %c0_i32_0 : i32, i32
  }
  func.func @transform_6(%arg0: i32, %arg1: i32) -> (i32, i32) {
    %c0_i32 = arith.constant 0 : i32
    %c0_i32_0 = arith.constant 0 : i32
    %c0_i32_1 = arith.constant 0 : i32
    return %c0_i32, %c0_i32_0 : i32, i32
  }
  func.func @transform_7(%arg0: i32, %arg1: i32) -> (i32, i32, i32) {
    %c0_i32 = arith.constant 0 : i32
    %c0_i32_0 = arith.constant 0 : i32
    return %arg0, %c0_i32, %arg1 : i32, i32, i32
  }
}

</mosaic_0001>

<bundles_post_ra>
// kernel: classifier_forward.1
= control target key start
LH: loop header
LB: loop body
LE: loop exit
PB: predicated region body
PF: predicated region fallthrough
CT: control target
= control target key end

     0   :  { %s5801_s24 = smov 0   ;;  %s5803_s25 = smov 0   ;;  %s8432_s0 = inlined_call_operand.vmem [shape: f32[2,16,16,4], index: 0, kind: input, shape index: {}, may-alias: {0,1,2}]   ;;  %s8433_s1 = inlined_call_operand.vmem [shape: f32[2,16,16,4], index: 1, kind: input, shape index: {}, may-alias: {0,1,2}]   ;;  %s8434_s2 = inlined_call_operand.vmem [shape: f32[2,16,16,4], index: 2, kind: input, shape index: {}, may-alias: {0,1,2}]   ;;  %s8435_s3 = inlined_call_operand.vmem [shape: bf16[4,8], index: 3, kind: input, shape index: {}]   ;;  %s8436_s4 = inlined_call_operand.vmem [shape: f32[1,8], index: 4, kind: input, shape index: {}]   ;;  %s8437_s5 = inlined_call_operand.vmem [shape: bf16[72,8], index: 5, kind: input, shape index: {}]   ;;  %s8438_s6 = inlined_call_operand.vmem [shape: f32[1,8], index: 6, kind: input, shape index: {}]   ;;  %s8439_s7 = inlined_call_operand.vmem [shape: f32[2,8,1024], index: 7, kind: output, shape index: {}]  }
   0x1   :  { %s5805_s26 = smov 0   ;;  %s5807_s27 = smov 0  }
   0x2   :  { %s5809_s28 = smov 0  }
   0x3 LB: > { %s26_s29 = sadd.s32 1, %s5743_s26  ;;  %s29_s30 = sadd.s32 1, %s5747_s27  ;;  %s5751_s28 = sphi %s5809_s28, %s17_s28   ;;  %s5747_s27 = sphi %s5807_s27, %s8687_s27   ;;  %s5743_s26 = sphi %s5805_s26, %s8686_s26   ;;  %s5739_s25 = sphi %s5803_s25, %s8685_s25   ;;  %s5735_s24 = sphi %s5801_s24, %s8684_s24  }
   0x4   : > { %p27_p0 = scmp.ge.s32.totalorder %s26_s29, 2  ;;  %p5559_p1 = scmp.ge.s32.totalorder %s5751_s28, 1 }
   0x5   : > { %p323_p2 = scmp.lt.s32.totalorder %s5751_s28, 5 }
   0x6   : > { %s8689_s29 = smov (%p27_p0, %s26_s29), 0  ;;  %s8691_s30 = smov (!%p27_p0, %s29_s30), %s5747_s27 }
   0x7   : > { %p324_p3 = pnand %p5559_p1, %p323_p2  ;;  %p31_p4 = scmp.ge.s32.totalorder %s8691_s30, 2 }
   0x9   : > { %s8693_s30 = smov (%p31_p4, %s8691_s30), 0  ;;  %327 = sbr.rel (%p324_p3) target bundleno = 1350 (0x546), region = 48 }
   0xe   : > { %v476_v0 = vld [vmem:[%s8435_s3] sm:$0x3]  ;;  %vm512_vm0 = vcmask 1041408   ;;  %s5837_s10 = sshll.u32 %s5735_s24, 3  ;;  %p394_p5 = scmp.lt.s32.totalorder %s5739_s25, 1  ;;  %vm481_vm1 = vcmask 31744  }
   0xf   : > { %v514_v1 = vsel %vm512_vm0, %v476_v0, 0  ;;  %s5561_s11 = sadd.s32 4294967295, %s5837_s10  ;;  %p410_p6 = scmp.lt.s32.totalorder %s5837_s10, 15  ;;  %v5879_v25 = vld [vmem:[%s8436_s4] ss:$0 sm:$0xff]  ;;  %vm717_vm2 = vcmask 1040384  }
  0x10   : > { %523 = vmatpush.bf16.msra.mxu0 %v514_v1  ;;  %p392_p7 = scmp.gt.s32.totalorder %s5561_s11, 0  ;;  %p5562_p8 = scmp.lt.s32.totalorder %s5561_s11, 15  ;;  %vm826_vm3 = vcmask 1046528   ;;  %vm1422_vm4 = vsmask.f32 256  ;;  %vm2853_vm6 = vcmask 1043456  }
  0x11   : > { %s8695_s25 = smov (!%p394_p5, %s5739_s25), 1  ;;  %p671_p9 = scmp.eq.s32.totalorder %s5735_s24, 0  ;;  %vm5960_vm5 = vmand %vm717_vm2, %vm1422_vm4  ;;  %vm1970_vm7 = vcmask 64512   ;;  %vm2019_vm8 = vcmask 130048   ;;  %vm2052_vm9 = vcmask 195584   ;;  %vm2085_vm10 = vcmask 261120  }
  0x12   : > { %s8697_s11 = smov (!%p392_p7, %s5561_s11), 0  ;;  %s5844_s12 = sshll.u32 %s8695_s25, 5  ;;  %vm2118_vm11 = vcmask 326656   ;;  %vm2151_vm12 = vcmask 392192   ;;  %vm2184_vm13 = vcmask 457728   ;;  %vm2217_vm14 = vcmask 523264  }
  0x13   : > { %s8699_s11 = smov (!%p5562_p8, %s8697_s11), 15  ;;  %s5755_s17 = smov 16   ;;  %vm2820_vm15 = vcmask 588800   ;;  %vm1676_vm0 = vcmask 1047552  }
  0x14   : > { %s411_s13 = scalar_select %p410_p6, %s5837_s10, 15 }
  0x15   : > { %s5567_s14 = sshll.u32 %s8699_s11, 1  ;;  %s5756_s18 = smov 32  }
  0x16   : > { %s400_s15 = sadd.s32 %s5844_s12, %s5567_s14  ;;  %s5571_s20 = sshll.u32 %s411_s13, 1 }
  0x17   : > { %s5569_s16 = sshll.u32 %s400_s15, 3  ;;  %s414_s21 = sadd.s32 %s5571_s20, %s5844_s12 }
  0x18   : > { %s402_s19 = scalar_lea.vmem %s8432_s0, %s5569_s16  ;;  %s5573_s22 = sshll.u32 %s414_s21, 3 }
  0x19   : > { %v446_v2 = vld [vmem:[%s402_s19] sm:$0xff]  ;;  %v447_v3 = vld [vmem:[%s402_s19 + $0x8] sm:$0xff]  ;;  %s5856_s9 = scalar_lea.vmem %s8433_s1, %s5573_s22  ;;  %s5753_s15 = smov 8  }
  0x1a   : > { %v466_v4 = vpack.c.bf16 %v447_v3, %v446_v2  ;;  %v448_v5 = vld [vmem:[%s5856_s9] sm:$0xff]  ;;  %v449_v6 = vld [vmem:[%s5856_s9 + $0x8] sm:$0xff]  ;;  %v450_v8 = vld [vmem:[%s5856_s9 + $0x10] sm:$0xff]  ;;  %s672_s14 = scalar_select %p671_p9, 0.0, 1.0 }
  0x1b   : > { %v467_v7 = vpack.c.bf16 %v449_v6, %v448_v5  ;;  %v451_v9 = vld [vmem:[%s5856_s9 + $0x18] sm:$0xff]  ;;  %v452_v11 = vld [vmem:[%s5856_s9 + $0x20] sm:$0xff]  ;;  %v453_v12 = vld [vmem:[%s5856_s9 + $0x28] sm:$0xff]  ;;  %s5754_s16 = smov 40   ;;  %s5757_s19 = smov 24  }
  0x1c   : > { %5584 = vmatmul.msk.bf16.vlgmr.msra.gmra.mxu0 %vm481_vm1, %v466_v4  ;;  %v468_v10 = vpack.c.bf16 %v451_v9, %v450_v8  ;;  %v469_v13 = vpack.c.bf16 %v453_v12, %v452_v11  ;;  %v454_v14 = vld [vmem:[%s5856_s9 + $0x30] sm:$0xff]  ;;  %v455_v15 = vld [vmem:[%s5856_s9 + $0x38] sm:$0xff]  ;;  %v456_v17 = vld [vmem:[%s5856_s9 + $0x40] sm:$0xff]  ;;  %v675_v57 = vstv %s672_s14  ;;  %s419_s20 = sadd.s32 8, %s5837_s10  ;;  %s5758_s10 = smov 64  }
  0x1d   : > { %v470_v16 = vpack.c.bf16 %v455_v15, %v454_v14  ;;  %v457_v18 = vld [vmem:[%s5856_s9 + $0x48] sm:$0xff]  ;;  %v458_v20 = vld [vmem:[%s5856_s9 + $0x50] sm:$0xff]  ;;  %v459_v21 = vld [vmem:[%s5856_s9 + $0x58] sm:$0xff]  ;;  %p6013_p10 = scmp.lt.s32.totalorder %s419_s20, 15  ;;  %s5759_s22 = smov 56  }
  0x1e   : > { %v471_v19 = vpack.c.bf16 %v457_v18, %v456_v17  ;;  %v472_v22 = vpack.c.bf16 %v459_v21, %v458_v20  ;;  %p673_p11 = scmp.eq.s32.totalorder %s5735_s24, 1 }
  0x1f   : > { %s8701_s20 = smov (!%p6013_p10, %s419_s20), 15 }
  0x20   : > { %s8703_s20 = smov (!%p6013_p10, %s8701_s20), 15 }
  0x21   : > { %s5578_s23 = sshll.u32 %s8703_s20, 1 }
  0x22   : > { %s428_s8 = sadd.s32 %s5578_s23, %s5844_s12 }
  0x23   : > { %s5580_s11 = sshll.u32 %s428_s8, 3 }
  0x24   : > { %s430_s14 = scalar_lea.vmem %s8434_s2, %s5580_s11 }
  0x25   : > { %s674_s11 = scalar_select %p673_p11, 0.0, 1.0 }
  0x2c   : > { %5585 = vmatmul.msk.bf16.gmra.mxu0 %vm481_vm1, %v467_v7 }
  0x3c   : > { %5586 = vmatmul.msk.bf16.gmra.mxu0 %vm481_vm1, %v468_v10 }
  0x4c   : > { %5587 = vmatmul.msk.bf16.gmra.mxu0 %vm481_vm1, %v469_v13 }
  0x5c   : > { %5588 = vmatmul.msk.bf16.gmra.mxu0 %vm481_vm1, %v470_v16 }
  0x6c   : > { %5589 = vmatmul.msk.bf16.gmra.mxu0 %vm481_vm1, %v471_v19 }
  0x7c   : > { %5590 = vmatmul.msk.bf16.gmra.mxu0 %vm481_vm1, %v472_v22 }
  0x99   : > { %v525_v23 = vpop.f32.mrf.mxu0 }
  0x9a   : > { %v526_v26 = vadd.f32 %v5879_v25, %v525_v23 }
  0x9c   : > { %v575_v28 = vmax.f32 %v526_v26, 0.0 }
  0x9e   : > { %v649_v31 = vmul.f32 0.25, %v575_v28  ;;  %v595_v47 = vmul.f32 0.75, %v575_v28 }
  0xa1   : > { %v527_v24 = vpop.f32.mrf.mxu0 }
  0xa2   : > { %v528_v32 = vadd.f32 %v5879_v25, %v527_v24 }
  0xa4   : > { %v576_v36 = vmax.f32 %v528_v32, 0.0 }
  0xa6   : > { %v596_v41 = vmul.f32 0.75, %v576_v36  ;;  %v650_v42 = vmul.f32 0.25, %v576_v36 }
  0xa9   : > { %v530_v27 = vpop.f32.mrf.mxu0 }
  0xaa   : > { %v531_v29 = vadd.f32 %v5879_v25, %v530_v27 }
  0xac   : > { %v577_v30 = vmax.f32 %v531_v29, 0.0 }
  0xae   : > { %v597_v33 = vmul.f32 0.75, %v577_v30  ;;  %v613_v43 = vmul.f32 0.25, %v577_v30 }
  0xb0   : > { %v653_v34 = vadd.f32 %v649_v31, %v597_v33  ;;  %v631_v53 = vadd.f32 %v613_v43, %v595_v47 }
  0xb1   : > { %v532_v35 = vpop.f32.mrf.mxu0 }
  0xb2   : > { %v721_v37 = vrot.slane %v653_v34, 7  ;;  %v533_v38 = vadd.f32 %v5879_v25, %v532_v35  ;;  %v973_v51 = vmul.f32 0.75, %v653_v34  ;;  %v830_v54 = vrot.slane %v653_v34, 1 }
  0xb3   : > { %v5893_v3 = vmul.f32 %v675_v57, %v631_v53 }
  0xb4   : > { %v809_v39 = vsel %vm717_vm2, %v653_v34, %v721_v37  ;;  %v578_v40 = vmax.f32 %v533_v38, 0.0 }
  0xb5   : > { %v937_v46 = vmul.f32 0.25, %v809_v39  ;;  %v827_v13 = vrot.slane %v5893_v3, 1  ;;  %v718_v31 = vrot.slane %v5893_v3, 7  ;;  %v971_v38 = vmul.f32 0.75, %v5893_v3 }
  0xb6   : > { %v598_v44 = vmul.f32 0.75, %v578_v40  ;;  %v614_v45 = vmul.f32 0.25, %v578_v40 }
  0xb7   : > { %v1009_v58 = vadd.f32 %v973_v51, %v937_v46 }
  0xb8   : > { %v632_v48 = vadd.f32 %v614_v45, %v596_v41  ;;  %v654_v49 = vadd.f32 %v650_v42, %v598_v44 }
  0xb9   : > { %v535_v50 = vpop.f32.mrf.mxu0  ;;  %v1045_v5 = vpack.c.bf16 %v1009_v58, %v1009_v58 }
  0xba   : > { %v536_v52 = vadd.f32 %v5879_v25, %v535_v50  ;;  %v722_v55 = vrot.slane %v654_v49, 7  ;;  %v831_v56 = vrot.slane %v654_v49, 1  ;;  %v5888_v59 = vmul.f32 %v675_v57, %v632_v48 }
  0xbb   : > { %v974_v62 = vmul.f32 0.75, %v654_v49  ;;  %v1480_v15 = vunpack.c.l.b16 %v1045_v5 }
  0xbc   : > { %v723_v60 = vsel %vm717_vm2, %v721_v37, %v722_v55  ;;  %v832_v61 = vsel %vm826_vm3, %v830_v54, %v831_v56  ;;  %v918_v63 = vsel %vm826_vm3, %v831_v56, %v654_v49  ;;  %v579_v2 = vmax.f32 %v536_v52, 0.0 }
  0xbd   : > { %v938_v0 = vmul.f32 0.25, %v723_v60  ;;  %v1081_v1 = vmul.f32 0.25, %v832_v61  ;;  %v1082_v4 = vmul.f32 0.25, %v918_v63  ;;  %v828_v8 = vrot.slane %v5888_v59, 1 }
  0xbe   : > { %v5896_v12 = vmul.f32 0.25, %v579_v2  ;;  %v5900_v20 = vmul.f32 0.75, %v579_v2  ;;  %v972_v41 = vmul.f32 0.75, %v5888_v59  ;;  %v719_v48 = vrot.slane %v5888_v59, 7 }
  0xbf   : > { %v1010_v6 = vadd.f32 %v974_v62, %v938_v0  ;;  %v1117_v7 = vadd.f32 %v1081_v1, %v973_v51  ;;  %v1118_v9 = vadd.f32 %v1082_v4, %v974_v62  ;;  %v829_v21 = vsel %vm826_vm3, %v827_v13, %v828_v8 }
  0xc0   : > { %v633_v22 = vadd.f32 %v5896_v12, %v597_v33  ;;  %v917_v27 = vsel %vm826_vm3, %v828_v8, %v5888_v59  ;;  %v5918_v32 = vadd.f32 %v613_v43, %v5900_v20  ;;  %v1079_v33 = vmul.f32 0.25, %v829_v21 }
  0xc1   : > { %v537_v10 = vpop.f32.mrf.mxu0  ;;  %v1046_v11 = vpack.c.bf16 %v1010_v6, %v1010_v6  ;;  %v1154_v14 = vpack.c.bf16 %v1118_v9, %v1118_v9  ;;  %v1153_v18 = vpack.c.bf16 %v1117_v7, %v1117_v7  ;;  %v1080_v37 = vmul.f32 0.25, %v917_v27 }
  0xc2   : > { %v538_v17 = vadd.f32 %v5879_v25, %v537_v10  ;;  %v724_v34 = vrot.slane %v633_v22, 7  ;;  %v1115_v42 = vadd.f32 %v1079_v33, %v971_v38  ;;  %v808_v43 = vsel %vm717_vm2, %v5893_v3, %v718_v31 }
  0xc3   : > { %v1481_v16 = vunpack.c.l.b16 %v1046_v11  ;;  %v1226_v19 = vunpack.c.l.b16 %v1154_v14  ;;  %v1225_v24 = vunpack.c.l.b16 %v1153_v18  ;;  %v1116_v47 = vadd.f32 %v1080_v37, %v972_v41 }
  0xc4   : > { %v580_v23 = vmax.f32 %v538_v17, 0.0  ;;  %v935_v52 = vmul.f32 0.25, %v808_v43  ;;  %v1151_v55 = vpack.c.bf16 %v1115_v42, %v1115_v42  ;;  %v833_v57 = vrot.slane %v633_v22, 1 }
  0xc5   : > { %v5904_v26 = vpack.c.b16 %v1481_v16, %v1480_v15  ;;  %v5912_v30 = vpack.c.b16 %v1226_v19, %v1225_v24  ;;  %v1152_v60 = vpack.c.bf16 %v1116_v47, %v1116_v47  ;;  %v975_v61 = vmul.f32 0.75, %v633_v22  ;;  %v461_v24 = vld [vmem:[%s5856_s9 + $0x68] sm:$0xff] }
  0xc6   : > { %v5908_v28 = vmul.f32 0.75, %v580_v23  ;;  %v5910_v29 = vmul.f32 0.25, %v580_v23  ;;  %v720_v62 = vsel %vm717_vm2, %v718_v31, %v719_v48  ;;  %v1007_v2 = vadd.f32 %v971_v38, %v935_v52  ;;  %v460_v23 = vld [vmem:[%s5856_s9 + $0x60] sm:$0xff] }
  0xc7   : > { %8530 = vst [vmem:[#allocation2_spill] sm:$0xff] %v5904_v26  ;;  %1699 = vrot.lane.b32.xlu0 %v5904_v26, %s5753_s15  ;;  %1841 = vrot.lane.b32.xlu1 %v5912_v30, %s5754_s16  ;;  %v1223_v6 = vunpack.c.l.b16 %v1151_v55  ;;  %v1285_v8 = vshrl.u32 %v5912_v30, 16  ;;  %v1224_v9 = vunpack.c.l.b16 %v1152_v60  ;;  %v936_v10 = vmul.f32 0.25, %v720_v62 }
  0xc8   : > { %8531 = vst [vmem:[#allocation3_spill] sm:$0xff] %v5912_v30  ;;  %v634_v35 = vadd.f32 %v5910_v29, %v598_v44  ;;  %v5922_v36 = vadd.f32 %v614_v45, %v5908_v28  ;;  %1731 = vrot.lane.b32.xlu2 %v5912_v30, %s5755_s17  ;;  %v727_v44 = vrot.slane %v5918_v32, 7  ;;  %v810_v45 = vsel %vm717_vm2, %v633_v22, %v724_v34 }
  0xc9   : > { %v939_v53 = vmul.f32 0.25, %v810_v45  ;;  %v540_v54 = vpop.f32.mrf.mxu0  ;;  %v977_v11 = vmul.f32 0.75, %v5918_v32  ;;  %v836_v16 = vrot.slane %v5918_v32, 1  ;;  %v1288_v21 = vshll.u32 %v5912_v30, 16 }
  0xca   : > { %v725_v39 = vrot.slane %v634_v35, 7  ;;  %v728_v40 = vrot.slane %v5922_v36, 7  ;;  %v834_v50 = vrot.slane %v634_v35, 1  ;;  %v811_v56 = vsel %vm717_vm2, %v5918_v32, %v727_v44 }
  0xcb   : > { %v976_v58 = vmul.f32 0.75, %v634_v35  ;;  %v941_v3 = vmul.f32 0.25, %v811_v56  ;;  %v1011_v4 = vadd.f32 %v975_v61, %v939_v53  ;;  %v978_v5 = vmul.f32 0.75, %v5922_v36 }
  0xcc   : > { %v726_v46 = vsel %vm717_vm2, %v724_v34, %v725_v39  ;;  %v729_v49 = vsel %vm717_vm2, %v727_v44, %v728_v40  ;;  %v835_v63 = vsel %vm826_vm3, %v833_v57, %v834_v50  ;;  %v919_v0 = vsel %vm826_vm3, %v834_v50, %v634_v35 }
  0xcd   : > { %v940_v51 = vmul.f32 0.25, %v726_v46  ;;  %v942_v59 = vmul.f32 0.25, %v729_v49  ;;  %v837_v7 = vrot.slane %v5922_v36, 1  ;;  %v1083_v14 = vmul.f32 0.25, %v835_v63 }
  0xce   : > { %v1084_v15 = vmul.f32 0.25, %v919_v0  ;;  %v1013_v18 = vadd.f32 %v977_v11, %v941_v3  ;;  %v1047_v19 = vpack.c.bf16 %v1011_v4, %v1011_v4  ;;  %v1043_v22 = vpack.c.bf16 %v1007_v2, %v1007_v2 }
  0xcf   : > { %1809 = vrot.lane.b32.xlu0 %v5904_v26, %s5756_s18  ;;  %v1012_v1 = vadd.f32 %v976_v58, %v940_v51  ;;  %v1014_v13 = vadd.f32 %v978_v5, %v942_v59  ;;  %v838_v27 = vsel %vm826_vm3, %v836_v16, %v837_v7  ;;  %v1287_v31 = vrot.slane %v1285_v8, 7 }
  0xd0   : > { %v5954_v33 = vpack.c.b16 %v1224_v9, %v1223_v6  ;;  %v1008_v34 = vadd.f32 %v972_v41, %v936_v10  ;;  %v920_v35 = vsel %vm826_vm3, %v837_v7, %v5922_v36  ;;  %v1119_v32 = vadd.f32 %v1083_v14, %v975_v61 }
  0xd1   : > { %v1048_v17 = vpack.c.bf16 %v1012_v1, %v1012_v1  ;;  %v1050_v37 = vpack.c.bf16 %v1014_v13, %v1014_v13  ;;  %v1120_v38 = vadd.f32 %v1084_v15, %v976_v58  ;;  %v542_v40 = vpop.f32.mrf.mxu0  ;;  %v1290_v43 = vor.u32 %v1288_v21, %v1287_v31  ;;  %v463_v13 = vld [vmem:[%s5856_s9 + $0x78] sm:$0xff] }
  0xd2   : > { %8532 = vst [vmem:[#allocation4_spill] sm:$0xff] %v5954_v33  ;;  %1729 = vrot.lane.b32.xlu1 %v5954_v33, %s5755_s17  ;;  %v1044_v44 = vpack.c.bf16 %v1008_v34, %v1008_v34  ;;  %v473_v41 = vpack.c.bf16 %v461_v24, %v460_v23  ;;  %v1049_v45 = vpack.c.bf16 %v1013_v18, %v1013_v18  ;;  %v1482_v46 = vunpack.c.l.b16 %v1047_v19 }
  0xd3   : > { %v1483_v42 = vunpack.c.l.b16 %v1048_v17  ;;  %v5968_v36 = vsel %vm5960_vm5, 0, %v1290_v43  ;;  %v543_v47 = vadd.f32 %v5879_v25, %v542_v40  ;;  %v1478_v48 = vunpack.c.l.b16 %v1043_v22 }
  0xd4   : > { %v1479_v49 = vunpack.c.l.b16 %v1044_v44  ;;  %5591 = vmatmul.msk.bf16.gmra.mxu0 %vm481_vm1, %v473_v41  ;;  %v1085_v50 = vmul.f32 0.25, %v838_v27  ;;  %v1086_v51 = vmul.f32 0.25, %v920_v35  ;;  %v1485_v52 = vunpack.c.l.b16 %v1050_v37  ;;  %1777 = vrot.lane.b32.xlu2 %v5968_v36, %s5757_s19 }
  0xd5   : > { %v541_v53 = vadd.f32 %v5879_v25, %v540_v54  ;;  %v1155_v55 = vpack.c.bf16 %v1119_v32, %v1119_v32  ;;  %v1156_v56 = vpack.c.bf16 %v1120_v38, %v1120_v38  ;;  %v5975_v57 = vpack.c.b16 %v1483_v42, %v1482_v46 }
  0xd6   : > { %v5977_v58 = vpack.c.b16 %v1479_v49, %v1478_v48  ;;  %v1484_v60 = vunpack.c.l.b16 %v1049_v45  ;;  %v582_v61 = vmax.f32 %v543_v47, 0.0  ;;  %v1121_v63 = vadd.f32 %v1085_v50, %v977_v11  ;;  %v462_v11 = vld [vmem:[%s5856_s9 + $0x70] sm:$0xff]  ;;  %s5760_s9 = smov 48  }
  0xd7   : > { %8535 = vst [vmem:[#allocation5_spill] sm:$0xff] %v5975_v57  ;;  %v581_v62 = vmax.f32 %v541_v53, 0.0  ;;  %v1122_v54 = vadd.f32 %v1086_v51, %v978_v5  ;;  %v1227_v0 = vunpack.c.l.b16 %v1155_v55  ;;  %v1228_v1 = vunpack.c.l.b16 %v1156_v56 }
  0xd8   : > { %8536 = vst [vmem:[#allocation6_spill] sm:$0xff] %v5977_v58  ;;  %1697 = vrot.lane.b32.xlu0 %v5977_v58, %s5753_s15  ;;  %v5981_v59 = vpack.c.b16 %v1485_v52, %v1484_v60  ;;  %v5985_v2 = vmul.f32 0.25, %v582_v61  ;;  %v1157_v3 = vpack.c.bf16 %v1121_v63, %v1121_v63  ;;  %v6008_v14 = vmul.f32 0.75, %v582_v61 }
  0xd9   : > { %v1158_v4 = vpack.c.bf16 %v1122_v54, %v1122_v54  ;;  %v5989_v6 = vpack.c.b16 %v1228_v1, %v1227_v0  ;;  %v5991_v7 = vmul.f32 0.25, %v581_v62  ;;  %v474_v15 = vpack.c.bf16 %v463_v13, %v462_v11 }
  0xda   : > { %8537 = vst [vmem:[#allocation7_spill] sm:$0xff] %v5981_v59  ;;  %1701 = vrot.lane.b32.xlu1 %v5975_v57, %s5753_s15  ;;  %v5995_v5 = vadd.f32 %v5985_v2, %v5908_v28  ;;  %v1229_v8 = vunpack.c.l.b16 %v1157_v3  ;;  %v6019_v16 = vmul.f32 0.75, %v581_v62  ;;  %v658_v18 = vadd.f32 %v5910_v29, %v6008_v14 }
  0xdb   : > { %8538 = vst [vmem:[#allocation8_spill] sm:$0xff] %v5989_v6  ;;  %v1230_v9 = vunpack.c.l.b16 %v1158_v4  ;;  %v6001_v10 = vadd.f32 %v5991_v7, %v5900_v20  ;;  %v1292_v21 = vshrl.u32 %v5989_v6, 16  ;;  %v1295_v35 = vshll.u32 %v5989_v6, 16 }
  0xdc   : > { %1813 = vrot.lane.b32.xlu2 %v5981_v59, %s5756_s18  ;;  %v731_v28 = vrot.slane %v5995_v5, 7  ;;  %v657_v22 = vadd.f32 %v5896_v12, %v6019_v16  ;;  %v734_v29 = vrot.slane %v658_v18, 7  ;;  %v6038_v34 = vmul.f32 0.75, %v5995_v5 }
  0xdd   : > { %v6017_v20 = vpack.c.b16 %v1230_v9, %v1229_v8  ;;  %v730_v17 = vrot.slane %v6001_v10, 7  ;;  %v1294_v27 = vrot.slane %v1292_v21, 7  ;;  %v979_v37 = vmul.f32 0.75, %v6001_v10  ;;  %v464_v21 = vld [vmem:[%s430_s14] sm:$0xff] }
  0xde   : > { %v733_v12 = vrot.slane %v657_v22, 7  ;;  %v843_v32 = vrot.slane %v658_v18, 1  ;;  %v842_v43 = vrot.slane %v657_v22, 1  ;;  %v840_v45 = vrot.slane %v5995_v5, 1 }
  0xdf   : > { %8540 = vst [vmem:[#allocation9_spill] sm:$0xff] %v6017_v20  ;;  %v732_v19 = vsel %vm717_vm2, %v730_v17, %v731_v28  ;;  %v812_v23 = vsel %vm717_vm2, %v6001_v10, %v730_v17  ;;  %v1297_v42 = vor.u32 %v1295_v35, %v1294_v27  ;;  %v1299_v46 = vshrl.u32 %v6017_v20, 16  ;;  %v545_v28 = vpop.f32.mrf.mxu0 }
  0xe0   : > { %1733 = vrot.lane.b32.xlu0 %v5989_v6, %s5755_s17  ;;  %v944_v24 = vmul.f32 0.25, %v732_v19  ;;  %v943_v31 = vmul.f32 0.25, %v812_v23  ;;  %v735_v40 = vsel %vm717_vm2, %v733_v12, %v734_v29  ;;  %v813_v41 = vsel %vm717_vm2, %v657_v22, %v733_v12 }
  0xe1   : > { %v844_v47 = vsel %vm826_vm3, %v842_v43, %v843_v32  ;;  %v922_v48 = vsel %vm826_vm3, %v843_v32, %v658_v18  ;;  %v946_v49 = vmul.f32 0.25, %v735_v40  ;;  %v6059_v51 = vsel %vm5960_vm5, 0, %v1297_v42 }
  0xe2   : > { %1703 = vrot.lane.b32.xlu1 %v5981_v59, %s5753_s15  ;;  %v1016_v38 = vadd.f32 %v6038_v34, %v944_v24  ;;  %v1015_v44 = vadd.f32 %v979_v37, %v943_v31  ;;  %v839_v52 = vrot.slane %v6001_v10, 1  ;;  %v945_v53 = vmul.f32 0.25, %v813_v41 }
  0xe3   : > { %v982_v56 = vmul.f32 0.75, %v658_v18  ;;  %v981_v60 = vmul.f32 0.75, %v657_v22  ;;  %v1089_v61 = vmul.f32 0.25, %v844_v47  ;;  %v1090_v62 = vmul.f32 0.25, %v922_v48  ;;  %v465_v22 = vld [vmem:[%s430_s14 + $0x8] sm:$0xff] }
  0xe4   : > { %1843 = vrot.lane.b32.xlu2 %v5989_v6, %s5754_s16  ;;  %5592 = vmatmul.msk.bf16.gmra.mxu0 %vm481_vm1, %v474_v15  ;;  %v1052_v50 = vpack.c.bf16 %v1016_v38, %v1016_v38  ;;  %v1051_v55 = vpack.c.bf16 %v1015_v44, %v1015_v44  ;;  %v841_v63 = vsel %vm826_vm3, %v839_v52, %v840_v45  ;;  %v1301_v1 = vrot.slane %v1299_v46, 7 }
  0xe5   : > { %v1018_v54 = vadd.f32 %v982_v56, %v946_v49  ;;  %v921_v3 = vsel %vm826_vm3, %v840_v45, %v5995_v5  ;;  %v1017_v4 = vadd.f32 %v981_v60, %v945_v53  ;;  %v1302_v9 = vshll.u32 %v6017_v20, 16 }
  0xe6   : > { %v1487_v0 = vunpack.c.l.b16 %v1052_v50  ;;  %v1486_v8 = vunpack.c.l.b16 %v1051_v55  ;;  %v1087_v10 = vmul.f32 0.25, %v841_v63  ;;  %v1125_v11 = vadd.f32 %v1089_v61, %v981_v60 }
  0xe7   : > { %v1126_v13 = vadd.f32 %v1090_v62, %v982_v56  ;;  %v1054_v15 = vpack.c.bf16 %v1018_v54, %v1018_v54  ;;  %v1088_v5 = vmul.f32 0.25, %v921_v3  ;;  %v1304_v18 = vor.u32 %v1302_v9, %v1301_v1 }
  0xe8   : > { %1845 = vrot.lane.b32.xlu0 %v6017_v20, %s5754_s16  ;;  %v6076_v17 = vpack.c.b16 %v1487_v0, %v1486_v8  ;;  %v1053_v19 = vpack.c.bf16 %v1017_v4, %v1017_v4  ;;  %v1161_v23 = vpack.c.bf16 %v1125_v11, %v1125_v11  ;;  %v475_v29 = vpack.c.bf16 %v465_v22, %v464_v21 }
  0xe9   : > { %v1162_v24 = vpack.c.bf16 %v1126_v13, %v1126_v13  ;;  %v1123_v27 = vadd.f32 %v1087_v10, %v979_v37  ;;  %v1124_v31 = vadd.f32 %v1088_v5, %v6038_v34  ;;  %v1489_v12 = vunpack.c.l.b16 %v1054_v15  ;;  %v547_v34 = vpop.f32.mrf.mxu0 }
  0xea   : > { %1735 = vrot.lane.b32.xlu1 %v6017_v20, %s5755_s17  ;;  %8541 = vst [vmem:[#allocation10_spill] sm:$0xff] %v6076_v17  ;;  %v6083_v35 = vsel %vm5960_vm5, 0, %v1304_v18  ;;  %v1488_v32 = vunpack.c.l.b16 %v1053_v19  ;;  %v1233_v38 = vunpack.c.l.b16 %v1161_v23  ;;  %v546_v46 = vadd.f32 %v5879_v25, %v545_v28 }
  0xeb   : > { %v1234_v40 = vunpack.c.l.b16 %v1162_v24  ;;  %v1159_v42 = vpack.c.bf16 %v1123_v27, %v1123_v27  ;;  %v1160_v37 = vpack.c.bf16 %v1124_v31, %v1124_v31  ;;  %v548_v47 = vadd.f32 %v5879_v25, %v547_v34 }
  0xec   : > { %1940 = vrot.lane.b32.xlu2 %v6017_v20, %s5758_s10  ;;  %v6090_v43 = vpack.c.b16 %v1489_v12, %v1488_v32  ;;  %v583_v49 = vmax.f32 %v546_v46, 0.0 }
  0xed   : > { %v6094_v44 = vpack.c.b16 %v1234_v40, %v1233_v38  ;;  %v1231_v41 = vunpack.c.l.b16 %v1159_v42  ;;  %v1232_v45 = vunpack.c.l.b16 %v1160_v37  ;;  %v584_v50 = vmax.f32 %v548_v47, 0.0 }
  0xee   : > { %8542 = vst [vmem:[#allocation11_spill] sm:$0xff] %v6090_v43  ;;  %v6106_v52 = vmul.f32 0.25, %v583_v49  ;;  %v6110_v55 = vmul.f32 0.75, %v583_v49 }
  0xef   : > { %8543 = vst [vmem:[#allocation12_spill] sm:$0xff] %v6094_v44  ;;  %v6102_v48 = vpack.c.b16 %v1232_v45, %v1231_v41  ;;  %v6108_v53 = vmul.f32 0.25, %v584_v50  ;;  %v6114_v56 = vmul.f32 0.75, %v584_v50  ;;  %v1313_v4 = vshrl.u32 %v6094_v44, 16 }
  0xf0   : > { %1906 = vrot.lane.b32.xlu0 %v5975_v57, %s5759_s22  ;;  %v637_v60 = vadd.f32 %v6106_v52, %v6019_v16  ;;  %v659_v62 = vadd.f32 %v5991_v7, %v6110_v55  ;;  %v1316_v38 = vshll.u32 %v6094_v44, 16 }
  0xf1   : > { %8544 = vst [vmem:[#allocation13_spill] sm:$0xff] %v6102_v48  ;;  %v638_v61 = vadd.f32 %v6108_v53, %v6008_v14  ;;  %v660_v63 = vadd.f32 %v5985_v2, %v6114_v56  ;;  %v1306_v1 = vshrl.u32 %v6102_v48, 16  ;;  %v1309_v13 = vshll.u32 %v6102_v48, 16  ;;  %v550_v37 = vpop.f32.mrf.mxu0 }
  0xf2   : > { %1811 = vrot.lane.b32.xlu1 %v5975_v57, %s5756_s18  ;;  %v736_v54 = vrot.slane %v637_v60, 7  ;;  %v739_v3 = vrot.slane %v659_v62, 7  ;;  %v848_v9 = vrot.slane %v659_v62, 1  ;;  %v983_v15 = vmul.f32 0.75, %v637_v60 }
  0xf3   : > { %v737_v0 = vrot.slane %v638_v61, 7  ;;  %v740_v16 = vrot.slane %v660_v63, 7  ;;  %v1308_v2 = vrot.slane %v1306_v1, 7  ;;  %v849_v10 = vrot.slane %v660_v63, 1 }
  0xf4   : > { %1874 = vrot.lane.b32.xlu2 %v6059_v51, %s5760_s9  ;;  %5593 = vmatmul.msk.bf16.gmra.mxu0 %vm481_vm1, %v475_v29  ;;  %v814_v7 = vsel %vm717_vm2, %v637_v60, %v736_v54  ;;  %v815_v8 = vsel %vm717_vm2, %v659_v62, %v739_v3  ;;  %v984_v18 = vmul.f32 0.75, %v638_v61  ;;  %v985_v21 = vmul.f32 0.75, %v659_v62 }
  0xf5   : > { %v738_v14 = vsel %vm717_vm2, %v736_v54, %v737_v0  ;;  %v741_v11 = vsel %vm717_vm2, %v739_v3, %v740_v16  ;;  %v947_v28 = vmul.f32 0.25, %v814_v7  ;;  %v949_v19 = vmul.f32 0.25, %v815_v8 }
  0xf6   : > { %v948_v5 = vmul.f32 0.25, %v738_v14  ;;  %v1311_v22 = vor.u32 %v1309_v13, %v1308_v2  ;;  %v1315_v23 = vrot.slane %v1313_v4, 7  ;;  %v850_v24 = vsel %vm826_vm3, %v848_v9, %v849_v10 }
  0xf7   : > { %v924_v29 = vsel %vm826_vm3, %v849_v10, %v660_v63  ;;  %v950_v27 = vmul.f32 0.25, %v741_v11  ;;  %v986_v31 = vmul.f32 0.75, %v660_v63  ;;  %v845_v12 = vrot.slane %v637_v60, 1 }
  0xf8   : > { %1779 = vrot.lane.b32.xlu0 %v6059_v51, %s5757_s19  ;;  %v846_v32 = vrot.slane %v638_v61, 1  ;;  %v1019_v40 = vadd.f32 %v983_v15, %v947_v28  ;;  %v1020_v42 = vadd.f32 %v984_v18, %v948_v5  ;;  %v1093_v34 = vmul.f32 0.25, %v850_v24 }
  0xf9   : > { %v1094_v41 = vmul.f32 0.25, %v924_v29  ;;  %v1318_v45 = vor.u32 %v1316_v38, %v1315_v23  ;;  %v1021_v46 = vadd.f32 %v985_v21, %v949_v19  ;;  %v1022_v47 = vadd.f32 %v986_v31, %v950_v27  ;;  %v552_v5 = vpop.f32.mrf.mxu0 }
  0xfa   : > { %1908 = vrot.lane.b32.xlu1 %v5981_v59, %s5759_s22  ;;  %v6150_v49 = vsel %vm5960_vm5, 0, %v1311_v22  ;;  %v847_v50 = vsel %vm826_vm3, %v845_v12, %v846_v32  ;;  %v923_v60 = vsel %vm826_vm3, %v846_v32, %v638_v61  ;;  %v1055_v63 = vpack.c.bf16 %v1019_v40, %v1019_v40 }
  0xfb   : > { %v1056_v54 = vpack.c.bf16 %v1020_v42, %v1020_v42  ;;  %v1129_v0 = vadd.f32 %v1093_v34, %v985_v21  ;;  %v1130_v1 = vadd.f32 %v1094_v41, %v986_v31  ;;  %v6160_v3 = vsel %vm5960_vm5, 0, %v1318_v45 }
  0xfc   : > { %1705 = vrot.lane.b32.xlu2 %v6076_v17, %s5753_s15  ;;  %v1057_v16 = vpack.c.bf16 %v1021_v46, %v1021_v46  ;;  %v1058_v7 = vpack.c.bf16 %v1022_v47, %v1022_v47  ;;  %v1091_v14 = vmul.f32 0.25, %v847_v50  ;;  %v1092_v2 = vmul.f32 0.25, %v923_v60 }
  0xfd   : > { %v1490_v61 = vunpack.c.l.b16 %v1055_v63  ;;  %v1491_v4 = vunpack.c.l.b16 %v1056_v54  ;;  %v1165_v8 = vpack.c.bf16 %v1129_v0, %v1129_v0  ;;  %v1166_v9 = vpack.c.bf16 %v1130_v1, %v1130_v1 }
  0xfe   : > { %v1492_v10 = vunpack.c.l.b16 %v1057_v16  ;;  %v1127_v11 = vadd.f32 %v1091_v14, %v983_v15  ;;  %v1128_v13 = vadd.f32 %v1092_v2, %v984_v18  ;;  %v1493_v28 = vunpack.c.l.b16 %v1058_v7 }
  0xff   : > { %v6168_v19 = vpack.c.b16 %v1491_v4, %v1490_v61  ;;  %v551_v21 = vadd.f32 %v5879_v25, %v550_v37  ;;  %v1237_v22 = vunpack.c.l.b16 %v1165_v8  ;;  %v1238_v23 = vunpack.c.l.b16 %v1166_v9  ;;  %v2788_v9 = vld [vmem:[%s8437_s5 + $0x20] sm:$0xf] }
 0x100   : > { %1876 = vrot.lane.b32.xlu0 %v6083_v35, %s5760_s9  ;;  %v553_v24 = vadd.f32 %v5879_v25, %v552_v5  ;;  %v1163_v27 = vpack.c.bf16 %v1127_v11, %v1127_v11  ;;  %v1164_v31 = vpack.c.bf16 %v1128_v13, %v1128_v13  ;;  %v6174_v12 = vpack.c.b16 %v1493_v28, %v1492_v10 }
 0x101   : > { %8545 = vst [vmem:[#allocation14_spill] sm:$0xff] %v6168_v19  ;;  %v585_v15 = vmax.f32 %v551_v21, 0.0  ;;  %v6180_v18 = vpack.c.b16 %v1238_v23, %v1237_v22  ;;  %v2810_v28 = vunpack.c.l.b16 %v2788_v9  ;;  %vm1677_vm1 = vsmask.f32 7424 }
 0x102   : > { %1938 = vrot.lane.b32.xlu1 %v5989_v6, %s5758_s10  ;;  %8546 = vst [vmem:[#allocation15_spill] sm:$0xff] %v6174_v12  ;;  %v586_v32 = vmax.f32 %v553_v24, 0.0  ;;  %v1235_v38 = vunpack.c.l.b16 %v1163_v27  ;;  %v1236_v40 = vunpack.c.l.b16 %v1164_v31 }
 0x103   : > { %8547 = vst [vmem:[#allocation16_spill] sm:$0xff] %v6180_v18  ;;  %v6184_v25 = vmul.f32 0.75, %v585_v15  ;;  %v6196_v45 = vmul.f32 0.25, %v585_v15  ;;  %v1327_v27 = vshrl.u32 %v6180_v18, 16  ;;  %v2815_v31 = vpack.c.b16 %v2810_v28, %v2810_v28 }
 0x104   : > { %1707 = vrot.lane.b32.xlu2 %v6090_v43, %s5753_s15  ;;  %v6188_v37 = vmul.f32 0.75, %v586_v32  ;;  %v6192_v41 = vpack.c.b16 %v1236_v40, %v1235_v38  ;;  %v6206_v60 = vmul.f32 0.25, %v586_v32 }
 0x105   : > { %v661_v46 = vadd.f32 %v6106_v52, %v6184_v25  ;;  %v639_v63 = vadd.f32 %v6196_v45, %v6110_v55 }
 0x106   : > { %8548 = vst [vmem:[#allocation17_spill] sm:$0xff] %v6192_v41  ;;  %v662_v50 = vadd.f32 %v6108_v53, %v6188_v37  ;;  %v640_v52 = vadd.f32 %v6206_v60, %v6114_v56  ;;  %v1320_v14 = vshrl.u32 %v6192_v41, 16  ;;  %v1323_v23 = vshll.u32 %v6192_v41, 16 }
 0x107   : > { %v745_v54 = vrot.slane %v661_v46, 7  ;;  %v742_v53 = vrot.slane %v639_v63, 7  ;;  %v851_v4 = vrot.slane %v639_v63, 1  ;;  %v989_v10 = vmul.f32 0.75, %v661_v46 }
 0x108   : > { %1739 = vrot.lane.b32.xlu0 %v6094_v44, %s5755_s17  ;;  %v746_v0 = vrot.slane %v662_v50, 7  ;;  %v743_v2 = vrot.slane %v640_v52, 7  ;;  %v990_v13 = vmul.f32 0.75, %v662_v50  ;;  %v852_v5 = vrot.slane %v640_v52, 1 }
 0x109   : > { %v817_v7 = vsel %vm717_vm2, %v661_v46, %v745_v54  ;;  %v816_v56 = vsel %vm717_vm2, %v639_v63, %v742_v53  ;;  %v1322_v22 = vrot.slane %v1320_v14, 7  ;;  %v854_v15 = vrot.slane %v661_v46, 1 }
 0x10a   : > { %1781 = vrot.lane.b32.xlu1 %v6083_v35, %s5757_s19  ;;  %v747_v55 = vsel %vm717_vm2, %v745_v54, %v746_v0  ;;  %v953_v8 = vmul.f32 0.25, %v817_v7  ;;  %v744_v24 = vsel %vm717_vm2, %v742_v53, %v743_v2  ;;  %v951_v32 = vmul.f32 0.25, %v816_v56 }
 0x10b   : > { %v954_v11 = vmul.f32 0.25, %v747_v55  ;;  %v987_v38 = vmul.f32 0.75, %v639_v63  ;;  %v855_v40 = vrot.slane %v662_v50, 1  ;;  %v988_v0 = vmul.f32 0.75, %v640_v52 }
 0x10c   : > { %1737 = vrot.lane.b32.xlu2 %v6102_v48, %s5755_s17  ;;  %v1025_v54 = vadd.f32 %v989_v10, %v953_v8  ;;  %v6244_v14 = vsel %vm2853_vm6, %v2815_v31, 0  ;;  %v853_v53 = vsel %vm826_vm3, %v851_v4, %v852_v5  ;;  %v925_v2 = vsel %vm826_vm3, %v852_v5, %v640_v52 }
 0x10d   : > { %v1026_v7 = vadd.f32 %v990_v13, %v954_v11  ;;  %v952_v9 = vmul.f32 0.25, %v744_v24  ;;  %v1325_v28 = vor.u32 %v1323_v23, %v1322_v22  ;;  %2860 = vmatpush.bf16.msra.mxu1 %v6244_v14  ;;  %5650 = vmatpush.bf16.msra.mxu3 %v6244_v14  ;;  %v1329_v63 = vrot.slane %v1327_v27, 7  ;;  %v555_v23 = vpop.f32.mrf.mxu0 }
 0x10e   : > { %v1330_v56 = vshll.u32 %v6180_v18, 16  ;;  %3013 = vmatpush.bf16.msra.mxu2 %v6244_v14  ;;  %v856_v8 = vsel %vm826_vm3, %v854_v15, %v855_v40  ;;  %v926_v11 = vsel %vm826_vm3, %v855_v40, %v662_v50  ;;  %v1061_v52 = vpack.c.bf16 %v1025_v54, %v1025_v54  ;;  %v6269_v50 = vld [vmem:[%s8437_s5 + $0x18] sm:$0xff] }
 0x10f   : > { %v1062_v4 = vpack.c.bf16 %v1026_v7, %v1026_v7  ;;  %v1095_v5 = vmul.f32 0.25, %v853_v53  ;;  %v1096_v22 = vmul.f32 0.25, %v925_v2  ;;  %v1023_v24 = vadd.f32 %v987_v38, %v951_v32  ;;  %v6279_v2 = vld [vmem:[%s8437_s5 + $0x10] sm:$0xff] }
 0x110   : > { %1815 = vrot.lane.b32.xlu0 %v6076_v17, %s5756_s18  ;;  %v1024_v31 = vadd.f32 %v988_v0, %v952_v9  ;;  %v6262_v27 = vsel %vm5960_vm5, 0, %v1325_v28  ;;  %v1098_v15 = vmul.f32 0.25, %v926_v11  ;;  %v1496_v40 = vunpack.c.l.b16 %v1061_v52 }
 0x111   : > { %v1131_v32 = vadd.f32 %v1095_v5, %v987_v38  ;;  %v1132_v54 = vadd.f32 %v1096_v22, %v988_v0  ;;  %v1497_v7 = vunpack.c.l.b16 %v1062_v4  ;;  %2861 = vmatpush.bf16.msra.mxu1 %v6269_v50  ;;  %v1059_v9 = vpack.c.bf16 %v1023_v24, %v1023_v24  ;;  %5651 = vmatpush.bf16.msra.mxu3 %v6269_v50 }
 0x112   : > { %1817 = vrot.lane.b32.xlu1 %v6090_v43, %s5756_s18  ;;  %v1060_v28 = vpack.c.bf16 %v1024_v31, %v1024_v31  ;;  %3014 = vmatpush.bf16.msra.mxu2 %v6269_v50  ;;  %v1134_v0 = vadd.f32 %v1098_v15, %v990_v13  ;;  %v6309_v31 = vld [vmem:[%s8436_s4] ss:$0 sm:$0xff] }
 0x113   : > { %v1168_v11 = vpack.c.bf16 %v1132_v54, %v1132_v54  ;;  %v6291_v52 = vpack.c.b16 %v1497_v7, %v1496_v40  ;;  %v556_v15 = vadd.f32 %v6309_v31, %v555_v23  ;;  %v6320_v7 = vld [vmem:[%s8437_s5] sm:$0xff] }
 0x114   : > { %1849 = vrot.lane.b32.xlu2 %v6094_v44, %s5754_s16  ;;  %v1495_v13 = vunpack.c.l.b16 %v1060_v28  ;;  %v1170_v22 = vpack.c.bf16 %v1134_v0, %v1134_v0 }
 0x115   : > { %8549 = vst [vmem:[#allocation18_spill] sm:$0xff] %v6291_v52  ;;  %2862 = vmatpush.bf16.msra.mxu1 %v6279_v2  ;;  %5652 = vmatpush.bf16.msra.mxu3 %v6279_v2  ;;  %v557_v24 = vpop.f32.mrf.mxu0 }
 0x116   : > { %3015 = vmatpush.bf16.msra.mxu2 %v6279_v2  ;;  %v558_v28 = vadd.f32 %v6309_v31, %v557_v24  ;;  %v1242_v0 = vunpack.c.l.b16 %v1170_v22 }
 0x118   : > { %1912 = vrot.lane.b32.xlu0 %v6090_v43, %s5759_s22  ;;  %v1332_v43 = vor.u32 %v1330_v56, %v1329_v63 }
 0x11a   : > { %1847 = vrot.lane.b32.xlu1 %v6102_v48, %s5754_s16  ;;  %v6285_v63 = vsel %vm5960_vm5, 0, %v1332_v43  ;;  %v1278_v43 = vshrl.u32 %v5954_v33, 16 }
 0x11c   : > { %1910 = vrot.lane.b32.xlu2 %v6076_v17, %s5759_s22  ;;  %v1281_v17 = vshll.u32 %v5954_v33, 16 }
 0x120   : > { %1942 = vrot.lane.b32.xlu0 %v6102_v48, %s5758_s10 }
 0x122   : > { %1944 = vrot.lane.b32.xlu1 %v6094_v44, %s5758_s10  ;;  %v6156_v62 = vpop.permute.xlu2 %1731 }
 0x124   : > { %1783 = vrot.lane.b32.xlu2 %v6150_v49, %s5757_s19 }
 0x128   : > { %1785 = vrot.lane.b32.xlu0 %v6160_v3, %s5757_s19 }
 0x12a   : > { %1878 = vrot.lane.b32.xlu1 %v6150_v49, %s5760_s9 }
 0x12c   : > { %1880 = vrot.lane.b32.xlu2 %v6160_v3, %s5760_s9 }
 0x12e   : > { %v6172_v29 = vpop.permute.xlu2 %1777 }
 0x130   : > { %1709 = vrot.lane.b32.xlu0 %v6168_v19, %s5753_s15 }
 0x132   : > { %1711 = vrot.lane.b32.xlu1 %v6174_v12, %s5753_s15 }
 0x134   : > { %1743 = vrot.lane.b32.xlu2 %v6180_v18, %s5755_s17 }
 0x136   : > { %v6190_v34 = vpop.permute.xlu2 %1813 }
 0x138   : > { %1821 = vrot.lane.b32.xlu0 %v6174_v12, %s5756_s18 }
 0x139   : > { %v6186_v42 = vpop.permute.xlu0 %1699  ;;  %v6202_v47 = vpop.permute.xlu1 %1841 }
 0x13a   : > { %1741 = vrot.lane.b32.xlu1 %v6192_v41, %s5755_s17 }
 0x13c   : > { %1819 = vrot.lane.b32.xlu2 %v6168_v19, %s5756_s18 }
 0x13e   : > { %v6212_v1 = vpop.permute.xlu2 %1843 }
 0x140   : > { %1851 = vrot.lane.b32.xlu0 %v6192_v41, %s5754_s16 }
 0x141   : > { %v6218_v16 = vpop.permute.xlu0 %1809 }
 0x142   : > { %1853 = vrot.lane.b32.xlu1 %v6180_v18, %s5754_s16 }
 0x144   : > { %v6225_v61 = vpop.permute.xlu1 %1729  ;;  %1916 = vrot.lane.b32.xlu2 %v6174_v12, %s5759_s22 }
 0x146   : > { %v6233_v21 = vpop.permute.xlu2 %1940 }
 0x148   : > { %1948 = vrot.lane.b32.xlu0 %v6180_v18, %s5758_s10 }
 0x14a   : > { %1914 = vrot.lane.b32.xlu1 %v6168_v19, %s5759_s22  ;;  %v6242_v55 = vpop.permute.xlu0 %1697  ;;  %v1097_v19 = vmul.f32 0.25, %v856_v8  ;;  %v1167_v8 = vpack.c.bf16 %v1131_v32, %v1131_v32  ;;  %v1240_v32 = vunpack.c.l.b16 %v1168_v11  ;;  %v587_v11 = vmax.f32 %v556_v15, 0.0 }
 0x14c   : > { %v6250_v46 = vpop.permute.xlu1 %1701  ;;  %1946 = vrot.lane.b32.xlu2 %v6192_v41, %s5758_s10  ;;  %v1133_v38 = vadd.f32 %v1097_v19, %v989_v10  ;;  %v6297_v19 = vld [vmem:[%s8437_s5 + $0x8] sm:$0xff]  ;;  %v1494_v10 = vunpack.c.l.b16 %v1059_v9  ;;  %v1239_v40 = vunpack.c.l.b16 %v1167_v8  ;;  %v6344_v22 = vmul.f32 0.75, %v587_v11 }
 0x14d   : > { %2863 = vmatpush.bf16.msra.mxu1 %v6297_v19  ;;  %5653 = vmatpush.bf16.msra.mxu3 %v6297_v19 }
 0x14e   : > { %v6258_v12 = vpop.permute.xlu2 %1874  ;;  %v1169_v5 = vpack.c.bf16 %v1133_v38, %v1133_v38  ;;  %v6322_v9 = vpack.c.b16 %v1495_v13, %v1494_v10  ;;  %v1280_v38 = vrot.slane %v1278_v43, 7  ;;  %3016 = vmatpush.bf16.msra.mxu2 %v6297_v19  ;;  %v6332_v59 = vpack.c.b16 %v1240_v32, %v1239_v40 }
 0x14f   : > { %v588_v10 = vmax.f32 %v558_v28, 0.0  ;;  %v6363_v28 = vmul.f32 0.25, %v587_v11 }
 0x150   : > { %1882 = vrot.lane.b32.xlu0 %v6262_v27, %s5760_s9  ;;  %8550 = vst [vmem:[#allocation19_spill] sm:$0xff] %v6322_v9  ;;  %v1241_v23 = vunpack.c.l.b16 %v1169_v5  ;;  %v1283_v13 = vor.u32 %v1281_v17, %v1280_v38  ;;  %v1337_v18 = vshll.u32 %v6332_v59, 16 }
 0x151   : > { %8551 = vst [vmem:[#allocation20_spill] sm:$0xff] %v6332_v59  ;;  %2864 = vmatpush.bf16.msra.mxu1 %v6320_v7  ;;  %5654 = vmatpush.bf16.msra.mxu3 %v6320_v7  ;;  %v6350_v17 = vmul.f32 0.75, %v588_v10 }
 0x152   : > { %1787 = vrot.lane.b32.xlu1 %v6262_v27, %s5757_s19  ;;  %v6273_v53 = vpop.permute.xlu0 %1733  ;;  %3017 = vmatpush.bf16.msra.mxu2 %v6320_v7  ;;  %v6339_v5 = vpack.c.b16 %v1242_v0, %v1241_v23  ;;  %v1424_v15 = vsel %vm5960_vm5, 0, %v1283_v13  ;;  %v641_v0 = vadd.f32 %v6363_v28, %v6184_v25  ;;  %v1334_v13 = vshrl.u32 %v6332_v59, 16 }
 0x153   : > { %v1973_v40 = vsel %vm1970_vm7, %v1424_v15, %v6242_v55  ;;  %v664_v38 = vadd.f32 %v6206_v60, %v6350_v17 }
 0x154   : > { %v6287_v56 = vpop.permute.xlu1 %1703  ;;  %1789 = vrot.lane.b32.xlu2 %v6285_v63, %s5757_s19  ;;  %8552 = vst [vmem:[#allocation21_spill] sm:$0xff] %v6339_v5  ;;  %v2021_v55 = vsel %vm2019_vm8, %v1973_v40, %v6225_v61  ;;  %v857_v57 = vrot.slane %v641_v0, 1  ;;  %v991_v20 = vmul.f32 0.75, %v641_v0 }
 0x155   : > { %5655 = vmatpush.bf16.msrb.mxu3 %v6244_v14  ;;  %v663_v14 = vadd.f32 %v6196_v45, %v6344_v22  ;;  %v2054_v60 = vsel %vm2052_vm9, %v2021_v55, %v6172_v29  ;;  %v752_v11 = vrot.slane %v664_v38, 7  ;;  %v861_v55 = vrot.slane %v664_v38, 1 }
 0x156   : > { %v6300_v4 = vpop.permute.xlu2 %1705  ;;  %v2087_v29 = vsel %vm2085_vm10, %v2054_v60, %v6218_v16  ;;  %v994_v48 = vmul.f32 0.75, %v664_v38 }
 0x157   : > { %v751_v45 = vrot.slane %v663_v14, 7  ;;  %v860_v40 = vrot.slane %v663_v14, 1  ;;  %v2120_v16 = vsel %vm2118_vm11, %v2087_v29, %v6202_v47  ;;  %v1341_v29 = vshrl.u32 %v6339_v5, 16 }
 0x158   : > { %1715 = vrot.lane.b32.xlu0 %v6291_v52, %s5753_s15 }
 0x159   : > { %5656 = vmatpush.bf16.msrb.mxu3 %v6269_v50  ;;  %v6374_v50 = vmul.f32 0.25, %v588_v10  ;;  %v748_v10 = vrot.slane %v641_v0, 7  ;;  %v753_v26 = vsel %vm717_vm2, %v751_v45, %v752_v11  ;;  %v928_v11 = vsel %vm826_vm3, %v861_v55, %v664_v38 }
 0x15a   : > { %1884 = vrot.lane.b32.xlu1 %v6285_v63, %s5760_s9  ;;  %v6314_v54 = vpop.permute.xlu0 %1845  ;;  %v1102_v6 = vmul.f32 0.25, %v928_v11 }
 0x15b   : > { %v642_v25 = vadd.f32 %v6374_v50, %v6188_v37  ;;  %v993_v37 = vmul.f32 0.75, %v663_v14 }
 0x15c   : > { %v6327_v8 = vpop.permute.xlu1 %1735  ;;  %1713 = vrot.lane.b32.xlu2 %v6322_v9, %s5753_s15 }
 0x15d   : > { %5657 = vmatpush.bf16.msrb.mxu3 %v6279_v2  ;;  %v819_v2 = vsel %vm717_vm2, %v663_v14, %v751_v45  ;;  %v749_v60 = vrot.slane %v642_v25, 7  ;;  %v858_v44 = vrot.slane %v642_v25, 1  ;;  %v862_v45 = vsel %vm826_vm3, %v860_v40, %v861_v55 }
 0x15e   : > { %v6335_v43 = vpop.permute.xlu2 %1707  ;;  %v957_v41 = vmul.f32 0.25, %v819_v2  ;;  %v560_v2 = vpop.f32.mrf.mxu0  ;;  %v2153_v14 = vsel %vm2151_vm12, %v2120_v16, %v6258_v12  ;;  %v1101_v16 = vmul.f32 0.25, %v862_v45 }
 0x15f   : > { %v859_v12 = vsel %vm826_vm3, %v857_v57, %v858_v44 }
 0x160   : > { %1745 = vrot.lane.b32.xlu0 %v6332_v59, %s5755_s17  ;;  %v1029_v55 = vadd.f32 %v993_v37, %v957_v41  ;;  %v1343_v41 = vrot.slane %v1341_v29, 7 }
 0x161   : > { %5658 = vmatpush.bf16.msrb.mxu3 %v6297_v19  ;;  %v1336_v19 = vrot.slane %v1334_v13, 7  ;;  %v958_v13 = vmul.f32 0.25, %v753_v26  ;;  %v1976_v26 = vsel %vm1970_vm7, %v5968_v36, %v6186_v42 }
 0x162   : > { %1747 = vrot.lane.b32.xlu1 %v6339_v5, %s5755_s17  ;;  %v6348_v24 = vpop.permute.xlu0 %1906  ;;  %v2023_v36 = vsel %vm2019_vm8, %v1976_v26, %v6156_v62  ;;  %v1065_v11 = vpack.c.bf16 %v1029_v55, %v1029_v55  ;;  %v1099_v62 = vmul.f32 0.25, %v859_v12  ;;  %v1138_v26 = vadd.f32 %v1102_v6, %v994_v48 }
 0x163   : > { %v2186_v38 = vsel %vm2184_vm13, %v2153_v14, %v6348_v24  ;;  %v1344_v24 = vshll.u32 %v6339_v5, 16  ;;  %v1137_v14 = vadd.f32 %v1101_v16, %v993_v37  ;;  %v561_v37 = vadd.f32 %v6309_v31, %v560_v2 }
 0x164   : > { %v6356_v32 = vpop.permute.xlu1 %1811  ;;  %1825 = vrot.lane.b32.xlu2 %v6291_v52, %s5756_s18  ;;  %v1500_v55 = vunpack.c.l.b16 %v1065_v11  ;;  %v1135_v12 = vadd.f32 %v1099_v62, %v991_v20 }
 0x165   : > { %5659 = vmatpush.bf16.msrb.mxu3 %v6320_v7  ;;  %v1339_v7 = vor.u32 %v1337_v18, %v1336_v19  ;;  %v1030_v19 = vadd.f32 %v994_v48, %v958_v13  ;;  %v1173_v6 = vpack.c.bf16 %v1137_v14, %v1137_v14  ;;  %v1174_v48 = vpack.c.bf16 %v1138_v26, %v1138_v26 }
 0x166   : > { %v6369_v23 = vpop.permute.xlu2 %1737 }
 0x167   : > { %v6430_v57 = vsel %vm5960_vm5, 0, %v1339_v7  ;;  %v1066_v29 = vpack.c.bf16 %v1030_v19, %v1030_v19  ;;  %v1245_v2 = vunpack.c.l.b16 %v1173_v6 }
 0x168   : > { %1857 = vrot.lane.b32.xlu0 %v6339_v5, %s5754_s16  ;;  %8553 = vst [vmem:[#allocation22_spill] sm:$0xff] %v6430_v57 }
 0x16a   : > { %1823 = vrot.lane.b32.xlu1 %v6322_v9, %s5756_s18  ;;  %v6382_v61 = vpop.permute.xlu0 %1779 }
 0x16b   : > { %v2056_v45 = vsel %vm2052_vm9, %v2023_v36, %v6382_v61 }
 0x16c   : > { %v6385_v15 = vpop.permute.xlu1 %1908  ;;  %1855 = vrot.lane.b32.xlu2 %v6332_v59, %s5754_s16 }
 0x16e   : > { %v6396_v58 = vpop.permute.xlu2 %1849 }
 0x170   : > { %1918 = vrot.lane.b32.xlu0 %v6322_v9, %s5759_s22  ;;  %v818_v9 = vsel %vm717_vm2, %v641_v0, %v748_v10  ;;  %v927_v0 = vsel %vm826_vm3, %v858_v44, %v642_v25  ;;  %v992_v44 = vmul.f32 0.75, %v642_v25 }
 0x171   : > { %v1100_v13 = vmul.f32 0.25, %v927_v0 }
 0x172   : > { %1920 = vrot.lane.b32.xlu1 %v6291_v52, %s5759_s22  ;;  %v1877_v47 = vpop.permute.xlu0 %1876  ;;  %v750_v52 = vsel %vm717_vm2, %v748_v10, %v749_v60  ;;  %v955_v10 = vmul.f32 0.25, %v818_v9  ;;  %v1346_v9 = vor.u32 %v1344_v24, %v1343_v41 }
 0x173   : > { %v956_v60 = vmul.f32 0.25, %v750_v52  ;;  %v2089_v52 = vsel %vm2085_vm10, %v2056_v45, %v6356_v32  ;;  %v1501_v32 = vunpack.c.l.b16 %v1066_v29 }
 0x174   : > { %v1939_v40 = vpop.permute.xlu1 %1938  ;;  %1952 = vrot.lane.b32.xlu2 %v6339_v5, %s5758_s10  ;;  %v1027_v25 = vadd.f32 %v991_v20, %v955_v10  ;;  %v2122_v0 = vsel %vm2118_vm11, %v2089_v52, %v6212_v1  ;;  %v6456_v20 = vsel %vm5960_vm5, 0, %v1346_v9  ;;  %v1246_v10 = vunpack.c.l.b16 %v1174_v48 }
 0x175   : > { %v2219_v18 = vsel %vm2217_vm14, %v2186_v38, %v1939_v40  ;;  %v1028_v61 = vadd.f32 %v992_v44, %v956_v60  ;;  %v562_v38 = vpop.f32.mrf.mxu0  ;;  %v2155_v16 = vsel %vm2151_vm12, %v2122_v0, %v1877_v47  ;;  %8554 = vst [vmem:[#allocation23_spill] sm:$0xff] %v6456_v20  ;;  %v589_v60 = vmax.f32 %v561_v37, 0.0 }
 0x176   : > { %5610 = vmatmul.msk.bf16.vlgmr.msra.gmra.mxu1 %vm2820_vm15, %v2219_v18  ;;  %v6426_v42 = vpop.permute.xlu2 %1910  ;;  %v1136_v18 = vadd.f32 %v1100_v13, %v992_v44  ;;  %v563_v19 = vadd.f32 %v6309_v31, %v562_v38  ;;  %v1063_v41 = vpack.c.bf16 %v1027_v25, %v1027_v25  ;;  %v2188_v47 = vsel %vm2184_vm13, %v2155_v16, %v6385_v15 }
 0x177   : > { %v1064_v24 = vpack.c.bf16 %v1028_v61, %v1028_v61  ;;  %v1171_v44 = vpack.c.bf16 %v1135_v12, %v1135_v12  ;;  %v6466_v11 = vpack.c.b16 %v1501_v32, %v1500_v55  ;;  %v2221_v29 = vsel %vm2217_vm14, %v2188_v47, %v6233_v21 }
 0x178   : > { %1791 = vrot.lane.b32.xlu0 %v6430_v57, %s5757_s19  ;;  %v1172_v45 = vpack.c.bf16 %v1136_v18, %v1136_v18  ;;  %v590_v62 = vmax.f32 %v563_v19, 0.0  ;;  %v1498_v13 = vunpack.c.l.b16 %v1063_v41  ;;  %v6474_v52 = vpack.c.b16 %v1246_v10, %v1245_v2 }
 0x179   : > { %8555 = vst [vmem:[#allocation24_spill] sm:$0xff] %v6466_v11  ;;  %v1499_v14 = vunpack.c.l.b16 %v1064_v24  ;;  %v6476_v9 = vmul.f32 0.25, %v589_v60  ;;  %v1243_v15 = vunpack.c.l.b16 %v1171_v44  ;;  %v6485_v12 = vmul.f32 0.75, %v589_v60 }
 0x17a   : > { %1950 = vrot.lane.b32.xlu1 %v6332_v59, %s5758_s10  ;;  %v6439_v7 = vpop.permute.xlu0 %1739  ;;  %8556 = vst [vmem:[#allocation25_spill] sm:$0xff] %v6474_v52  ;;  %v1244_v25 = vunpack.c.l.b16 %v1172_v45  ;;  %v6479_v61 = vmul.f32 0.25, %v590_v62  ;;  %v6489_v21 = vmul.f32 0.75, %v590_v62  ;;  %v1979_v60 = vsel %vm1970_vm7, %v6059_v51, %v6250_v46 }
 0x17b   : > { %v6483_v55 = vpack.c.b16 %v1499_v14, %v1498_v13  ;;  %v643_v18 = vadd.f32 %v6476_v9, %v6344_v22  ;;  %v6503_v0 = vadd.f32 %v6363_v28, %v6485_v12  ;;  %v1355_v28 = vshrl.u32 %v6474_v52, 16 }
 0x17c   : > { %v6443_v40 = vpop.permute.xlu1 %1781  ;;  %1886 = vrot.lane.b32.xlu2 %v6430_v57, %s5760_s9  ;;  %v6497_v48 = vpack.c.b16 %v1244_v25, %v1243_v15  ;;  %v644_v37 = vadd.f32 %v6479_v61, %v6350_v17  ;;  %v666_v19 = vadd.f32 %v6374_v50, %v6489_v21  ;;  %v2025_v45 = vsel %vm2019_vm8, %v1979_v60, %v6273_v53 }
 0x17d   : > { %v754_v22 = vrot.slane %v643_v18, 7  ;;  %v757_v24 = vrot.slane %v6503_v0, 7  ;;  %v565_v10 = vpop.f32.mrf.mxu0  ;;  %v995_v13 = vmul.f32 0.75, %v643_v18  ;;  %v1357_v51 = vrot.slane %v1355_v28, 7 }
 0x17e   : > { %v6452_v36 = vpop.permute.xlu2 %1783  ;;  %8557 = vst [vmem:[#allocation26_spill] sm:$0xff] %v6497_v48  ;;  %v755_v16 = vrot.slane %v644_v37, 7  ;;  %v758_v17 = vrot.slane %v666_v19, 7  ;;  %v1348_v44 = vshrl.u32 %v6497_v48, 16  ;;  %v1358_v46 = vshll.u32 %v6474_v52, 16 }
 0x17f   : > { %v820_v2 = vsel %vm717_vm2, %v643_v18, %v754_v22  ;;  %v821_v62 = vsel %vm717_vm2, %v6503_v0, %v757_v24  ;;  %v2058_v53 = vsel %vm2052_vm9, %v2025_v45, %v6443_v40  ;;  %v997_v60 = vmul.f32 0.75, %v6503_v0 }
 0x180   : > { %1888 = vrot.lane.b32.xlu0 %v6456_v20, %s5760_s9  ;;  %v756_v47 = vsel %vm717_vm2, %v754_v22, %v755_v16  ;;  %v759_v15 = vsel %vm717_vm2, %v757_v24, %v758_v17  ;;  %v996_v22 = vmul.f32 0.75, %v644_v37  ;;  %v961_v16 = vmul.f32 0.25, %v821_v62 }
 0x181   : > { %v960_v25 = vmul.f32 0.25, %v756_v47  ;;  %v1350_v57 = vrot.slane %v1348_v44, 7  ;;  %v863_v24 = vrot.slane %v643_v18, 1  ;;  %v864_v17 = vrot.slane %v644_v37, 1 }
 0x182   : > { %1793 = vrot.lane.b32.xlu1 %v6456_v20, %s5757_s19  ;;  %v6462_v1 = vpop.permute.xlu0 %1815  ;;  %v962_v5 = vmul.f32 0.25, %v759_v15  ;;  %v998_v59 = vmul.f32 0.75, %v666_v19  ;;  %v2091_v47 = vsel %vm2085_vm10, %v2058_v53, %v6190_v34  ;;  %v1360_v40 = vor.u32 %v1358_v46, %v1357_v51 }
 0x183   : > { %v866_v45 = vrot.slane %v6503_v0, 1  ;;  %v867_v62 = vrot.slane %v666_v19, 1  ;;  %v1032_v30 = vadd.f32 %v996_v22, %v960_v25  ;;  %v1033_v18 = vadd.f32 %v997_v60, %v961_v16 }
 0x184   : > { %v6468_v26 = vpop.permute.xlu1 %1817  ;;  %1719 = vrot.lane.b32.xlu2 %v6466_v11, %s5753_s15  ;;  %v865_v33 = vsel %vm826_vm3, %v863_v24, %v864_v17  ;;  %v2124_v34 = vsel %vm2118_vm11, %v2091_v47, %v6314_v54  ;;  %v566_v51 = vadd.f32 %v6309_v31, %v565_v10 }
 0x185   : > { %v1068_v25 = vpack.c.bf16 %v1032_v30, %v1032_v30  ;;  %v1103_v53 = vmul.f32 0.25, %v865_v33  ;;  %v1069_v24 = vpack.c.bf16 %v1033_v18, %v1033_v18 }
 0x186   : > { %5611 = vmatmul.msk.bf16.gmra.mxu1 %vm2820_vm15, %v2221_v29  ;;  %v6481_v38 = vpop.permute.xlu2 %1880  ;;  %v959_v29 = vmul.f32 0.25, %v820_v2  ;;  %v1351_v2 = vshll.u32 %v6497_v48, 16 }
 0x188   : > { %1751 = vrot.lane.b32.xlu0 %v6474_v52, %s5755_s17  ;;  %v1031_v28 = vadd.f32 %v995_v13, %v959_v29  ;;  %v1353_v15 = vor.u32 %v1351_v2, %v1350_v57  ;;  %v1034_v29 = vadd.f32 %v998_v59, %v962_v5  ;;  %v6560_v57 = vsel %vm5960_vm5, 0, %v1360_v40 }
 0x189   : > { %v930_v5 = vsel %vm826_vm3, %v867_v62, %v666_v19 }
 0x18a   : > { %1717 = vrot.lane.b32.xlu1 %v6483_v55, %s5753_s15  ;;  %v6495_v6 = vpop.permute.xlu0 %1912  ;;  %v1067_v0 = vpack.c.bf16 %v1031_v28, %v1031_v28  ;;  %v6575_v30 = vsel %vm5960_vm5, 0, %v1353_v15  ;;  %v1139_v28 = vadd.f32 %v1103_v53, %v995_v13 }
 0x18c   : > { %v6505_v32 = vpop.permute.xlu1 %1847  ;;  %1749 = vrot.lane.b32.xlu2 %v6497_v48, %s5755_s17  ;;  %v1502_v33 = vunpack.c.l.b16 %v1067_v0 }
 0x18e   : > { %v6511_v41 = vpop.permute.xlu2 %1743 }
 0x18f   : > { %8558 = vst [vmem:[#allocation27_spill] sm:$0xff] %v6511_v41 }
 0x190   : > { %1827 = vrot.lane.b32.xlu0 %v6483_v55, %s5756_s18 }
 0x192   : > { %1829 = vrot.lane.b32.xlu1 %v6466_v11, %s5756_s18  ;;  %v1943_v50 = vpop.permute.xlu0 %1942 }
 0x194   : > { %v6529_v14 = vpop.permute.xlu1 %1944  ;;  %1861 = vrot.lane.b32.xlu2 %v6474_v52, %s5754_s16  ;;  %v567_v52 = vpop.f32.mrf.mxu0 }
 0x195   : > { %v568_v10 = vadd.f32 %v6309_v31, %v567_v52  ;;  %v591_v52 = vmax.f32 %v566_v51, 0.0 }
 0x196   : > { %v6538_v20 = vpop.permute.xlu2 %1819 }
 0x197   : > { %v592_v40 = vmax.f32 %v568_v10, 0.0 }
 0x198   : > { %1924 = vrot.lane.b32.xlu0 %v6466_v11, %s5759_s22  ;;  %v929_v11 = vsel %vm826_vm3, %v864_v17, %v644_v37  ;;  %v868_v37 = vsel %vm826_vm3, %v866_v45, %v867_v62  ;;  %v1070_v17 = vpack.c.bf16 %v1034_v29, %v1034_v29  ;;  %v1982_v45 = vsel %vm1970_vm7, %v6083_v35, %v6287_v56 }
 0x199   : > { %v1104_v16 = vmul.f32 0.25, %v929_v11  ;;  %v1105_v19 = vmul.f32 0.25, %v868_v37  ;;  %v1503_v11 = vunpack.c.l.b16 %v1068_v25  ;;  %v1504_v62 = vunpack.c.l.b16 %v1069_v24 }
 0x19a   : > { %1859 = vrot.lane.b32.xlu1 %v6497_v48, %s5754_s16  ;;  %v6548_v44 = vpop.permute.xlu0 %1785  ;;  %v1505_v18 = vunpack.c.l.b16 %v1070_v17  ;;  %v2027_v29 = vsel %vm2019_vm8, %v1982_v45, %v6327_v8  ;;  %v1175_v35 = vpack.c.bf16 %v1139_v28, %v1139_v28  ;;  %v6598_v37 = vmul.f32 0.75, %v592_v40 }
 0x19b   : > { %v1140_v47 = vadd.f32 %v1104_v16, %v996_v22  ;;  %v6590_v51 = vpack.c.b16 %v1503_v11, %v1502_v33  ;;  %v2060_v13 = vsel %vm2052_vm9, %v2027_v29, %v6452_v36  ;;  %v6594_v22 = vmul.f32 0.75, %v591_v52 }
 0x19c   : > { %v1879_v41 = vpop.permute.xlu1 %1878  ;;  %1922 = vrot.lane.b32.xlu2 %v6483_v55, %s5759_s22  ;;  %v6618_v16 = vadd.f32 %v6479_v61, %v6598_v37  ;;  %v6626_v24 = vmul.f32 0.25, %v591_v52  ;;  %v6633_v61 = vmul.f32 0.25, %v592_v40 }
 0x19d   : > { %v2157_v46 = vsel %vm2151_vm12, %v2124_v34, %v1879_v41  ;;  %v1141_v34 = vadd.f32 %v1105_v19, %v997_v60  ;;  %8559 = vst [vmem:[#allocation28_spill] sm:$0xff] %v6590_v51  ;;  %v1176_v56 = vpack.c.bf16 %v1140_v47, %v1140_v47  ;;  %v6602_v60 = vpack.c.b16 %v1505_v18, %v1504_v62 }
 0x19e   : > { %v2190_v54 = vsel %vm2184_vm13, %v2157_v46, %v6426_v42  ;;  %v6567_v2 = vpop.permute.xlu2 %1916  ;;  %v1106_v42 = vmul.f32 0.25, %v930_v5  ;;  %v2093_v46 = vsel %vm2085_vm10, %v2060_v13, %v6462_v1  ;;  %v6610_v25 = vadd.f32 %v6476_v9, %v6594_v22 }
 0x19f   : > { %v2223_v41 = vsel %vm2217_vm14, %v2190_v54, %v1943_v50  ;;  %8560 = vst [vmem:[#allocation29_spill] sm:$0xff] %v6602_v60  ;;  %v1177_v36 = vpack.c.bf16 %v1141_v34, %v1141_v34  ;;  %v1247_v54 = vunpack.c.l.b16 %v1175_v35  ;;  %v1248_v53 = vunpack.c.l.b16 %v1176_v56 }
 0x1a0   : > { %5612 = vmatmul.msk.bf16.gmra.mxu1 %vm2820_vm15, %v2223_v41  ;;  %1797 = vrot.lane.b32.xlu0 %v6560_v57, %s5757_s19  ;;  %v1142_v0 = vadd.f32 %v1106_v42, %v998_v59  ;;  %v2126_v59 = vsel %vm2118_vm11, %v2093_v46, %v6505_v32  ;;  %v763_v17 = vrot.slane %v6610_v25, 7  ;;  %v645_v47 = vadd.f32 %v6626_v24, %v6485_v12 }
 0x1a1   : > { %v2159_v32 = vsel %vm2151_vm12, %v2126_v59, %v6481_v38  ;;  %v1249_v41 = vunpack.c.l.b16 %v1177_v36  ;;  %v6631_v33 = vpack.c.b16 %v1248_v53, %v1247_v54  ;;  %v764_v38 = vrot.slane %v6618_v16, 7 }
 0x1a2   : > { %1890 = vrot.lane.b32.xlu1 %v6575_v30, %s5760_s9  ;;  %v6579_v50 = vpop.permute.xlu0 %1709  ;;  %v1178_v5 = vpack.c.bf16 %v1142_v0, %v1142_v0  ;;  %v2192_v19 = vsel %vm2184_vm13, %v2159_v32, %v6495_v6  ;;  %v823_v6 = vsel %vm717_vm2, %v6610_v25, %v763_v17  ;;  %v6660_v29 = vmul.f32 0.75, %v6610_v25 }
 0x1a3   : > { %8561 = vst [vmem:[#allocation30_spill] sm:$0xff] %v6631_v33  ;;  %v2225_v11 = vsel %vm2217_vm14, %v2192_v19, %v6529_v14  ;;  %v646_v14 = vadd.f32 %v6633_v61, %v6489_v21  ;;  %v765_v40 = vsel %vm717_vm2, %v763_v17, %v764_v38  ;;  %v1362_v45 = vshrl.u32 %v6631_v33, 16 }
 0x1a4   : > { %v6584_v15 = vpop.permute.xlu1 %1711  ;;  %1795 = vrot.lane.b32.xlu2 %v6575_v30, %s5757_s19  ;;  %v1250_v9 = vunpack.c.l.b16 %v1178_v5  ;;  %v965_v18 = vmul.f32 0.25, %v823_v6  ;;  %v966_v34 = vmul.f32 0.25, %v765_v40  ;;  %v6665_v0 = vmul.f32 0.75, %v6618_v16  ;;  %v570_v40 = vpop.f32.mrf.mxu0 }
 0x1a5   : > { %v869_v12 = vrot.slane %v645_v47, 1  ;;  %v870_v13 = vrot.slane %v646_v14, 1  ;;  %v1364_v35 = vrot.slane %v1362_v45, 7  ;;  %v1365_v56 = vshll.u32 %v6631_v33, 16 }
 0x1a6   : > { %v6600_v8 = vpop.permute.xlu2 %1946  ;;  %v6643_v52 = vpack.c.b16 %v1250_v9, %v1249_v41  ;;  %v1037_v46 = vadd.f32 %v6660_v29, %v965_v18  ;;  %v1985_v59 = vsel %vm1970_vm7, %v6150_v49, %v6300_v4  ;;  %v1038_v36 = vadd.f32 %v6665_v0, %v966_v34 }
 0x1a7   : > { %v2029_v54 = vsel %vm2019_vm8, %v1985_v59, %v6369_v23  ;;  %v871_v53 = vsel %vm826_vm3, %v869_v12, %v870_v13  ;;  %v931_v32 = vsel %vm826_vm3, %v870_v13, %v646_v14  ;;  %v1367_v41 = vor.u32 %v1365_v56, %v1364_v35 }
 0x1a8   : > { %1721 = vrot.lane.b32.xlu0 %v6590_v51, %s5753_s15  ;;  %8562 = vst [vmem:[#allocation31_spill] sm:$0xff] %v6643_v52  ;;  %v760_v9 = vrot.slane %v645_v47, 7  ;;  %v761_v17 = vrot.slane %v646_v14, 7  ;;  %v2062_v49 = vsel %vm2052_vm9, %v2029_v54, %v6548_v44  ;;  %v872_v19 = vrot.slane %v6610_v25, 1 }
 0x1a9   : > { %v999_v38 = vmul.f32 0.75, %v645_v47  ;;  %v873_v6 = vrot.slane %v6618_v16, 1  ;;  %v1000_v23 = vmul.f32 0.75, %v646_v14  ;;  %v1074_v45 = vpack.c.bf16 %v1038_v36, %v1038_v36 }
 0x1aa   : > { %1723 = vrot.lane.b32.xlu1 %v6602_v60, %s5753_s15  ;;  %v6614_v1 = vpop.permute.xlu0 %1821  ;;  %v1107_v18 = vmul.f32 0.25, %v871_v53  ;;  %v1108_v34 = vmul.f32 0.25, %v931_v32  ;;  %v2095_v12 = vsel %vm2085_vm10, %v2062_v49, %v6468_v26  ;;  %v6697_v44 = vsel %vm5960_vm5, 0, %v1367_v41 }
 0x1ab   : > { %v822_v25 = vsel %vm717_vm2, %v645_v47, %v760_v9  ;;  %v762_v35 = vsel %vm717_vm2, %v760_v9, %v761_v17  ;;  %v1369_v14 = vshrl.u32 %v6643_v52, 16  ;;  %v1509_v36 = vunpack.c.l.b16 %v1074_v45 }
 0x1ac   : > { %v6622_v10 = vpop.permute.xlu1 %1741  ;;  %1892 = vrot.lane.b32.xlu2 %v6560_v57, %s5760_s9  ;;  %v1143_v59 = vadd.f32 %v1107_v18, %v999_v38  ;;  %v1144_v26 = vadd.f32 %v1108_v34, %v1000_v23  ;;  %v2128_v54 = vsel %vm2118_vm11, %v2095_v12, %v6396_v58  ;;  %v963_v53 = vmul.f32 0.25, %v822_v25 }
 0x1ad   : > { %v932_v32 = vsel %vm826_vm3, %v873_v6, %v6618_v16  ;;  %v964_v41 = vmul.f32 0.25, %v762_v35  ;;  %v1988_v45 = vsel %vm1970_vm7, %v6160_v3, %v6335_v43  ;;  %v572_v3 = vpop.f32.mrf.mxu0 }
 0x1ae   : > { %v6636_v42 = vpop.permute.xlu2 %1789  ;;  %v1110_v16 = vmul.f32 0.25, %v932_v32  ;;  %v1180_v34 = vpack.c.bf16 %v1144_v26, %v1144_v26  ;;  %v1035_v25 = vadd.f32 %v999_v38, %v963_v53 }
 0x1af   : > { %v1036_v35 = vadd.f32 %v1000_v23, %v964_v41 }
 0x1b0   : > { %5613 = vmatmul.msk.bf16.gmra.mxu1 %vm2820_vm15, %v2225_v11  ;;  %1833 = vrot.lane.b32.xlu0 %v6602_v60, %s5756_s18  ;;  %v1073_v11 = vpack.c.bf16 %v1037_v46, %v1037_v46  ;;  %v874_v46 = vsel %vm826_vm3, %v872_v19, %v873_v6  ;;  %v1371_v19 = vrot.slane %v1369_v14, 7  ;;  %v1179_v6 = vpack.c.bf16 %v1143_v59, %v1143_v59 }
 0x1b1   : > { %v1109_v18 = vmul.f32 0.25, %v874_v46  ;;  %v1146_v59 = vadd.f32 %v1110_v16, %v6665_v0  ;;  %v1071_v23 = vpack.c.bf16 %v1035_v25, %v1035_v25 }
 0x1b2   : > { %1753 = vrot.lane.b32.xlu1 %v6631_v33, %s5755_s17  ;;  %v6649_v28 = vpop.permute.xlu0 %1851  ;;  %v1508_v56 = vunpack.c.l.b16 %v1073_v11  ;;  %v1372_v11 = vshll.u32 %v6643_v52, 16  ;;  %v1251_v26 = vunpack.c.l.b16 %v1179_v6 }
 0x1b4   : > { %v6657_v62 = vpop.permute.xlu1 %1853  ;;  %1755 = vrot.lane.b32.xlu2 %v6643_v52, %s5755_s17  ;;  %v6721_v12 = vpack.c.b16 %v1509_v36, %v1508_v56  ;;  %v1374_v46 = vor.u32 %v1372_v11, %v1371_v19  ;;  %v571_v56 = vadd.f32 %v6309_v31, %v570_v40  ;;  %v1252_v36 = vunpack.c.l.b16 %v1180_v34 }
 0x1b6   : > { %v6667_v21 = vpop.permute.xlu2 %1713  ;;  %v593_v53 = vmax.f32 %v571_v56, 0.0  ;;  %v6747_v32 = vpack.c.b16 %v1252_v36, %v1251_v26  ;;  %v678_v56 = vstv %s674_s11 }
 0x1b8   : > { %1863 = vrot.lane.b32.xlu0 %v6631_v33, %s5754_s16  ;;  %8564 = vst [vmem:[#allocation33_spill] sm:$0xff] %v6747_v32  ;;  %v629_v11 = vmul.f32 0.25, %v593_v53 }
 0x1ba   : > { %1865 = vrot.lane.b32.xlu1 %v6643_v52, %s5754_s16  ;;  %v6679_v5 = vpop.permute.xlu0 %1948 }
 0x1bc   : > { %v1915_v4 = vpop.permute.xlu1 %1914  ;;  %1831 = vrot.lane.b32.xlu2 %v6590_v51, %s5756_s18 }
 0x1be   : > { %v6693_v13 = vpop.permute.xlu2 %1825 }
 0x1c0   : > { %1894 = vrot.lane.b32.xlu0 %v6697_v44, %s5760_s9 }
 0x1c2   : > { %1926 = vrot.lane.b32.xlu1 %v6590_v51, %s5759_s22  ;;  %v1883_v47 = vpop.permute.xlu0 %1882 }
 0x1c3   : > { %v2161_v9 = vsel %vm2151_vm12, %v2128_v54, %v1883_v47  ;;  %v1072_v54 = vpack.c.bf16 %v1036_v35, %v1036_v35 }
 0x1c4   : > { %v1788_v17 = vpop.permute.xlu1 %1787  ;;  %v2194_v49 = vsel %vm2184_vm13, %v2161_v9, %v1915_v4  ;;  %1928 = vrot.lane.b32.xlu2 %v6602_v60, %s5759_s22  ;;  %v2031_v4 = vsel %vm2019_vm8, %v1988_v45, %v6439_v7  ;;  %v573_v7 = vadd.f32 %v6309_v31, %v572_v3  ;;  %v1182_v31 = vpack.c.bf16 %v1146_v59, %v1146_v59 }
 0x1c5   : > { %v2227_v58 = vsel %vm2217_vm14, %v2194_v49, %v6600_v8  ;;  %v2064_v14 = vsel %vm2052_vm9, %v2031_v4, %v1788_v17  ;;  %v1145_v8 = vadd.f32 %v1109_v18, %v6660_v29  ;;  %v6743_v29 = vsel %vm5960_vm5, 0, %v1374_v46 }
 0x1c6   : > { %5614 = vmatmul.msk.bf16.gmra.mxu1 %vm2820_vm15, %v2227_v58  ;;  %v6726_v43 = vpop.permute.xlu2 %1855  ;;  %v2097_v47 = vsel %vm2085_vm10, %v2064_v14, %v6538_v20  ;;  %8563 = vst [vmem:[#allocation32_spill] sm:$0xff] %v6743_v29  ;;  %v594_v41 = vmax.f32 %v573_v7, 0.0  ;;  %v1506_v17 = vunpack.c.l.b16 %v1071_v23  ;;  %v1507_v20 = vunpack.c.l.b16 %v1072_v54 }
 0x1c7   : > { %v1181_v0 = vpack.c.bf16 %v1145_v8, %v1145_v8  ;;  %v2130_v9 = vsel %vm2118_vm11, %v2097_v47, %v6649_v28  ;;  %v1254_v18 = vunpack.c.l.b16 %v1182_v31  ;;  %v647_v4 = vadd.f32 %v629_v11, %v6594_v22 }
 0x1c8   : > { %1727 = vrot.lane.b32.xlu0 %v6721_v12, %s5753_s15  ;;  %v630_v58 = vmul.f32 0.25, %v594_v41  ;;  %v6763_v6 = vpack.c.b16 %v1507_v20, %v1506_v17  ;;  %v652_v25 = vmul.f32 0.75, %v594_v41  ;;  %v651_v46 = vmul.f32 0.75, %v593_v53 }
 0x1c9   : > { %v1253_v45 = vunpack.c.l.b16 %v1181_v0  ;;  %v766_v22 = vrot.slane %v647_v4, 7  ;;  %v875_v54 = vrot.slane %v647_v4, 1  ;;  %v1379_v31 = vshll.u32 %v6747_v32, 16 }
 0x1ca   : > { %1799 = vrot.lane.b32.xlu1 %v6697_v44, %s5757_s19  ;;  %v6737_v38 = vpop.permute.xlu0 %1715  ;;  %v648_v14 = vadd.f32 %v630_v58, %v6598_v37  ;;  %v670_v8 = vadd.f32 %v652_v25, %v6633_v61  ;;  %v1376_v37 = vshrl.u32 %v6747_v32, 16  ;;  %v669_v36 = vadd.f32 %v651_v46, %v6626_v24 }
 0x1cb   : > { %v6772_v3 = vpack.c.b16 %v1254_v18, %v1253_v45  ;;  %v824_v23 = vsel %vm717_vm2, %v647_v4, %v766_v22  ;;  %v1991_v45 = vsel %vm1970_vm7, %v6262_v27, %v6579_v50 }
 0x1cc   : > { %v1885_v40 = vpop.permute.xlu1 %1884  ;;  %1801 = vrot.lane.b32.xlu2 %v6743_v29, %s5757_s19  ;;  %v767_v59 = vrot.slane %v648_v14, 7  ;;  %v876_v26 = vrot.slane %v648_v14, 1  ;;  %v680_v47 = vmul.f32 %v678_v56, %v670_v8  ;;  %v1378_v53 = vrot.slane %v1376_v37, 7 }
 0x1cd   : > { %v2163_v19 = vsel %vm2151_vm12, %v2130_v9, %v1885_v40  ;;  %8565 = vst [vmem:[#allocation34_spill] sm:$0xff] %v6772_v3  ;;  %v679_v41 = vmul.f32 %v678_v56, %v669_v36  ;;  %v967_v24 = vmul.f32 0.25, %v824_v23  ;;  %v1003_v9 = vmul.f32 0.75, %v647_v4 }
 0x1ce   : > { %v6751_v49 = vpop.permute.xlu2 %1952  ;;  %v2196_v28 = vsel %vm2184_vm13, %v2163_v19, %v6567_v2  ;;  %v768_v61 = vsel %vm717_vm2, %v766_v22, %v767_v59  ;;  %v933_v40 = vsel %vm826_vm3, %v876_v26, %v648_v14  ;;  %v877_v17 = vsel %vm826_vm3, %v875_v54, %v876_v26 }
 0x1cf   : > { %v2229_v35 = vsel %vm2217_vm14, %v2196_v28, %v6679_v5  ;;  %v879_v20 = vrot.slane %v680_v47, 1  ;;  %v968_v19 = vmul.f32 0.25, %v768_v61  ;;  %v1004_v11 = vmul.f32 0.75, %v648_v14 }
 0x1d0   : > { %1757 = vrot.lane.b32.xlu0 %v6747_v32, %s5755_s17  ;;  %v1112_v18 = vmul.f32 0.25, %v933_v40  ;;  %v1383_v28 = vshrl.u32 %v6772_v3, 16  ;;  %v2033_v4 = vsel %vm2019_vm8, %v1991_v45, %v6622_v10  ;;  %v1381_v25 = vor.u32 %v1379_v31, %v1378_v53 }
 0x1d1   : > { %v1111_v46 = vmul.f32 0.25, %v877_v17  ;;  %v878_v14 = vrot.slane %v679_v41, 1  ;;  %v934_v8 = vsel %vm826_vm3, %v879_v20, %v680_v47  ;;  %v1040_v56 = vadd.f32 %v1004_v11, %v968_v19 }
 0x1d2   : > { %1896 = vrot.lane.b32.xlu1 %v6743_v29, %s5760_s9  ;;  %v6759_v16 = vpop.permute.xlu0 %1745  ;;  %v1148_v27 = vadd.f32 %v1112_v18, %v1004_v11  ;;  %v2066_v50 = vsel %vm2052_vm9, %v2033_v4, %v6636_v42  ;;  %v1385_v59 = vrot.slane %v1383_v28, 7  ;;  %v1386_v26 = vshll.u32 %v6772_v3, 16 }
 0x1d3   : > { %v769_v10 = vrot.slane %v679_v41, 7  ;;  %v770_v37 = vrot.slane %v680_v47, 7  ;;  %v6820_v23 = vsel %vm5960_vm5, 0, %v1381_v25  ;;  %v1147_v61 = vadd.f32 %v1111_v46, %v1003_v9 }
 0x1d4   : > { %v6765_v34 = vpop.permute.xlu1 %1747  ;;  %1725 = vrot.lane.b32.xlu2 %v6763_v6, %s5753_s15  ;;  %8567 = vst [vmem:[#allocation36_spill] sm:$0xff] %v6820_v23  ;;  %v1076_v40 = vpack.c.bf16 %v1040_v56, %v1040_v56  ;;  %v1114_v53 = vmul.f32 0.25, %v934_v8  ;;  %v2099_v42 = vsel %vm2085_vm10, %v2066_v50, %v6614_v1  ;;  %v880_v31 = vsel %vm826_vm3, %v878_v14, %v879_v20  ;;  %vm7011_vm3 = vmand %vm1676_vm0, %vm1677_vm1 }
 0x1d5   : > { %v1184_v17 = vpack.c.bf16 %v1148_v27, %v1148_v27  ;;  %v2132_v19 = vsel %vm2118_vm11, %v2099_v42, %v6657_v62  ;;  %v1388_v11 = vor.u32 %v1386_v26, %v1385_v59  ;;  %v771_v1 = vsel %vm717_vm2, %v769_v10, %v770_v37 }
 0x1d6   : > { %5615 = vmatmul.msk.bf16.gmra.mxu1 %vm2820_vm15, %v2229_v35  ;;  %v6776_v2 = vpop.permute.xlu2 %1886  ;;  %v1039_v35 = vadd.f32 %v1003_v9, %v967_v24  ;;  %v1994_v24 = vsel %vm1970_vm7, %v6285_v63, %v6584_v15  ;;  %v825_v20 = vsel %vm717_vm2, %v679_v41, %v769_v10  ;;  %v1005_v18 = vmul.f32 0.75, %v679_v41  ;;  %v8569_v41 = vld [vmem:[#allocation27_spill] sm:$0xff] }
 0x1d7   : > { %v2165_v45 = vsel %vm2151_vm12, %v2132_v19, %v6776_v2  ;;  %v1183_v15 = vpack.c.bf16 %v1147_v61, %v1147_v61  ;;  %v1006_v4 = vmul.f32 0.75, %v680_v47  ;;  %v1113_v25 = vmul.f32 0.25, %v880_v31 }
 0x1d8   : > { %1869 = vrot.lane.b32.xlu0 %v6772_v3, %s5754_s16  ;;  %v1075_v54 = vpack.c.bf16 %v1039_v35, %v1039_v35  ;;  %v969_v2 = vmul.f32 0.25, %v825_v20  ;;  %v970_v46 = vmul.f32 0.25, %v771_v1  ;;  %v1256_v14 = vunpack.c.l.b16 %v1184_v17 }
 0x1d9   : > { %v1511_v8 = vunpack.c.l.b16 %v1076_v40  ;;  %v6849_v47 = vsel %vm5960_vm5, 0, %v1388_v11  ;;  %v1255_v50 = vunpack.c.l.b16 %v1183_v15  ;;  %v1149_v59 = vadd.f32 %v1113_v25, %v1005_v18 }
 0x1da   : > { %1759 = vrot.lane.b32.xlu1 %v6772_v3, %s5755_s17  ;;  %v6783_v5 = vpop.permute.xlu0 %1857  ;;  %v1510_v35 = vunpack.c.l.b16 %v1075_v54  ;;  %v1150_v26 = vadd.f32 %v1114_v53, %v1006_v4  ;;  %v1041_v37 = vadd.f32 %v1005_v18, %v969_v2  ;;  %v1042_v54 = vadd.f32 %v1006_v4, %v970_v46 }
 0x1db   : > { %v6862_v31 = vpack.c.b16 %v1256_v14, %v1255_v50 }
 0x1dc   : > { %v6787_v7 = vpop.permute.xlu1 %1823  ;;  %1837 = vrot.lane.b32.xlu2 %v6721_v12, %s5756_s18  ;;  %v6858_v40 = vpack.c.b16 %v1511_v8, %v1510_v35  ;;  %v1186_v17 = vpack.c.bf16 %v1150_v26, %v1150_v26  ;;  %v1077_v19 = vpack.c.bf16 %v1041_v37, %v1041_v37  ;;  %v8574_v8 = vld [vmem:[#allocation25_spill] sm:$0xff] }
 0x1dd   : > { %8571 = vst [vmem:[#allocation38_spill] sm:$0xff] %v6862_v31  ;;  %v1393_v25 = vshll.u32 %v6862_v31, 16 }
 0x1de   : > { %v6794_v0 = vpop.permute.xlu2 %1719  ;;  %8570 = vst [vmem:[#allocation27_spill] sm:$0xff] %v6858_v40  ;;  %v1258_v20 = vunpack.c.l.b16 %v1186_v17 }
 0x1e0   : > { %1930 = vrot.lane.b32.xlu0 %v6763_v6, %s5759_s22 }
 0x1e2   : > { %1835 = vrot.lane.b32.xlu1 %v6763_v6, %s5756_s18  ;;  %v1919_v58 = vpop.permute.xlu0 %1918 }
 0x1e3   : > { %v2198_v28 = vsel %vm2184_vm13, %v2165_v45, %v1919_v58  ;;  %v2035_v58 = vsel %vm2019_vm8, %v1994_v24, %v8569_v41  ;;  %v1185_v24 = vpack.c.bf16 %v1149_v59, %v1149_v59  ;;  %v1390_v45 = vshrl.u32 %v6862_v31, 16 }
 0x1e4   : > { %v6808_v22 = vpop.permute.xlu1 %1920  ;;  %1867 = vrot.lane.b32.xlu2 %v6747_v32, %s5754_s16 }
 0x1e5   : > { %v1257_v1 = vunpack.c.l.b16 %v1185_v24  ;;  %v1392_v4 = vrot.slane %v1390_v45, 7  ;;  %v8580_v45 = vld [vmem:[#allocation3_spill] sm:$0xff] }
 0x1e6   : > { %v6816_v36 = vpop.permute.xlu2 %1749 }
 0x1e7   : > { %8566 = vst [vmem:[#allocation35_spill] sm:$0xff] %v6816_v36  ;;  %v1395_v46 = vor.u32 %v1393_v25, %v1392_v4  ;;  %v8584_v4 = vld [vmem:[#allocation13_spill] sm:$0xff]  ;;  %v8585_v25 = vld [vmem:[#allocation12_spill] sm:$0xff] }
 0x1e8   : > { %1803 = vrot.lane.b32.xlu0 %v6820_v23, %s5757_s19 }
 0x1ea   : > { %1932 = vrot.lane.b32.xlu1 %v6721_v12, %s5759_s22  ;;  %v1792_v9 = vpop.permute.xlu0 %1791 }
 0x1eb   : > { %v2068_v27 = vsel %vm2052_vm9, %v2035_v58, %v1792_v9  ;;  %v1078_v9 = vpack.c.bf16 %v1042_v54, %v1042_v54 }
 0x1ec   : > { %v1951_v63 = vpop.permute.xlu1 %1950  ;;  %1898 = vrot.lane.b32.xlu2 %v6820_v23, %s5760_s9  ;;  %v2101_v61 = vsel %vm2085_vm10, %v2068_v27, %v6787_v7 }
 0x1ed   : > { %v2231_v62 = vsel %vm2217_vm14, %v2198_v28, %v1951_v63  ;;  %v2134_v53 = vsel %vm2118_vm11, %v2101_v61, %v6726_v43  ;;  %v1512_v28 = vunpack.c.l.b16 %v1077_v19  ;;  %v1513_v63 = vunpack.c.l.b16 %v1078_v9  ;;  %v8579_v9 = vld [vmem:[#allocation4_spill] sm:$0xff] }
 0x1ee   : > { %5616 = vmatmul.msk.bf16.gmra.mxu1 %vm2820_vm15, %v2231_v62  ;;  %v6843_v56 = vpop.permute.xlu2 %1861  ;;  %v6883_v62 = vpack.c.b16 %v1258_v20, %v1257_v1  ;;  %v8581_v1 = vld [vmem:[#allocation8_spill] sm:$0xff] }
 0x1ef   : > { %8568 = vst [vmem:[#allocation37_spill] sm:$0xff] %v6843_v56  ;;  %v6890_v2 = vpack.c.b16 %v1513_v63, %v1512_v28  ;;  %v8583_v28 = vld [vmem:[#allocation9_spill] sm:$0xff] }
 0x1f0   : > { %1900 = vrot.lane.b32.xlu0 %v6849_v47, %s5760_s9  ;;  %8572 = vst [vmem:[#allocation39_spill] sm:$0xff] %v6883_v62  ;;  %v1397_v14 = vshrl.u32 %v6883_v62, 16  ;;  %v1400_v50 = vshll.u32 %v6883_v62, 16 }
 0x1f1   : > { %8573 = vst [vmem:[#allocation40_spill] sm:$0xff] %v6890_v2 }
 0x1f2   : > { %1805 = vrot.lane.b32.xlu1 %v6849_v47, %s5757_s19  ;;  %v1889_v10 = vpop.permute.xlu0 %1888  ;;  %v1399_v27 = vrot.slane %v1397_v14, 7  ;;  %v8587_v14 = vld [vmem:[#allocation17_spill] sm:$0xff] }
 0x1f3   : > { %v2167_v7 = vsel %vm2151_vm12, %v2134_v53, %v1889_v10 }
 0x1f4   : > { %v6860_v42 = vpop.permute.xlu1 %1793  ;;  %1934 = vrot.lane.b32.xlu2 %v6858_v40, %s5759_s22  ;;  %v2200_v43 = vsel %vm2184_vm13, %v2167_v7, %v6808_v22  ;;  %v1402_v26 = vor.u32 %v1400_v50, %v1399_v27  ;;  %v8589_v27 = vld [vmem:[#allocation16_spill] sm:$0xff] }
 0x1f5   : > { %v2233_v35 = vsel %vm2217_vm14, %v2200_v43, %v6751_v49  ;;  %v1440_v49 = vsel %vm5960_vm5, 0, %v1395_v46  ;;  %v8590_v50 = vld [vmem:[#allocation20_spill] sm:$0xff] }
 0x1f6   : > { %v6868_v11 = vpop.permute.xlu2 %1922  ;;  %v1441_v37 = vsel %vm5960_vm5, 0, %v1402_v26 }
 0x1f8   : > { %1839 = vrot.lane.b32.xlu0 %v6858_v40, %s5756_s18 }
 0x1fa   : > { %1871 = vrot.lane.b32.xlu1 %v6862_v31, %s5754_s16  ;;  %v6876_v18 = vpop.permute.xlu0 %1751 }
 0x1fc   : > { %v6880_v15 = vpop.permute.xlu1 %1717  ;;  %1958 = vrot.lane.b32.xlu2 %v6631_v33, %s5758_s10 }
 0x1fe   : > { %5617 = vmatmul.msk.bf16.gmra.mxu1 %vm2820_vm15, %v2233_v35  ;;  %v6892_v22 = vpop.permute.xlu2 %1795 }
 0x200   : > { %1936 = vrot.lane.b32.xlu0 %v6890_v2, %s5759_s22 }
 0x202   : > { %1956 = vrot.lane.b32.xlu1 %v8574_v8, %s5758_s10  ;;  %v6899_v41 = vpop.permute.xlu0 %1827 }
 0x204   : > { %v6903_v58 = vpop.permute.xlu1 %1829  ;;  %1807 = vrot.lane.b32.xlu2 %v1440_v49, %s5757_s19 }
 0x205   : > { %8575 = vst [vmem:[#allocation41_spill] sm:$0xff] %v6903_v58 }
 0x206   : > { %v6907_v59 = vpop.permute.xlu2 %1892 }
 0x208   : > { %1954 = vrot.lane.b32.xlu0 %v6497_v48, %s5758_s10 }
 0x20a   : > { %1902 = vrot.lane.b32.xlu1 %v1440_v49, %s5760_s9  ;;  %v6912_v10 = vpop.permute.xlu0 %1924 }
 0x20c   : > { %v6916_v54 = vpop.permute.xlu1 %1859  ;;  %1904 = vrot.lane.b32.xlu2 %v1441_v37, %s5760_s9 }
 0x20e   : > { %v6919_v61 = vpop.permute.xlu2 %1755 }
 0x20f   : > { %8576 = vst [vmem:[#allocation42_spill] sm:$0xff] %v6919_v61 }
 0x210   : > { %1960 = vrot.lane.b32.xlu0 %v6643_v52, %s5758_s10 }
 0x212   : > { %1962 = vrot.lane.b32.xlu1 %v6747_v32, %s5758_s10  ;;  %v6925_v24 = vpop.permute.xlu0 %1797 }
 0x213   : > { %8577 = vst [vmem:[#allocation43_spill] sm:$0xff] %v6925_v24 }
 0x214   : > { %v6927_v17 = vpop.permute.xlu1 %1890  ;;  %1964 = vrot.lane.b32.xlu2 %v6772_v3, %s5758_s10 }
 0x216   : > { %v6931_v39 = vpop.permute.xlu2 %1831 }
 0x218   : > { %1966 = vrot.lane.b32.xlu0 %v6862_v31, %s5758_s10  ;;  %v8595_v31 = vld [vmem:[#allocation6_spill] sm:$0xff] }
 0x219   : > { %v1535_v40 = vshll.u32 %v8595_v31, 16 }
 0x21a   : > { %1968 = vrot.lane.b32.xlu1 %v6883_v62, %s5758_s10  ;;  %v6937_v53 = vpop.permute.xlu0 %1721 }
 0x21c   : > { %v6939_v19 = vpop.permute.xlu1 %1723  ;;  %2250 = vrot.lane.b32.xlu2 %v8579_v9, %s5753_s15  ;;  %v8593_v9 = vld [vmem:[#allocation21_spill] sm:$0xff] }
 0x21d   : > { %8578 = vst [vmem:[#allocation44_spill] sm:$0xff] %v6939_v19  ;;  %v8610_v19 = vld [vmem:[#allocation15_spill] sm:$0xff] }
 0x21e   : > { %v6943_v7 = vpop.permute.xlu2 %1928  ;;  %v1584_v58 = vshll.u32 %v8610_v19, 16 }
 0x220   : > { %2252 = vrot.lane.b32.xlu0 %v8580_v45, %s5753_s15 }
 0x222   : > { %2254 = vrot.lane.b32.xlu1 %v8581_v1, %s5753_s15  ;;  %v6949_v20 = vpop.permute.xlu0 %1833 }
 0x223   : > { %8582 = vst [vmem:[#allocation4_spill] sm:$0xff] %v6949_v20 }
 0x224   : > { %v6951_v43 = vpop.permute.xlu1 %1753  ;;  %2256 = vrot.lane.b32.xlu2 %v8583_v28, %s5753_s15  ;;  %v8600_v28 = vld [vmem:[#allocation7_spill] sm:$0xff] }
 0x225   : > { %v1554_v56 = vshrl.u32 %v8600_v28, 16 }
 0x226   : > { %v6955_v63 = vpop.permute.xlu2 %1801 }
 0x228   : > { %2258 = vrot.lane.b32.xlu0 %v8584_v4, %s5753_s15 }
 0x22a   : > { %2260 = vrot.lane.b32.xlu1 %v8585_v25, %s5753_s15  ;;  %v6961_v35 = vpop.permute.xlu0 %1863  ;;  %v1537_v25 = vrot.slane %v1535_v40, 1  ;;  %v1556_v40 = vshll.u32 %v8600_v28, 16 }
 0x22c   : > { %v6963_v46 = vpop.permute.xlu1 %1865  ;;  %2262 = vrot.lane.b32.xlu2 %v8587_v14, %s5753_s15 }
 0x22d   : > { %8586 = vst [vmem:[#allocation3_spill] sm:$0xff] %v6963_v46 }
 0x22e   : > { %v6967_v49 = vpop.permute.xlu2 %1725 }
 0x22f   : > { %8588 = vst [vmem:[#allocation45_spill] sm:$0xff] %v6967_v49 }
 0x230   : > { %2264 = vrot.lane.b32.xlu0 %v8589_v27, %s5753_s15  ;;  %v8596_v27 = vld [vmem:[#allocation2_spill] sm:$0xff] }
 0x231   : > { %v1542_v14 = vshll.u32 %v8596_v27, 16 }
 0x232   : > { %2266 = vrot.lane.b32.xlu1 %v8590_v50, %s5753_s15  ;;  %v6973_v26 = vpop.permute.xlu0 %1894 }
 0x233   : > { %8591 = vst [vmem:[#allocation46_spill] sm:$0xff] %v6973_v26 }
 0x234   : > { %v6975_v37 = vpop.permute.xlu1 %1926  ;;  %2268 = vrot.lane.b32.xlu2 %v8593_v9, %s5753_s15 }
 0x235   : > { %8592 = vst [vmem:[#allocation47_spill] sm:$0xff] %v6975_v37 }
 0x236   : > { %v6979_v62 = vpop.permute.xlu2 %1837 }
 0x237   : > { %8594 = vst [vmem:[#allocation48_spill] sm:$0xff] %v6979_v62  ;;  %v1533_v62 = vshrl.u32 %v8595_v31, 16  ;;  %v8601_v31 = vld [vmem:[#allocation10_spill] sm:$0xff] }
 0x238   : > { %2270 = vrot.lane.b32.xlu0 %v6497_v48, %s5753_s15  ;;  %v8598_v48 = vld [vmem:[#allocation5_spill] sm:$0xff]  ;;  %v1563_v37 = vshll.u32 %v8601_v31, 16 }
 0x239   : > { %v1549_v4 = vshll.u32 %v8598_v48, 16  ;;  %v1538_v49 = vor.u32 %v1537_v25, %v1533_v62  ;;  %v1558_v25 = vrot.slane %v1556_v40, 1 }
 0x23a   : > { %2272 = vrot.lane.b32.xlu1 %v8574_v8, %s5753_s15  ;;  %v6985_v2 = vpop.permute.xlu0 %1727  ;;  %v1544_v8 = vrot.slane %v1542_v14, 1 }
 0x23b   : > { %v1679_v62 = vsel %vm7011_vm3, %v1538_v49, 0  ;;  %v1561_v49 = vshrl.u32 %v8601_v31, 16  ;;  %v1559_v40 = vor.u32 %v1558_v25, %v1554_v56 }
 0x23c   : > { %v6988_v50 = vpop.permute.xlu1 %1799  ;;  %2274 = vrot.lane.b32.xlu2 %v6631_v33, %s5753_s15  ;;  %v1540_v33 = vshrl.u32 %v8596_v27, 16 }
 0x23d   : > { %v7046_v56 = vsel %vm7011_vm3, %v1559_v40, 0 }
 0x23e   : > { %v6993_v9 = vpop.permute.xlu2 %1867  ;;  %v1545_v14 = vor.u32 %v1544_v8, %v1540_v33  ;;  %v1565_v8 = vrot.slane %v1563_v37, 1  ;;  %8612 = vst [vmem:[#allocation49_spill] sm:$0xff] %v7046_v56 }
 0x23f   : > { %8597 = vst [vmem:[#allocation2_spill] sm:$0xff] %v6993_v9 }
 0x240   : > { %2276 = vrot.lane.b32.xlu0 %v6643_v52, %s5753_s15  ;;  %v1551_v52 = vrot.slane %v1549_v4, 1  ;;  %v8605_v4 = vld [vmem:[#allocation11_spill] sm:$0xff]  ;;  %v7023_v33 = vsel %vm7011_vm3, %v1545_v14, 0  ;;  %v1566_v37 = vor.u32 %v1565_v8, %v1561_v49  ;;  %v1582_v49 = vshrl.u32 %v8610_v19, 16 }
 0x241   : > { %8606 = vst [vmem:[#allocation10_spill] sm:$0xff] %v7023_v33 }
 0x242   : > { %2278 = vrot.lane.b32.xlu1 %v6747_v32, %s5753_s15  ;;  %v7001_v23 = vpop.permute.xlu0 %1757  ;;  %v1547_v32 = vshrl.u32 %v8598_v48, 16  ;;  %v7054_v8 = vsel %vm7011_vm3, %v1566_v37, 0 }
 0x243   : > { %8599 = vst [vmem:[#allocation5_spill] sm:$0xff] %v7001_v23 }
 0x244   : > { %v7005_v9 = vpop.permute.xlu1 %1896  ;;  %2280 = vrot.lane.b32.xlu2 %v6772_v3, %s5753_s15  ;;  %v1552_v26 = vor.u32 %v1551_v52, %v1547_v32  ;;  %v1570_v3 = vshll.u32 %v8605_v4, 16  ;;  %v8608_v52 = vld [vmem:[#allocation14_spill] sm:$0xff] }
 0x245   : > { %v1577_v32 = vshll.u32 %v8608_v52, 16 }
 0x246   : > { %v7015_v61 = vpop.permute.xlu2 %1898  ;;  %v1572_v14 = vrot.slane %v1570_v3, 1  ;;  %v8613_v3 = vld [vmem:[#allocation19_spill] sm:$0xff] }
 0x247   : > { %8604 = vst [vmem:[#allocation7_spill] sm:$0xff] %v7015_v61  ;;  %v1579_v25 = vrot.slane %v1577_v32, 1  ;;  %v8616_v32 = vld [vmem:[#allocation18_spill] sm:$0xff]  ;;  %v1589_v37 = vshrl.u32 %v8613_v3, 16 }
 0x248   : > { %2298 = vrot.lane.b32.xlu0 %v1679_v62, %s5755_s17  ;;  %v7034_v62 = vsel %vm7011_vm3, %v1552_v26, 0  ;;  %v1575_v26 = vshrl.u32 %v8608_v52, 16  ;;  %8614 = vst [vmem:[#allocation19_spill] sm:$0xff] %v7054_v8 }
 0x249   : > { %8609 = vst [vmem:[#allocation14_spill] sm:$0xff] %v7034_v62 }
 0x24a   : > { %2300 = vrot.lane.b32.xlu1 %v7023_v33, %s5755_s17  ;;  %v7028_v1 = vpop.permute.xlu0 %1869  ;;  %v1580_v46 = vor.u32 %v1579_v25, %v1575_v26 }
 0x24b   : > { %8607 = vst [vmem:[#allocation11_spill] sm:$0xff] %v7028_v1  ;;  %v1568_v1 = vshrl.u32 %v8605_v4, 16 }
 0x24c   : > { %v7036_v29 = vpop.permute.xlu1 %1759  ;;  %2302 = vrot.lane.b32.xlu2 %v7034_v62, %s5755_s17  ;;  %v1591_v62 = vshll.u32 %v8613_v3, 16  ;;  %v7076_v26 = vsel %vm7011_vm3, %v1580_v46, 0 }
 0x24d   : > { %v1573_v33 = vor.u32 %v1572_v14, %v1568_v1  ;;  %v1598_v1 = vshll.u32 %v8616_v32, 16  ;;  %8620 = vst [vmem:[#allocation53_spill] sm:$0xff] %v7076_v26 }
 0x24e   : > { %v7042_v61 = vpop.permute.xlu2 %1934  ;;  %v1593_v24 = vrot.slane %v1591_v62, 1  ;;  %v8621_v62 = vld [vmem:[#allocation24_spill] sm:$0xff] }
 0x24f   : > { %8611 = vst [vmem:[#allocation15_spill] sm:$0xff] %v7042_v61  ;;  %v1586_v61 = vrot.slane %v1584_v58, 1  ;;  %v7064_v14 = vsel %vm7011_vm3, %v1573_v33, 0  ;;  %v1596_v33 = vshrl.u32 %v8616_v32, 16  ;;  %v1600_v25 = vrot.slane %v1598_v1, 1 }
 0x250   : > { %2304 = vrot.lane.b32.xlu0 %v7046_v56, %s5755_s17  ;;  %8617 = vst [vmem:[#allocation18_spill] sm:$0xff] %v7064_v14 }
 0x251   : > { %v1587_v58 = vor.u32 %v1586_v61, %v1582_v49  ;;  %v1603_v49 = vshrl.u32 %v6483_v55, 16 }
 0x252   : > { %2306 = vrot.lane.b32.xlu1 %v7054_v8, %s5755_s17  ;;  %v7059_v40 = vpop.permute.xlu0 %1930  ;;  %v1605_v8 = vshll.u32 %v6483_v55, 16 }
 0x253   : > { %8615 = vst [vmem:[#allocation50_spill] sm:$0xff] %v7059_v40  ;;  %v1594_v40 = vor.u32 %v1593_v24, %v1589_v37  ;;  %v7084_v61 = vsel %vm7011_vm3, %v1587_v58, 0  ;;  %v1619_v24 = vshll.u32 %v6590_v51, 16  ;;  %v1610_v58 = vshrl.u32 %v8621_v62, 16 }
 0x254   : > { %v7066_v56 = vpop.permute.xlu1 %1835  ;;  %2308 = vrot.lane.b32.xlu2 %v7064_v14, %s5755_s17  ;;  %8622 = vst [vmem:[#allocation54_spill] sm:$0xff] %v7084_v61  ;;  %v1607_v14 = vrot.slane %v1605_v8, 1 }
 0x255   : > { %8618 = vst [vmem:[#allocation51_spill] sm:$0xff] %v7066_v56  ;;  %v1612_v56 = vshll.u32 %v8621_v62, 16  ;;  %v7094_v1 = vsel %vm7011_vm3, %v1594_v40, 0  ;;  %v1621_v40 = vrot.slane %v1619_v24, 1 }
 0x256   : > { %v7072_v20 = vpop.permute.xlu2 %1958  ;;  %8624 = vst [vmem:[#allocation56_spill] sm:$0xff] %v7094_v1  ;;  %v1608_v8 = vor.u32 %v1607_v14, %v1603_v49  ;;  %v1624_v14 = vshrl.u32 %v6602_v60, 16 }
 0x257   : > { %8619 = vst [vmem:[#allocation52_spill] sm:$0xff] %v7072_v20  ;;  %v1601_v20 = vor.u32 %v1600_v25, %v1596_v33  ;;  %v1617_v25 = vshrl.u32 %v6590_v51, 16 }
 0x258   : > { %2310 = vrot.lane.b32.xlu0 %v7076_v26, %s5755_s17  ;;  %v1614_v26 = vrot.slane %v1612_v56, 1  ;;  %v1633_v56 = vshll.u32 %v6763_v6, 16 }
 0x259   : > { %v7104_v33 = vsel %vm7011_vm3, %v1601_v20, 0  ;;  %v1622_v51 = vor.u32 %v1621_v40, %v1617_v25  ;;  %v1638_v25 = vshrl.u32 %v6721_v12, 16 }
 0x25a   : > { %2312 = vrot.lane.b32.xlu1 %v7084_v61, %s5755_s17  ;;  %v7089_v46 = vpop.permute.xlu0 %1803  ;;  %v1626_v61 = vshll.u32 %v6602_v60, 16  ;;  %8625 = vst [vmem:[#allocation57_spill] sm:$0xff] %v7104_v33 }
 0x25b   : > { %8623 = vst [vmem:[#allocation55_spill] sm:$0xff] %v7089_v46  ;;  %v1615_v46 = vor.u32 %v1614_v26, %v1610_v58  ;;  %v1640_v26 = vshll.u32 %v6721_v12, 16 }
 0x25c   : > { %v7096_v37 = vpop.permute.xlu1 %1932  ;;  %2314 = vrot.lane.b32.xlu2 %v7094_v1, %s5755_s17  ;;  %v7112_v1 = vsel %vm7011_vm3, %v1608_v8, 0  ;;  %v1628_v49 = vrot.slane %v1626_v61, 1  ;;  %v1631_v8 = vshrl.u32 %v6763_v6, 16 }
 0x25d   : > { %8626 = vst [vmem:[#allocation58_spill] sm:$0xff] %v7112_v1  ;;  %v7122_v24 = vsel %vm7011_vm3, %v1615_v46, 0  ;;  %v1642_v40 = vrot.slane %v1640_v26, 1  ;;  %v2018_v46 = vsel %vm1970_vm7, %v6849_v47, %v6985_v2 }
 0x25e   : > { %v1808_v36 = vpop.permute.xlu2 %1807  ;;  %v1629_v61 = vor.u32 %v1628_v49, %v1624_v14 }
 0x25f   : > { %v1643_v47 = vor.u32 %v1642_v40, %v1638_v25 }
 0x260   : > { %2316 = vrot.lane.b32.xlu0 %v7104_v33, %s5755_s17  ;;  %v1635_v33 = vrot.slane %v1633_v56, 1  ;;  %v2051_v56 = vsel %vm2019_vm8, %v2018_v46, %v7036_v29  ;;  %v7143_v14 = vsel %vm7011_vm3, %v1629_v61, 0 }
 0x262   : > { %2318 = vrot.lane.b32.xlu1 %v7112_v1, %s5755_s17  ;;  %v7117_v20 = vpop.permute.xlu0 %1900  ;;  %v7131_v1 = vsel %vm7011_vm3, %v1622_v51, 0  ;;  %v1636_v62 = vor.u32 %v1635_v33, %v1631_v8  ;;  %v2084_v51 = vsel %vm2052_vm9, %v2051_v56, %v1808_v36  ;;  %v8627_v8 = vld [vmem:[#allocation22_spill] sm:$0xff] }
 0x263   : > { %v1997_v36 = vsel %vm1970_vm7, %v8627_v8, %v6667_v21 }
 0x264   : > { %v7124_v58 = vpop.permute.xlu1 %1805  ;;  %2320 = vrot.lane.b32.xlu2 %v7122_v24, %s5755_s17  ;;  %v7151_v2 = vsel %vm7011_vm3, %v1636_v62, 0  ;;  %v2037_v46 = vsel %vm2019_vm8, %v1997_v36, %v6759_v16  ;;  %v7166_v62 = vsel %vm7011_vm3, %v1643_v47, 0 }
 0x265   : > { %v2070_v40 = vsel %vm2052_vm9, %v2037_v46, %v6860_v42  ;;  %v2006_v42 = vsel %vm1970_vm7, %v6560_v57, %v6794_v0 }
 0x266   : > { %v1905_v60 = vpop.permute.xlu2 %1904 }
 0x268   : > { %2322 = vrot.lane.b32.xlu0 %v7131_v1, %s5755_s17 }
 0x26a   : > { %2324 = vrot.lane.b32.xlu1 %v7143_v14, %s5755_s17  ;;  %v1840_v49 = vpop.permute.xlu0 %1839 }
 0x26b   : > { %v2117_v26 = vsel %vm2085_vm10, %v2084_v51, %v1840_v49  ;;  %v2043_v49 = vsel %vm2019_vm8, %v2006_v42, %v6876_v18  ;;  %v8630_v42 = vld [vmem:[#allocation4_spill] sm:$0xff] }
 0x26c   : > { %v1872_v33 = vpop.permute.xlu1 %1871  ;;  %2326 = vrot.lane.b32.xlu2 %v7151_v2, %s5755_s17  ;;  %v2076_v47 = vsel %vm2052_vm9, %v2043_v49, %v6988_v50  ;;  %v8631_v49 = vld [vmem:[#allocation43_spill] sm:$0xff] }
 0x26d   : > { %v2150_v29 = vsel %vm2118_vm11, %v2117_v26, %v1872_v33  ;;  %v2109_v0 = vsel %vm2085_vm10, %v2076_v47, %v6931_v39  ;;  %v8634_v47 = vld [vmem:[#allocation7_spill] sm:$0xff] }
 0x26e   : > { %v2183_v61 = vsel %vm2151_vm12, %v2150_v29, %v1905_v60  ;;  %v7162_v25 = vpop.permute.xlu2 %1964  ;;  %v2103_v60 = vsel %vm2085_vm10, %v2070_v40, %v6693_v13  ;;  %v2142_v50 = vsel %vm2118_vm11, %v2109_v0, %v6961_v35 }
 0x26f   : > { %v2136_v51 = vsel %vm2118_vm11, %v2103_v60, %v6783_v5  ;;  %v2175_v33 = vsel %vm2151_vm12, %v2142_v50, %v7005_v9 }
 0x270   : > { %2328 = vrot.lane.b32.xlu0 %v7166_v62, %s5755_s17  ;;  %v2169_v13 = vsel %vm2151_vm12, %v2136_v51, %v6927_v17  ;;  %v2208_v9 = vsel %vm2184_vm13, %v2175_v33, %v6943_v7 }
 0x271   : > { %v2202_v5 = vsel %vm2184_vm13, %v2169_v13, %v6868_v11  ;;  %v8628_v11 = vld [vmem:[#allocation23_spill] sm:$0xff]  ;;  %v8633_v13 = vld [vmem:[#allocation10_spill] sm:$0xff] }
 0x272   : > { %2330 = vrot.lane.b32.xlu1 %v8596_v27, %s5757_s19  ;;  %v1937_v21 = vpop.permute.xlu0 %1936  ;;  %v2000_v39 = vsel %vm1970_vm7, %v8628_v11, %v6737_v38  ;;  %v8637_v11 = vld [vmem:[#allocation44_spill] sm:$0xff] }
 0x273   : > { %v7177_v16 = vsel %vm2184_vm13, %v2183_v61, %v1937_v21  ;;  %v2039_v8 = vsel %vm2019_vm8, %v2000_v39, %v6765_v34  ;;  %v8638_v39 = vld [vmem:[#allocation32_spill] sm:$0xff] }
 0x274   : > { %v1957_v56 = vpop.permute.xlu1 %1956  ;;  %2332 = vrot.lane.b32.xlu2 %v8598_v48, %s5757_s19  ;;  %v2072_v36 = vsel %vm2052_vm9, %v2039_v8, %v6892_v22  ;;  %v2012_v8 = vsel %vm1970_vm7, %v8638_v39, %v8637_v11  ;;  %v8652_v11 = vld [vmem:[#allocation36_spill] sm:$0xff] }
 0x275   : > { %v2105_v61 = vsel %vm2085_vm10, %v2072_v36, %v6899_v41  ;;  %v2009_v41 = vsel %vm1970_vm7, %v6697_v44, %v6937_v53  ;;  %v2003_v44 = vsel %vm1970_vm7, %v6575_v30, %v6880_v15  ;;  %v8632_v15 = vld [vmem:[#allocation3_spill] sm:$0xff] }
 0x276   : > { %v7190_v26 = vpop.permute.xlu2 %2250  ;;  %v2138_v46 = vsel %vm2118_vm11, %v2105_v61, %v6916_v54  ;;  %v2045_v54 = vsel %vm2019_vm8, %v2009_v41, %v6951_v43 }
 0x277   : > { %v2171_v34 = vsel %vm2151_vm12, %v2138_v46, %v6907_v59  ;;  %v2078_v53 = vsel %vm2052_vm9, %v2045_v54, %v6955_v63  ;;  %v8643_v54 = vld [vmem:[#allocation55_spill] sm:$0xff] }
 0x278   : > { %2334 = vrot.lane.b32.xlu0 %v8600_v28, %s5757_s19  ;;  %v2204_v7 = vsel %vm2184_vm13, %v2171_v34, %v6912_v10  ;;  %v8629_v10 = vld [vmem:[#allocation35_spill] sm:$0xff]  ;;  %v8642_v34 = vld [vmem:[#allocation42_spill] sm:$0xff] }
 0x279   : > { %v2237_v59 = vsel %vm2217_vm14, %v2204_v7, %v1957_v56  ;;  %v2041_v43 = vsel %vm2019_vm8, %v2003_v44, %v8629_v10  ;;  %v2111_v56 = vsel %vm2085_vm10, %v2078_v53, %v8630_v42  ;;  %v2047_v41 = vsel %vm2019_vm8, %v2012_v8, %v8642_v34  ;;  %v8645_v53 = vld [vmem:[#allocation47_spill] sm:$0xff]  ;;  %v8653_v8 = vld [vmem:[#allocation5_spill] sm:$0xff]  ;;  %v8655_v34 = vld [vmem:[#allocation48_spill] sm:$0xff] }
 0x27a   : > { %2336 = vrot.lane.b32.xlu1 %v8601_v31, %s5757_s19  ;;  %v1955_v57 = vpop.permute.xlu0 %1954  ;;  %v2074_v30 = vsel %vm2052_vm9, %v2041_v43, %v8631_v49  ;;  %v2144_v63 = vsel %vm2118_vm11, %v2111_v56, %v8632_v15  ;;  %v2080_v7 = vsel %vm2052_vm9, %v2047_v41, %v8643_v54  ;;  %v8646_v43 = vld [vmem:[#allocation51_spill] sm:$0xff]  ;;  %v8647_v56 = vld [vmem:[#allocation52_spill] sm:$0xff]  ;;  %v8648_v15 = vld [vmem:[#allocation2_spill] sm:$0xff] }
 0x27b   : > { %v2235_v18 = vsel %vm2217_vm14, %v2202_v5, %v1955_v57  ;;  %v8635_v57 = vld [vmem:[#allocation50_spill] sm:$0xff]  ;;  %v2113_v42 = vsel %vm2085_vm10, %v2080_v7, %v8646_v43 }
 0x27c   : > { %v7203_v17 = vpop.permute.xlu1 %1902  ;;  %5618 = vmatmul.msk.bf16.gmra.mxu1 %vm2820_vm15, %v2235_v18  ;;  %2338 = vrot.lane.b32.xlu2 %v8605_v4, %s5757_s19  ;;  %v8636_v18 = vld [vmem:[#allocation41_spill] sm:$0xff] }
 0x27d   : > { %v2107_v50 = vsel %vm2085_vm10, %v2074_v30, %v8636_v18 }
 0x27e   : > { %v7212_v29 = vpop.permute.xlu2 %2256 }
 0x280   : > { %2340 = vrot.lane.b32.xlu0 %v8608_v52, %s5757_s19 }
 0x282   : > { %2342 = vrot.lane.b32.xlu1 %v8610_v19, %s5757_s19  ;;  %v1961_v35 = vpop.permute.xlu0 %1960 }
 0x283   : > { %v2241_v38 = vsel %vm2217_vm14, %v2208_v9, %v1961_v35  ;;  %v8639_v35 = vld [vmem:[#allocation8_spill] sm:$0xff]  ;;  %v8640_v9 = vld [vmem:[#allocation37_spill] sm:$0xff] }
 0x284   : > { %v1963_v40 = vpop.permute.xlu1 %1962  ;;  %5621 = vmatmul.msk.bf16.vlgmr.msra.gmra.mxu3 %vm2820_vm15, %v2241_v38  ;;  %2344 = vrot.lane.b32.xlu2 %v8613_v3, %s5757_s19  ;;  %v2140_v61 = vsel %vm2118_vm11, %v2107_v50, %v8640_v9  ;;  %v8641_v38 = vld [vmem:[#allocation46_spill] sm:$0xff] }
 0x285   : > { %v2173_v46 = vsel %vm2151_vm12, %v2140_v61, %v8641_v38  ;;  %v8654_v38 = vld [vmem:[#allocation24_spill] sm:$0xff] }
 0x286   : > { %v7237_v22 = vpop.permute.xlu2 %2262  ;;  %v2206_v10 = vsel %vm2184_vm13, %v2173_v46, %v8645_v53 }
 0x287   : > { %v2239_v49 = vsel %vm2217_vm14, %v2206_v10, %v8647_v56  ;;  %v8657_v10 = vld [vmem:[#allocation13_spill] sm:$0xff] }
 0x288   : > { %2346 = vrot.lane.b32.xlu0 %v8616_v32, %s5757_s19 }
 0x28a   : > { %2348 = vrot.lane.b32.xlu1 %v6483_v55, %s5757_s19  ;;  %v7250_v21 = vpop.permute.xlu0 %1966 }
 0x28c   : > { %v7258_v60 = vpop.permute.xlu1 %1968  ;;  %5619 = vmatmul.msk.bf16.gmra.mxu1 %vm2820_vm15, %v2237_v59  ;;  %2362 = vrot.lane.b32.xlu2 %v8580_v45, %s5756_s18  ;;  %v2177_v45 = vsel %vm2151_vm12, %v2144_v63, %v8634_v47  ;;  %v8644_v59 = vld [vmem:[#allocation14_spill] sm:$0xff]  ;;  %v2146_v63 = vsel %vm2118_vm11, %v2113_v42, %v8648_v15  ;;  %v8658_v42 = vld [vmem:[#allocation15_spill] sm:$0xff] }
 0x28d   : > { %v2210_v5 = vsel %vm2184_vm13, %v2177_v45, %v8635_v57  ;;  %v8649_v45 = vld [vmem:[#allocation9_spill] sm:$0xff] }
 0x28e   : > { %v7267_v51 = vpop.permute.xlu2 %2268  ;;  %v2243_v33 = vsel %vm2217_vm14, %v2210_v5, %v1963_v40 }
 0x290   : > { %2395 = vrot.lane.b32.xlu0 %v8633_v13, %s5754_s16  ;;  %v2179_v13 = vsel %vm2151_vm12, %v2146_v63, %v7117_v20  ;;  %v8650_v20 = vld [vmem:[#allocation49_spill] sm:$0xff] }
 0x291   : > { %v2212_v5 = vsel %vm2184_vm13, %v2179_v13, %v7096_v37 }
 0x292   : > { %2427 = vrot.lane.b32.xlu1 %v8598_v48, %s5760_s9  ;;  %v7281_v0 = vpop.permute.xlu0 %2252  ;;  %v2245_v18 = vsel %vm2217_vm14, %v2212_v5, %v7162_v25 }
 0x294   : > { %v2255_v36 = vpop.permute.xlu1 %2254  ;;  %5622 = vmatmul.msk.bf16.gmra.mxu3 %vm2820_vm15, %v2243_v33  ;;  %2459 = vrot.lane.b32.xlu2 %v8639_v35, %s5759_s22  ;;  %v8651_v33 = vld [vmem:[#allocation45_spill] sm:$0xff] }
 0x295   : > { %v2015_v39 = vsel %vm1970_vm7, %v8652_v11, %v8651_v33  ;;  %v2529_v9 = vsel %vm1970_vm7, %v8598_v48, %v2255_v36  ;;  %v8656_v48 = vld [vmem:[#allocation11_spill] sm:$0xff] }
 0x296   : > { %v7298_v40 = vpop.permute.xlu2 %2274 }
 0x298   : > { %2492 = vrot.lane.b32.xlu0 %v8644_v59, %s5758_s10 }
 0x29a   : > { %2364 = vrot.lane.b32.xlu1 %v8639_v35, %s5756_s18  ;;  %v7306_v44 = vpop.permute.xlu0 %2258  ;;  %v2049_v35 = vsel %vm2019_vm8, %v2015_v39, %v8653_v8  ;;  %v8661_v8 = vld [vmem:[#allocation12_spill] sm:$0xff] }
 0x29b   : > { %v2082_v25 = vsel %vm2052_vm9, %v2049_v35, %v7124_v58 }
 0x29c   : > { %v2261_v30 = vpop.permute.xlu1 %2260  ;;  %5620 = vmatmul.msk.bf16.gmra.mxu1 %vm2820_vm15, %v2239_v49  ;;  %2397 = vrot.lane.b32.xlu2 %v8644_v59, %s5754_s16  ;;  %v2115_v41 = vsel %vm2085_vm10, %v2082_v25, %v8655_v34 }
 0x29d   : > { %v2148_v58 = vsel %vm2118_vm11, %v2115_v41, %v8656_v48  ;;  %v2535_v7 = vsel %vm1970_vm7, %v8605_v4, %v2261_v30  ;;  %v8659_v30 = vld [vmem:[#allocation19_spill] sm:$0xff]  ;;  %v8663_v48 = vld [vmem:[#allocation17_spill] sm:$0xff] }
 0x29e   : > { %v7321_v47 = vpop.permute.xlu2 %2280  ;;  %v2181_v36 = vsel %vm2151_vm12, %v2148_v58, %v7203_v17 }
 0x29f   : > { %v2214_v56 = vsel %vm2184_vm13, %v2181_v36, %v8658_v42 }
 0x2a0   : > { %2429 = vrot.lane.b32.xlu0 %v8600_v28, %s5760_s9  ;;  %v2247_v17 = vsel %vm2217_vm14, %v2214_v56, %v7250_v21 }
 0x2a2   : > { %2461 = vrot.lane.b32.xlu1 %v8649_v45, %s5759_s22  ;;  %v7327_v57 = vpop.permute.xlu0 %2264 }
 0x2a4   : > { %v2267_v50 = vpop.permute.xlu1 %2266  ;;  %5623 = vmatmul.msk.bf16.gmra.mxu3 %vm2820_vm15, %v2245_v18  ;;  %2494 = vrot.lane.b32.xlu2 %v8650_v20, %s5758_s10 }
 0x2a5   : > { %v2541_v15 = vsel %vm1970_vm7, %v8613_v3, %v2267_v50  ;;  %v2527_v50 = vsel %vm1970_vm7, %v8596_v27, %v7281_v0  ;;  %v2531_v27 = vsel %vm1970_vm7, %v8600_v28, %v7212_v29  ;;  %v8662_v0 = vld [vmem:[#allocation18_spill] sm:$0xff] }
 0x2a6   : > { %v2303_v37 = vpop.permute.xlu2 %2302 }
 0x2a7   : > { %v7346_v61 = vsel %vm2019_vm8, %v2529_v9, %v2303_v37  ;;  %v2249_v9 = vsel %vm2217_vm14, %v7177_v16, %v7258_v60  ;;  %v2533_v37 = vsel %vm1970_vm7, %v8601_v31, %v7306_v44  ;;  %v2539_v44 = vsel %vm1970_vm7, %v8610_v19, %v7327_v57 }
 0x2a8   : > { %2350 = vrot.lane.b32.xlu0 %v8654_v38, %s5757_s19 }
 0x2aa   : > { %2366 = vrot.lane.b32.xlu1 %v8649_v45, %s5756_s18  ;;  %v2271_v46 = vpop.permute.xlu0 %2270  ;;  %v8660_v45 = vld [vmem:[#allocation6_spill] sm:$0xff] }
 0x2ab   : > { %v2525_v21 = vsel %vm1970_vm7, %v8660_v45, %v7190_v26 }
 0x2ac   : > { %v2273_v54 = vpop.permute.xlu1 %2272  ;;  %2399 = vrot.lane.b32.xlu2 %v8650_v20, %s5754_s16 }
 0x2ad   : > { %v2547_v26 = vsel %vm1970_vm7, %v8654_v38, %v2273_v54 }
 0x2ae   : > { %v2309_v59 = vpop.permute.xlu2 %2308 }
 0x2af   : > { %v7363_v53 = vsel %vm2019_vm8, %v2535_v7, %v2309_v59  ;;  %v8665_v7 = vld [vmem:[#allocation28_spill] sm:$0xff] }
 0x2b0   : > { %2431 = vrot.lane.b32.xlu0 %v8601_v31, %s5760_s9  ;;  %v2537_v31 = vsel %vm1970_vm7, %v8608_v52, %v7237_v22  ;;  %v8664_v22 = vld [vmem:[#allocation53_spill] sm:$0xff] }
 0x2b2   : > { %2463 = vrot.lane.b32.xlu1 %v8657_v10, %s5759_s22  ;;  %v2277_v43 = vpop.permute.xlu0 %2276 }
 0x2b4   : > { %v2279_v49 = vpop.permute.xlu1 %2278  ;;  %5624 = vmatmul.msk.bf16.gmra.mxu3 %vm2820_vm15, %v2247_v17  ;;  %2496 = vrot.lane.b32.xlu2 %v8659_v30, %s5758_s10 }
 0x2b5   : > { %v2553_v29 = vsel %vm1970_vm7, %v6763_v6, %v2279_v49 }
 0x2b6   : > { %v2315_v63 = vpop.permute.xlu2 %2314 }
 0x2b7   : > { %v7379_v13 = vsel %vm2019_vm8, %v2541_v15, %v2315_v63  ;;  %v8666_v15 = vld [vmem:[#allocation29_spill] sm:$0xff] }
 0x2b8   : > { %2368 = vrot.lane.b32.xlu0 %v8657_v10, %s5756_s18  ;;  %v2545_v10 = vsel %vm1970_vm7, %v6483_v55, %v2271_v46  ;;  %v2551_v63 = vsel %vm1970_vm7, %v8666_v15, %v2277_v43 }
 0x2ba   : > { %2401 = vrot.lane.b32.xlu1 %v8659_v30, %s5754_s16  ;;  %v2299_v5 = vpop.permute.xlu0 %2298 }
 0x2bb   : > { %v7389_v18 = vsel %vm2019_vm8, %v2525_v21, %v2299_v5  ;;  %v8667_v21 = vld [vmem:[#allocation16_spill] sm:$0xff] }
 0x2bc   : > { %v2301_v20 = vpop.permute.xlu1 %2300  ;;  %2433 = vrot.lane.b32.xlu2 %v8605_v4, %s5760_s9 }
 0x2bd   : > { %v7397_v33 = vsel %vm2019_vm8, %v2527_v50, %v2301_v20  ;;  %v2555_v20 = vsel %vm1970_vm7, %v6721_v12, %v7321_v47 }
 0x2be   : > { %v2321_v11 = vpop.permute.xlu2 %2320 }
 0x2bf   : > { %v7402_v39 = vsel %vm2019_vm8, %v2547_v26, %v2321_v11 }
 0x2c0   : > { %2465 = vrot.lane.b32.xlu0 %v8661_v8, %s5759_s22 }
 0x2c2   : > { %2498 = vrot.lane.b32.xlu1 %v8662_v0, %s5758_s10  ;;  %v2305_v4 = vpop.permute.xlu0 %2304 }
 0x2c3   : > { %v2563_v35 = vsel %vm2019_vm8, %v2531_v27, %v2305_v4  ;;  %v8669_v27 = vld [vmem:[#allocation20_spill] sm:$0xff] }
 0x2c4   : > { %v2307_v25 = vpop.permute.xlu1 %2306  ;;  %5625 = vmatmul.msk.bf16.gmra.mxu3 %vm2820_vm15, %v2249_v9  ;;  %2370 = vrot.lane.b32.xlu2 %v8661_v8, %s5756_s18  ;;  %v8670_v4 = vld [vmem:[#allocation56_spill] sm:$0xff] }
 0x2c5   : > { %v2565_v28 = vsel %vm2019_vm8, %v2533_v37, %v2307_v25 }
 0x2c6   : > { %v2327_v34 = vpop.permute.xlu2 %2326 }
 0x2c7   : > { %v7425_v41 = vsel %vm2019_vm8, %v2553_v29, %v2327_v34  ;;  %v8671_v34 = vld [vmem:[#allocation21_spill] sm:$0xff] }
 0x2c8   : > { %2403 = vrot.lane.b32.xlu0 %v8662_v0, %s5754_s16 }
 0x2ca   : > { %2435 = vrot.lane.b32.xlu1 %v8608_v52, %s5760_s9  ;;  %v2311_v16 = vpop.permute.xlu0 %2310  ;;  %v2543_v52 = vsel %vm1970_vm7, %v8616_v32, %v7267_v51  ;;  %v2549_v51 = vsel %vm1970_vm7, %v8665_v7, %v7298_v40 }
 0x2cb   : > { %v2569_v60 = vsel %vm2019_vm8, %v2537_v31, %v2311_v16  ;;  %v8672_v31 = vld [vmem:[#allocation57_spill] sm:$0xff] }
 0x2cc   : > { %v2313_v54 = vpop.permute.xlu1 %2312  ;;  %2467 = vrot.lane.b32.xlu2 %v8663_v48, %s5759_s22 }
 0x2cd   : > { %v2571_v58 = vsel %vm2019_vm8, %v2539_v44, %v2313_v54 }
 0x2ce   : > { %v7441_v36 = vpop.permute.xlu2 %2332 }
 0x2d0   : > { %2500 = vrot.lane.b32.xlu0 %v8664_v22, %s5758_s10 }
 0x2d2   : > { %2352 = vrot.lane.b32.xlu1 %v8665_v7, %s5757_s19  ;;  %v2317_v59 = vpop.permute.xlu0 %2316 }
 0x2d3   : > { %v2575_v57 = vsel %vm2019_vm8, %v2543_v52, %v2317_v59 }
 0x2d4   : > { %v2319_v42 = vpop.permute.xlu1 %2318  ;;  %2372 = vrot.lane.b32.xlu2 %v8663_v48, %s5756_s18 }
 0x2d5   : > { %v7456_v56 = vsel %vm2019_vm8, %v2545_v10, %v2319_v42 }
 0x2d6   : > { %v2339_v17 = vpop.permute.xlu2 %2338 }
 0x2d7   : > { %v7459_v49 = vsel %vm2052_vm9, %v2565_v28, %v2339_v17 }
 0x2d8   : > { %2405 = vrot.lane.b32.xlu0 %v8664_v22, %s5754_s16 }
 0x2da   : > { %2437 = vrot.lane.b32.xlu1 %v8610_v19, %s5760_s9  ;;  %v2323_v46 = vpop.permute.xlu0 %2322  ;;  %v8668_v19 = vld [vmem:[#allocation54_spill] sm:$0xff] }
 0x2db   : > { %v7469_v30 = vsel %vm2019_vm8, %v2549_v51, %v2323_v46  ;;  %v2591_v46 = vsel %vm2052_vm9, %v7397_v33, %v7441_v36 }
 0x2dc   : > { %v2325_v45 = vpop.permute.xlu1 %2324  ;;  %2469 = vrot.lane.b32.xlu2 %v8667_v21, %s5759_s22 }
 0x2dd   : > { %v7476_v5 = vsel %vm2019_vm8, %v2551_v63, %v2325_v45 }
 0x2de   : > { %v2345_v50 = vpop.permute.xlu2 %2344 }
 0x2df   : > { %v7479_v40 = vsel %vm2052_vm9, %v2571_v58, %v2345_v50 }
 0x2e0   : > { %2502 = vrot.lane.b32.xlu0 %v8668_v19, %s5758_s10 }
 0x2e2   : > { %2374 = vrot.lane.b32.xlu1 %v8667_v21, %s5756_s18  ;;  %v2329_v43 = vpop.permute.xlu0 %2328 }
 0x2e3   : > { %v7489_v26 = vsel %vm2019_vm8, %v2555_v20, %v2329_v43 }
 0x2e4   : > { %v2331_v11 = vpop.permute.xlu1 %2330  ;;  %2407 = vrot.lane.b32.xlu2 %v8668_v19, %s5754_s16  ;;  %v8675_v19 = vld [vmem:[#allocation25_spill] sm:$0xff] }
 0x2e5   : > { %v2589_v54 = vsel %vm2052_vm9, %v7389_v18, %v2331_v11  ;;  %v8673_v18 = vld [vmem:[#allocation26_spill] sm:$0xff] }
 0x2e6   : > { %v2363_v8 = vpop.permute.xlu2 %2362 }
 0x2e8   : > { %2439 = vrot.lane.b32.xlu0 %v8613_v3, %s5760_s9 }
 0x2ea   : > { %2471 = vrot.lane.b32.xlu1 %v8669_v27, %s5759_s22  ;;  %v2335_v0 = vpop.permute.xlu0 %2334 }
 0x2ec   : > { %v2337_v47 = vpop.permute.xlu1 %2336  ;;  %2504 = vrot.lane.b32.xlu2 %v8670_v4, %s5758_s10 }
 0x2ed   : > { %v7500_v9 = vsel %vm2052_vm9, %v2563_v35, %v2337_v47  ;;  %v2593_v47 = vsel %vm2052_vm9, %v7346_v61, %v2335_v0 }
 0x2ee   : > { %v2460_v37 = vpop.permute.xlu2 %2459 }
 0x2f0   : > { %2376 = vrot.lane.b32.xlu0 %v8669_v27, %s5756_s18 }
 0x2f2   : > { %2409 = vrot.lane.b32.xlu1 %v8670_v4, %s5754_s16  ;;  %v2341_v25 = vpop.permute.xlu0 %2340 }
 0x2f3   : > { %v7508_v3 = vsel %vm2052_vm9, %v7363_v53, %v2341_v25 }
 0x2f4   : > { %v2343_v28 = vpop.permute.xlu1 %2342  ;;  %2441 = vrot.lane.b32.xlu2 %v8616_v32, %s5760_s9 }
 0x2f5   : > { %v7513_v29 = vsel %vm2052_vm9, %v2569_v60, %v2343_v28 }
 0x2f6   : > { %v2398_v35 = vpop.permute.xlu2 %2397 }
 0x2f8   : > { %2473 = vrot.lane.b32.xlu0 %v8671_v34, %s5759_s22 }
 0x2fa   : > { %2506 = vrot.lane.b32.xlu1 %v8672_v31, %s5758_s10  ;;  %v2347_v16 = vpop.permute.xlu0 %2346 }
 0x2fb   : > { %v7521_v44 = vsel %vm2052_vm9, %v7379_v13, %v2347_v16  ;;  %v2621_v13 = vsel %vm2085_vm10, %v2589_v54, %v2363_v8 }
 0x2fc   : > { %v2349_v53 = vpop.permute.xlu1 %2348  ;;  %2354 = vrot.lane.b32.xlu2 %v8666_v15, %s5757_s19 }
 0x2fd   : > { %v7526_v32 = vsel %vm2052_vm9, %v2575_v57, %v2349_v53  ;;  %v8674_v57 = vld [vmem:[#allocation58_spill] sm:$0xff]  ;;  %v8677_v53 = vld [vmem:[#allocation31_spill] sm:$0xff] }
 0x2fe   : > { %v2495_v60 = vpop.permute.xlu2 %2494 }
 0x300   : > { %2378 = vrot.lane.b32.xlu0 %v8671_v34, %s5756_s18 }
 0x302   : > { %2411 = vrot.lane.b32.xlu1 %v8672_v31, %s5754_s16  ;;  %v2396_v48 = vpop.permute.xlu0 %2395 }
 0x303   : > { %v2653_v22 = vsel %vm2118_vm11, %v2621_v13, %v2396_v48 }
 0x304   : > { %v2428_v58 = vpop.permute.xlu1 %2427  ;;  %2443 = vrot.lane.b32.xlu2 %v6483_v55, %s5760_s9 }
 0x305   : > { %v2685_v59 = vsel %vm2151_vm12, %v2653_v22, %v2428_v58 }
 0x306   : > { %v2400_v52 = vpop.permute.xlu2 %2399  ;;  %v2717_v42 = vsel %vm2184_vm13, %v2685_v59, %v2460_v37  ;;  %v8678_v59 = vld [vmem:[#allocation33_spill] sm:$0xff] }
 0x308   : > { %2475 = vrot.lane.b32.xlu0 %v8673_v18, %s5759_s22 }
 0x30a   : > { %2508 = vrot.lane.b32.xlu1 %v8674_v57, %s5758_s10  ;;  %v2493_v10 = vpop.permute.xlu0 %2492 }
 0x30b   : > { %v2749_v17 = vsel %vm2217_vm14, %v2717_v42, %v2493_v10 }
 0x30c   : > { %v2365_v51 = vpop.permute.xlu1 %2364  ;;  %5626 = vmatmul.msk.bf16.vlgmr.msra.gmra.mxu2 %vm2820_vm15, %v2749_v17  ;;  %2380 = vrot.lane.b32.xlu2 %v8673_v18, %s5756_s18 }
 0x30d   : > { %v2623_v63 = vsel %vm2085_vm10, %v2591_v46, %v2365_v51 }
 0x30e   : > { %v2497_v55 = vpop.permute.xlu2 %2496  ;;  %v2655_v50 = vsel %vm2118_vm11, %v2623_v63, %v2398_v35 }
 0x310   : > { %2413 = vrot.lane.b32.xlu0 %v8674_v57, %s5754_s16 }
 0x312   : > { %2445 = vrot.lane.b32.xlu1 %v8654_v38, %s5760_s9  ;;  %v2430_v45 = vpop.permute.xlu0 %2429 }
 0x313   : > { %v2687_v20 = vsel %vm2151_vm12, %v2655_v50, %v2430_v45 }
 0x314   : > { %v2462_v21 = vpop.permute.xlu1 %2461  ;;  %2477 = vrot.lane.b32.xlu2 %v8675_v19, %s5759_s22 }
 0x315   : > { %v2719_v33 = vsel %vm2184_vm13, %v2687_v20, %v2462_v21  ;;  %v8680_v21 = vld [vmem:[#allocation27_spill] sm:$0xff] }
 0x316   : > { %v2434_v43 = vpop.permute.xlu2 %2433  ;;  %v2751_v11 = vsel %vm2217_vm14, %v2719_v33, %v2495_v60  ;;  %v1647_v50 = vshll.u32 %v8680_v21, 16 }
 0x318   : > { %2510 = vrot.lane.b32.xlu0 %v7122_v24, %s5758_s10 }
 0x31a   : > { %2382 = vrot.lane.b32.xlu1 %v8675_v19, %s5756_s18  ;;  %v2351_v36 = vpop.permute.xlu0 %2350 }
 0x31b   : > { %v7567_v38 = vsel %vm2052_vm9, %v7456_v56, %v2351_v36  ;;  %v8676_v56 = vld [vmem:[#allocation30_spill] sm:$0xff]  ;;  %v1645_v36 = vshrl.u32 %v8680_v21, 16 }
 0x31c   : > { %v2367_v8 = vpop.permute.xlu1 %2366  ;;  %5627 = vmatmul.msk.bf16.gmra.mxu2 %vm2820_vm15, %v2751_v11  ;;  %2415 = vrot.lane.b32.xlu2 %v7122_v24, %s5754_s16  ;;  %v1649_v11 = vrot.slane %v1647_v50, 1 }
 0x31d   : > { %v2625_v4 = vsel %vm2085_vm10, %v2593_v47, %v2367_v8 }
 0x31e   : > { %v2371_v27 = vpop.permute.xlu2 %2370  ;;  %v2657_v28 = vsel %vm2118_vm11, %v2625_v4, %v2400_v52  ;;  %v1650_v47 = vor.u32 %v1649_v11, %v1645_v36 }
 0x320   : > { %2447 = vrot.lane.b32.xlu0 %v8665_v7, %s5760_s9 }
 0x322   : > { %2479 = vrot.lane.b32.xlu1 %v8676_v56, %s5759_s22  ;;  %v2432_v37 = vpop.permute.xlu0 %2431 }
 0x323   : > { %v2689_v24 = vsel %vm2151_vm12, %v2657_v28, %v2432_v37 }
 0x324   : > { %v2464_v25 = vpop.permute.xlu1 %2463  ;;  %2512 = vrot.lane.b32.xlu2 %v7131_v1, %s5758_s10 }
 0x325   : > { %v2721_v61 = vsel %vm2184_vm13, %v2689_v24, %v2464_v25  ;;  %v8682_v25 = vld [vmem:[#allocation40_spill] sm:$0xff] }
 0x326   : > { %v2468_v35 = vpop.permute.xlu2 %2467  ;;  %v2753_v0 = vsel %vm2217_vm14, %v2721_v61, %v2497_v55  ;;  %v1654_v28 = vshll.u32 %v8682_v25, 16 }
 0x328   : > { %2356 = vrot.lane.b32.xlu0 %v6763_v6, %s5757_s19 }
 0x32a   : > { %2384 = vrot.lane.b32.xlu1 %v8676_v56, %s5756_s18  ;;  %v2369_v7 = vpop.permute.xlu0 %2368  ;;  %v8681_v56 = vld [vmem:[#allocation38_spill] sm:$0xff] }
 0x32b   : > { %v2627_v16 = vsel %vm2085_vm10, %v7500_v9, %v2369_v7  ;;  %v1652_v7 = vshrl.u32 %v8682_v25, 16 }
 0x32c   : > { %v2402_v34 = vpop.permute.xlu1 %2401  ;;  %5628 = vmatmul.msk.bf16.gmra.mxu2 %vm2820_vm15, %v2753_v0  ;;  %2417 = vrot.lane.b32.xlu2 %v7131_v1, %s5754_s16  ;;  %v1656_v0 = vrot.slane %v1654_v28, 1 }
 0x32d   : > { %v2659_v54 = vsel %vm2118_vm11, %v2627_v16, %v2402_v34 }
 0x32e   : > { %v2373_v31 = vpop.permute.xlu2 %2372  ;;  %v2691_v1 = vsel %vm2151_vm12, %v2659_v54, %v2434_v43  ;;  %v8683_v54 = vld [vmem:[#allocation39_spill] sm:$0xff] }
 0x32f   : > { %v2631_v45 = vsel %vm2085_vm10, %v7508_v3, %v2373_v31 }
 0x330   : > { %2449 = vrot.lane.b32.xlu0 %v8666_v15, %s5760_s9 }
 0x332   : > { %2481 = vrot.lane.b32.xlu1 %v8677_v53, %s5759_s22  ;;  %v2466_v60 = vpop.permute.xlu0 %2465 }
 0x333   : > { %v2723_v58 = vsel %vm2184_vm13, %v2691_v1, %v2466_v60 }
 0x334   : > { %v2499_v48 = vpop.permute.xlu1 %2498  ;;  %2514 = vrot.lane.b32.xlu2 %v7143_v14, %s5758_s10 }
 0x335   : > { %v2755_v9 = vsel %vm2217_vm14, %v2723_v58, %v2499_v48 }
 0x336   : > { %v2470_v13 = vpop.permute.xlu2 %2469 }
 0x338   : > { %2386 = vrot.lane.b32.xlu0 %v8677_v53, %s5756_s18  ;;  %v1657_v53 = vor.u32 %v1656_v0, %v1652_v7 }
 0x33a   : > { %2419 = vrot.lane.b32.xlu1 %v7143_v14, %s5754_s16  ;;  %v2404_v15 = vpop.permute.xlu0 %2403  ;;  %v2629_v14 = vsel %vm2085_vm10, %v7459_v49, %v2371_v27  ;;  %v1696_v48 = vsel %vm7011_vm3, %v1657_v53, 0 }
 0x33b   : > { %v2661_v57 = vsel %vm2118_vm11, %v2629_v14, %v2404_v15 }
 0x33c   : > { %v2436_v22 = vpop.permute.xlu1 %2435  ;;  %5629 = vmatmul.msk.bf16.gmra.mxu2 %vm2820_vm15, %v2755_v9  ;;  %2451 = vrot.lane.b32.xlu2 %v6763_v6, %s5760_s9 }
 0x33d   : > { %v2693_v42 = vsel %vm2151_vm12, %v2661_v57, %v2436_v22  ;;  %v2866_v57 = vpop.f32.mrf.mxu1 }
 0x33e   : > { %v2408_v52 = vpop.permute.xlu2 %2407  ;;  %v2725_v51 = vsel %vm2184_vm13, %v2693_v42, %v2468_v35 }
 0x340   : > { %2483 = vrot.lane.b32.xlu0 %v8678_v59, %s5759_s22 }
 0x342   : > { %2516 = vrot.lane.b32.xlu1 %v7151_v2, %s5758_s10  ;;  %v2501_v18 = vpop.permute.xlu0 %2500 }
 0x343   : > { %v2757_v55 = vsel %vm2217_vm14, %v2725_v51, %v2501_v18 }
 0x344   : > { %v2353_v10 = vpop.permute.xlu1 %2352  ;;  %2388 = vrot.lane.b32.xlu2 %v8678_v59, %s5756_s18 }
 0x345   : > { %v7623_v6 = vsel %vm2052_vm9, %v7402_v39, %v2353_v10  ;;  %v8679_v39 = vld [vmem:[#allocation34_spill] sm:$0xff] }
 0x346   : > { %v2505_v17 = vpop.permute.xlu2 %2504 }
 0x348   : > { %2421 = vrot.lane.b32.xlu0 %v7151_v2, %s5754_s16 }
 0x34a   : > { %2453 = vrot.lane.b32.xlu1 %v6721_v12, %s5760_s9  ;;  %v2406_v49 = vpop.permute.xlu0 %2405 }
 0x34b   : > { %v2663_v19 = vsel %vm2118_vm11, %v2631_v45, %v2406_v49  ;;  %v7699_v49 = vld [vmem:[%s8438_s6] ss:$0 sm:$0xff] }
 0x34c   : > { %v2438_v46 = vpop.permute.xlu1 %2437  ;;  %5630 = vmatmul.msk.bf16.gmra.mxu2 %vm2820_vm15, %v2757_v55  ;;  %2485 = vrot.lane.b32.xlu2 %v8679_v39, %s5759_s22 }
 0x34d   : > { %v2695_v43 = vsel %vm2151_vm12, %v2663_v19, %v2438_v46 }
 0x34e   : > { %v2442_v63 = vpop.permute.xlu2 %2441  ;;  %v2727_v8 = vsel %vm2184_vm13, %v2695_v43, %v2470_v13 }
 0x350   : > { %2518 = vrot.lane.b32.xlu0 %v7166_v62, %s5758_s10 }
 0x352   : > { %2358 = vrot.lane.b32.xlu1 %v6721_v12, %s5757_s19  ;;  %v2503_v2 = vpop.permute.xlu0 %2502 }
 0x353   : > { %v2759_v27 = vsel %vm2217_vm14, %v2727_v8, %v2503_v2  ;;  %v2868_v2 = vpop.f32.mrf.mxu1 }
 0x354   : > { %v2375_v20 = vpop.permute.xlu1 %2374  ;;  %2390 = vrot.lane.b32.xlu2 %v8679_v39, %s5756_s18  ;;  %v2867_v39 = vadd.f32 %v7699_v49, %v2866_v57  ;;  %v2869_v50 = vadd.f32 %v7699_v49, %v2868_v2 }
 0x356   : > { %v2355_v33 = vpop.permute.xlu2 %2354 }
 0x357   : > { %v7649_v12 = vsel %vm2052_vm9, %v7469_v30, %v2355_v33  ;;  %v1695_v30 = vsel %vm7011_vm3, %v1650_v47, 0 }
 0x358   : > { %2423 = vrot.lane.b32.xlu0 %v7166_v62, %s5754_s16  ;;  %v2633_v62 = vsel %vm2085_vm10, %v7513_v29, %v2375_v20 }
 0x359   : > { %v2665_v24 = vsel %vm2118_vm11, %v2633_v62, %v2408_v52 }
 0x35a   : > { %2455 = vrot.lane.b32.xlu1 %v8680_v21, %s5760_s9  ;;  %v2440_v3 = vpop.permute.xlu0 %2439 }
 0x35b   : > { %v2697_v61 = vsel %vm2151_vm12, %v2665_v24, %v2440_v3 }
 0x35c   : > { %v2472_v4 = vpop.permute.xlu1 %2471  ;;  %5631 = vmatmul.msk.bf16.gmra.mxu2 %vm2820_vm15, %v2759_v27  ;;  %2487 = vrot.lane.b32.xlu2 %v8681_v56, %s5759_s22 }
 0x35d   : > { %v2729_v29 = vsel %vm2184_vm13, %v2697_v61, %v2472_v4 }
 0x35e   : > { %v2444_v34 = vpop.permute.xlu2 %2443  ;;  %v2761_v16 = vsel %vm2217_vm14, %v2729_v29, %v2505_v17 }
 0x360   : > { %2520 = vrot.lane.b32.xlu0 %v1695_v30, %s5758_s10 }
 0x362   : > { %2360 = vrot.lane.b32.xlu1 %v8680_v21, %s5757_s19  ;;  %v2377_v37 = vpop.permute.xlu0 %2376  ;;  %v2946_v21 = vmax.f32 %v2867_v39, 0.0 }
 0x363   : > { %v2635_v13 = vsel %vm2085_vm10, %v7479_v40, %v2377_v37 }
 0x364   : > { %v2410_v35 = vpop.permute.xlu1 %2409  ;;  %2392 = vrot.lane.b32.xlu2 %v8681_v56, %s5756_s18  ;;  %v3163_v43 = vrot.slane %v2946_v21, 1  ;;  %v3164_v36 = vrot.slane %v2946_v21, 2  ;;  %v3165_v11 = vrot.slane %v2946_v21, 3  ;;  %v3166_v47 = vrot.slane %v2946_v21, 4 }
 0x365   : > { %v2667_v15 = vsel %vm2118_vm11, %v2635_v13, %v2410_v35  ;;  %v3167_v4 = vrot.slane %v2946_v21, 5  ;;  %v7718_v56 = vmax.f32 %v2869_v50, 0.0 }
 0x366   : > { %v2381_v58 = vpop.permute.xlu2 %2380  ;;  %v2699_v22 = vsel %vm2151_vm12, %v2667_v15, %v2442_v63 }
 0x367   : > { %v2639_v3 = vsel %vm2085_vm10, %v7526_v32, %v2381_v58 }
 0x368   : > { %2425 = vrot.lane.b32.xlu0 %v1695_v30, %s5754_s16 }
 0x36a   : > { %2457 = vrot.lane.b32.xlu1 %v8682_v25, %s5760_s9  ;;  %v2474_v31 = vpop.permute.xlu0 %2473  ;;  %s5582_s9 = sshll.u32 %s8695_s25, 3 }
 0x36b   : > { %v2731_v52 = vsel %vm2184_vm13, %v2699_v22, %v2474_v31 }
 0x36c   : > { %v2507_v60 = vpop.permute.xlu1 %2506  ;;  %5632 = vmatmul.msk.bf16.gmra.mxu2 %vm2820_vm15, %v2761_v16  ;;  %2489 = vrot.lane.b32.xlu2 %v8683_v54, %s5759_s22  ;;  %s5581_s22 = sshll.u32 %s5735_s24, 2 }
 0x36d   : > { %v2763_v18 = vsel %vm2217_vm14, %v2731_v52, %v2507_v60  ;;  %p438_p12 = scmp.lt.s32.totalorder %s5581_s22, 7 }
 0x36e   : > { %v7691_v23 = vpop.permute.xlu2 %2477 }
 0x36f   : > { %s8705_s22 = smov (!%p438_p12, %s5581_s22), 7 }
 0x370   : > { %2522 = vrot.lane.b32.xlu0 %v1696_v48, %s5758_s10  ;;  %s441_s12 = sadd.s32 %s5582_s9, %s8705_s22 }
 0x371   : > { %s5583_s24 = sshll.u32 %s441_s12, 3 }
 0x372   : > { %v2379_v1 = vpop.permute.xlu0 %2378  ;;  %s443_s20 = scalar_lea.vmem %s8439_s7, %s5583_s24 }
 0x373   : > { %v2637_v40 = vsel %vm2085_vm10, %v7521_v44, %v2379_v1 }
 0x374   : > { %v2412_v9 = vpop.permute.xlu1 %2411 }
 0x375   : > { %v2669_v42 = vsel %vm2118_vm11, %v2637_v40, %v2412_v9  ;;  %v3168_v9 = vrot.slane %v2946_v21, 6 }
 0x376   : > { %v7701_v51 = vpop.permute.xlu2 %2415  ;;  %v2701_v55 = vsel %vm2151_vm12, %v2669_v42, %v2444_v34 }
 0x37a   : > { %v2476_v59 = vpop.permute.xlu0 %2475 }
 0x37b   : > { %v2733_v46 = vsel %vm2184_vm13, %v2701_v55, %v2476_v59  ;;  %v3169_v59 = vrot.slane %v2946_v21, 7  ;;  %v3170_v55 = vrot.slane %v7718_v56, 1 }
 0x37c   : > { %v2509_v14 = vpop.permute.xlu1 %2508  ;;  %5633 = vmatmul.msk.bf16.gmra.mxu2 %vm2820_vm15, %v2763_v18 }
 0x37d   : > { %v2765_v44 = vsel %vm2217_vm14, %v2733_v46, %v2509_v14 }
 0x37e   : > { %v7712_v33 = vpop.permute.xlu2 %2512 }
 0x382   : > { %v2414_v10 = vpop.permute.xlu0 %2413 }
 0x383   : > { %v2671_v30 = vsel %vm2118_vm11, %v2639_v3, %v2414_v10 }
 0x384   : > { %v2446_v17 = vpop.permute.xlu1 %2445 }
 0x385   : > { %v2703_v16 = vsel %vm2151_vm12, %v2671_v30, %v2446_v17  ;;  %v3173_v30 = vrot.slane %v7718_v56, 4 }
 0x386   : > { %v2735_v40 = vsel %vm2184_vm13, %v2703_v16, %v7691_v23  ;;  %v2418_v57 = vpop.permute.xlu2 %2417  ;;  %v3175_v16 = vrot.slane %v7718_v56, 6 }
 0x38a   : > { %v2511_v63 = vpop.permute.xlu0 %2510 }
 0x38b   : > { %v2767_v17 = vsel %vm2217_vm14, %v2735_v40, %v2511_v63  ;;  %v3171_v63 = vrot.slane %v7718_v56, 2 }
 0x38c   : > { %v7707_v45 = vpop.permute.xlu1 %2382  ;;  %5634 = vmatmul.msk.bf16.gmra.mxu2 %vm2820_vm15, %v2765_v44  ;;  %v2871_v44 = vpop.f32.mrf.mxu1 }
 0x38f   : > { %v3019_v19 = vpop.f32.mrf.mxu2 }
 0x390   : > { %v3020_v20 = vadd.f32 %v7699_v49, %v3019_v19 }
 0x392   : > { %v3099_v8 = vmax.f32 %v3020_v20, 0.0  ;;  %v7716_v27 = vpop.permute.xlu0 %2447 }
 0x394   : > { %v3643_v62 = vrot.slane %v3099_v8, 1  ;;  %v3644_v37 = vrot.slane %v3099_v8, 2  ;;  %v3645_v25 = vrot.slane %v3099_v8, 3  ;;  %v3646_v28 = vrot.slane %v3099_v8, 4  ;;  %v7721_v24 = vpop.permute.xlu1 %2479 }
 0x395   : > { %v3647_v35 = vrot.slane %v3099_v8, 5  ;;  %v3648_v61 = vrot.slane %v3099_v8, 6  ;;  %v3649_v7 = vrot.slane %v3099_v8, 7  ;;  %v3867_v0 = vperm.slane %v3099_v8, 0 }
 0x396   : > { %v3868_v32 = vperm.slane %v3643_v62, 0  ;;  %v3869_v29 = vperm.slane %v3644_v37, 0  ;;  %v3870_v34 = vperm.slane %v3645_v25, 0  ;;  %v3871_v31 = vperm.slane %v3646_v28, 0 }
 0x397   : > { %v3872_v53 = vperm.slane %v3647_v35, 0  ;;  %v3873_v60 = vperm.slane %v3648_v61, 0  ;;  %v4379_v54 = vsel %vm717_vm2, %v2946_v21, %v3867_v0  ;;  %v3021_v48 = vpop.f32.mrf.mxu2  ;;  %v3874_v13 = vperm.slane %v3649_v7, 0 }
 0x398   : > { %v4380_v1 = vsel %vm717_vm2, %v3163_v43, %v3868_v32  ;;  %v4381_v58 = vsel %vm717_vm2, %v3164_v36, %v3869_v29  ;;  %v4382_v15 = vsel %vm717_vm2, %v3165_v11, %v3870_v34  ;;  %4891 = vst [vmem:[#allocation1] ss:$4 sm:$0xff] %v4379_v54  ;;  %v4383_v22 = vsel %vm717_vm2, %v3166_v47, %v3871_v31 }
 0x399   : > { %4893 = vst [vmem:[#allocation1 + $0x1] ss:$4 sm:$0xff] %v4380_v1  ;;  %v3022_v52 = vadd.f32 %v7699_v49, %v3021_v48  ;;  %v4384_v18 = vsel %vm717_vm2, %v3167_v4, %v3872_v53  ;;  %v4385_v10 = vsel %vm717_vm2, %v3168_v9, %v3873_v60  ;;  %v4386_v46 = vsel %vm717_vm2, %v3169_v59, %v3874_v13 }
 0x39a   : > { %4895 = vst [vmem:[#allocation1 + $0x2] ss:$4 sm:$0xff] %v4381_v58  ;;  %v7731_v14 = vpop.permute.xlu0 %2356  ;;  %v3172_v4 = vrot.slane %v7718_v56, 3  ;;  %v2872_v62 = vadd.f32 %v7699_v49, %v2871_v44  ;;  %v3174_v25 = vrot.slane %v7718_v56, 5  ;;  %v3176_v48 = vrot.slane %v7718_v56, 7 }
 0x39b   : > { %4897 = vst [vmem:[#allocation1 + $0x3] ss:$4 sm:$0xff] %v4382_v15  ;;  %v3100_v42 = vmax.f32 %v3022_v52, 0.0  ;;  %v2515_v15 = vpop.permute.xlu2 %2514  ;;  %v2641_v9 = vsel %vm2085_vm10, %v7567_v38, %v7707_v45 }
 0x39c   : > { %4899 = vst [vmem:[#allocation1 + $0x20] ss:$4 sm:$0xff] %v4383_v22  ;;  %v2385_v39 = vpop.permute.xlu1 %2384  ;;  %5635 = vmatmul.msk.bf16.gmra.mxu2 %vm2820_vm15, %v2767_v17  ;;  %v7756_v13 = vmax.f32 %v2872_v62, 0.0 }
 0x39d   : > { %4901 = vst [vmem:[#allocation1 + $0x21] ss:$4 sm:$0xff] %v4384_v18  ;;  %v3650_v2 = vrot.slane %v3100_v42, 1  ;;  %v3651_v21 = vrot.slane %v3100_v42, 2  ;;  %v3652_v23 = vrot.slane %v3100_v42, 3  ;;  %v3653_v50 = vrot.slane %v3100_v42, 4 }
 0x39e   : > { %4903 = vst [vmem:[#allocation1 + $0x22] ss:$4 sm:$0xff] %v4385_v10  ;;  %v3654_v19 = vrot.slane %v3100_v42, 5  ;;  %v3655_v20 = vrot.slane %v3100_v42, 6  ;;  %v3656_v43 = vrot.slane %v3100_v42, 7  ;;  %v3875_v36 = vperm.slane %v3100_v42, 0 }
 0x39f   : > { %4905 = vst [vmem:[#allocation1 + $0x23] ss:$4 sm:$0xff] %v4386_v46  ;;  %v3876_v11 = vperm.slane %v3650_v2, 0  ;;  %v3877_v3 = vperm.slane %v3651_v21, 0  ;;  %v3878_v8 = vperm.slane %v3652_v23, 0  ;;  %v3024_v47 = vpop.f32.mrf.mxu2  ;;  %v3879_v37 = vperm.slane %v3653_v50, 0  ;;  %v2873_v46 = vpop.f32.mrf.mxu1 }
 0x3a0   : > { %v3880_v28 = vperm.slane %v3654_v19, 0  ;;  %v3881_v35 = vperm.slane %v3655_v20, 0  ;;  %v3882_v0 = vperm.slane %v3656_v43, 0  ;;  %v4387_v32 = vsel %vm717_vm2, %v7718_v56, %v3875_v36 }
 0x3a1   : > { %v4388_v61 = vsel %vm717_vm2, %v3170_v55, %v3876_v11  ;;  %v4389_v29 = vsel %vm717_vm2, %v3171_v63, %v3877_v3  ;;  %v2643_v34 = vsel %vm2085_vm10, %v7623_v6, %v2385_v39  ;;  %v4390_v53 = vsel %vm717_vm2, %v3172_v4, %v3878_v8 }
 0x3a2   : > { %v4906_v7 = vld.sshfl [vmem:[#allocation1] sm:$0xff pattern:$0x73625140]  ;;  %v2450_v31 = vpop.permute.xlu0 %2449  ;;  %v3025_v60 = vadd.f32 %v7699_v49, %v3024_v47  ;;  %v2675_v54 = vsel %vm2118_vm11, %v2643_v34, %v2418_v57  ;;  %v4391_v1 = vsel %vm717_vm2, %v3173_v30, %v3879_v37  ;;  %v4392_v22 = vsel %vm717_vm2, %v3174_v25, %v3880_v28 }
 0x3a3   : > { %4908 = vst [vmem:[#allocation1] ss:$4 sm:$0xff] %v4387_v32  ;;  %5282 = vxpose.xlu1.b32.start [1/16] (narrow) %v4906_v7, 8  ;;  %v2707_v6 = vsel %vm2151_vm12, %v2675_v54, %v2450_v31  ;;  %v4393_v18 = vsel %vm717_vm2, %v3175_v16, %v3881_v35  ;;  %v4394_v40 = vsel %vm717_vm2, %v3176_v48, %v3882_v0  ;;  %v3177_v45 = vrot.slane %v7756_v13, 1 }
 0x3a4   : > { %4909 = vst [vmem:[#allocation1 + $0x1] ss:$4 sm:$0xff] %v4388_v61  ;;  %v2482_v58 = vpop.permute.xlu1 %2481  ;;  %v3101_v52 = vmax.f32 %v3025_v60, 0.0  ;;  %v2673_v39 = vsel %vm2118_vm11, %v2641_v9, %v7701_v51  ;;  %v3178_v19 = vrot.slane %v7756_v13, 2  ;;  %v3179_v11 = vrot.slane %v7756_v13, 3 }
 0x3a5   : > { %4910 = vst [vmem:[#allocation1 + $0x2] ss:$4 sm:$0xff] %v4389_v29  ;;  %v2739_v59 = vsel %vm2184_vm13, %v2707_v6, %v2482_v58  ;;  %v2705_v20 = vsel %vm2151_vm12, %v2673_v39, %v7716_v27  ;;  %v3180_v51 = vrot.slane %v7756_v13, 4  ;;  %v2874_v3 = vadd.f32 %v7699_v49, %v2873_v46 }
 0x3a6   : > { %v4907_v56 = vld.sshfl [vmem:[#allocation1 + $0x20] sm:$0xff pattern:$0x73625140]  ;;  %4911 = vst [vmem:[#allocation1 + $0x3] ss:$4 sm:$0xff] %v4390_v53  ;;  %v2771_v57 = vsel %vm2217_vm14, %v2739_v59, %v2515_v15  ;;  %v3657_v10 = vrot.slane %v3101_v52, 1  ;;  %v2737_v61 = vsel %vm2184_vm13, %v2705_v20, %v7721_v24 }
 0x3a7   : > { %4912 = vst [vmem:[#allocation1 + $0x20] ss:$4 sm:$0xff] %v4391_v1  ;;  %v3658_v42 = vrot.slane %v3101_v52, 2  ;;  %v3659_v17 = vrot.slane %v3101_v52, 3  ;;  %v3660_v55 = vrot.slane %v3101_v52, 4  ;;  %5637 = vmatmul.msk.bf16.vlgmr.msrb.gmra.mxu3 %vm2820_vm15, %v2771_v57  ;;  %v3026_v38 = vpop.f32.mrf.mxu2  ;;  %v3661_v44 = vrot.slane %v3101_v52, 5 }
 0x3a8   : > { %4913 = vst [vmem:[#allocation1 + $0x21] ss:$4 sm:$0xff] %v4392_v22  ;;  %v3662_v2 = vrot.slane %v3101_v52, 6  ;;  %v3883_v21 = vperm.slane %v3101_v52, 0  ;;  %v3884_v23 = vperm.slane %v3657_v10, 0  ;;  %v3663_v43 = vrot.slane %v3101_v52, 7 }
 0x3a9   : > { %4914 = vst [vmem:[#allocation1 + $0x22] ss:$4 sm:$0xff] %v4393_v18  ;;  %v3885_v50 = vperm.slane %v3658_v42, 0  ;;  %v3886_v36 = vperm.slane %v3659_v17, 0  ;;  %v3887_v8 = vperm.slane %v3660_v55, 0  ;;  %v3181_v47 = vrot.slane %v7756_v13, 5  ;;  %v2452_v55 = vpop.permute.xlu2 %2451 }
 0x3aa   : > { %4915 = vst [vmem:[#allocation1 + $0x23] ss:$4 sm:$0xff] %v4394_v40  ;;  %v2387_v63 = vpop.permute.xlu0 %2386  ;;  %v3888_v4 = vperm.slane %v3661_v44, 0  ;;  %v4396_v30 = vsel %vm717_vm2, %v3177_v45, %v3884_v23  ;;  %v3027_v62 = vadd.f32 %v7699_v49, %v3026_v38  ;;  %v3889_v25 = vperm.slane %v3662_v2, 0 }
 0x3ab   : > { %5283 = vxpose.xlu1.b32.cont [2/16] (narrow) %v4907_v56, 8  ;;  %v4395_v28 = vsel %vm717_vm2, %v7756_v13, %v3883_v21  ;;  %v4397_v35 = vsel %vm717_vm2, %v3178_v19, %v3885_v50  ;;  %v3890_v7 = vperm.slane %v3663_v43, 0  ;;  %v4398_v0 = vsel %vm717_vm2, %v3179_v11, %v3886_v36 }
 0x3ac   : > { %v2420_v27 = vpop.permute.xlu1 %2419  ;;  %v3102_v32 = vmax.f32 %v3027_v62, 0.0  ;;  %v2769_v29 = vsel %vm2217_vm14, %v2737_v61, %v7712_v33  ;;  %v3182_v34 = vrot.slane %v7756_v13, 6  ;;  %v3183_v31 = vrot.slane %v7756_v13, 7 }
 0x3ad   : > { %v4916_v37 = vld.sshfl [vmem:[#allocation1] sm:$0xff pattern:$0x73625140]  ;;  %v7791_v16 = vmax.f32 %v2874_v3, 0.0  ;;  %v4399_v53 = vsel %vm717_vm2, %v3180_v51, %v3887_v8  ;;  %5636 = vmatmul.msk.bf16.gmra.mxu2 %vm2820_vm15, %v2769_v29  ;;  %v4400_v60 = vsel %vm717_vm2, %v3181_v47, %v3888_v4  ;;  %v2645_v33 = vsel %vm2085_vm10, %v7649_v12, %v2387_v63  ;;  %v2876_v12 = vpop.f32.mrf.mxu1 }
 0x3ae   : > { %4918 = vst [vmem:[#allocation1] ss:$4 sm:$0xff] %v4395_v28  ;;  %v3664_v54 = vrot.slane %v3102_v32, 1  ;;  %v3665_v48 = vrot.slane %v3102_v32, 2  ;;  %v4401_v13 = vsel %vm717_vm2, %v3182_v34, %v3889_v25  ;;  %v3666_v58 = vrot.slane %v3102_v32, 3 }
 0x3af   : > { %4919 = vst [vmem:[#allocation1 + $0x1] ss:$4 sm:$0xff] %v4396_v30  ;;  %v3029_v24 = vpop.f32.mrf.mxu2  ;;  %v4402_v6 = vsel %vm717_vm2, %v3183_v31, %v3890_v7  ;;  %v3667_v15 = vrot.slane %v3102_v32, 4  ;;  %v3184_v22 = vrot.slane %v7791_v16, 1  ;;  %v3668_v52 = vrot.slane %v3102_v32, 5 }
 0x3b0   : > { %4920 = vst [vmem:[#allocation1 + $0x2] ss:$4 sm:$0xff] %v4397_v35  ;;  %v3030_v9 = vadd.f32 %v7699_v49, %v3029_v24  ;;  %v3892_v59 = vperm.slane %v3664_v54, 0  ;;  %v2677_v56 = vsel %vm2118_vm11, %v2645_v33, %v2420_v27  ;;  %v3669_v18 = vrot.slane %v3102_v32, 6 }
 0x3b1   : > { %v7798_v1 = vld.sshfl [vmem:[#allocation1 + $0x20] sm:$0xff pattern:$0x73625140]  ;;  %4921 = vst [vmem:[#allocation1 + $0x3] ss:$4 sm:$0xff] %v4398_v0  ;;  %v3891_v40 = vperm.slane %v3102_v32, 0  ;;  %v2709_v21 = vsel %vm2151_vm12, %v2677_v56, %v2452_v55  ;;  %v2877_v23 = vadd.f32 %v7699_v49, %v2876_v12  ;;  %v2389_v12 = vpop.permute.xlu2 %2388 }
 0x3b2   : > { %4922 = vst [vmem:[#allocation1 + $0x20] ss:$4 sm:$0xff] %v4399_v53  ;;  %v3893_v57 = vperm.slane %v3665_v48, 0  ;;  %v2484_v10 = vpop.permute.xlu0 %2483  ;;  %v3185_v42 = vrot.slane %v7791_v16, 2  ;;  %v3186_v17 = vrot.slane %v7791_v16, 3  ;;  %v3670_v38 = vrot.slane %v3102_v32, 7 }
 0x3b3   : > { %4923 = vst [vmem:[#allocation1 + $0x21] ss:$4 sm:$0xff] %v4400_v60  ;;  %5284 = vxpose.xlu1.b32.cont [3/16] (narrow) %v4916_v37, 8  ;;  %v3894_v45 = vperm.slane %v3666_v58, 0  ;;  %v3187_v39 = vrot.slane %v7791_v16, 4  ;;  %v3895_v44 = vperm.slane %v3667_v15, 0  ;;  %v4404_v19 = vsel %vm717_vm2, %v3184_v22, %v3892_v59 }
 0x3b4   : > { %4924 = vst [vmem:[#allocation1 + $0x22] ss:$4 sm:$0xff] %v4401_v13  ;;  %v2517_v46 = vpop.permute.xlu1 %2516  ;;  %v7808_v2 = vmax.f32 %v3030_v9, 0.0  ;;  %v3896_v50 = vperm.slane %v3668_v52, 0  ;;  %v2741_v20 = vsel %vm2184_vm13, %v2709_v21, %v2484_v10  ;;  %v3897_v36 = vperm.slane %v3669_v18, 0 }
 0x3b5   : > { %4925 = vst [vmem:[#allocation1 + $0x23] ss:$4 sm:$0xff] %v4402_v6  ;;  %v4403_v63 = vsel %vm717_vm2, %v7791_v16, %v3891_v40  ;;  %v4405_v11 = vsel %vm717_vm2, %v3185_v42, %v3893_v57  ;;  %v2773_v51 = vsel %vm2217_vm14, %v2741_v20, %v2517_v46  ;;  %v3188_v3 = vrot.slane %v7791_v16, 5  ;;  %v2878_v53 = vpop.f32.mrf.mxu1 }
 0x3b6   : > { %v3898_v8 = vperm.slane %v3670_v38, 0  ;;  %v4406_v47 = vsel %vm717_vm2, %v3186_v17, %v3894_v45  ;;  %v3189_v4 = vrot.slane %v7791_v16, 6  ;;  %v4407_v30 = vsel %vm717_vm2, %v3187_v39, %v3895_v44 }
 0x3b7   : > { %5638 = vmatmul.msk.bf16.gmra.mxu3 %vm2820_vm15, %v2773_v51  ;;  %v3671_v62 = vrot.slane %v7808_v2, 1  ;;  %v3190_v27 = vrot.slane %v7791_v16, 7  ;;  %v2950_v37 = vmax.f32 %v2877_v23, 0.0  ;;  %v4408_v25 = vsel %vm717_vm2, %v3188_v3, %v3896_v50  ;;  %v3031_v35 = vpop.f32.mrf.mxu2 }
 0x3b8   : > { %v7814_v43 = vld.sshfl [vmem:[#allocation1] sm:$0xff pattern:$0x73625140]  ;;  %v3672_v28 = vrot.slane %v7808_v2, 2  ;;  %v4409_v7 = vsel %vm717_vm2, %v3189_v4, %v3897_v36  ;;  %v3673_v0 = vrot.slane %v7808_v2, 3  ;;  %v3674_v29 = vrot.slane %v7808_v2, 4 }
 0x3b9   : > { %4928 = vst [vmem:[#allocation1] ss:$4 sm:$0xff] %v4403_v63  ;;  %v4410_v32 = vsel %vm717_vm2, %v3190_v27, %v3898_v8  ;;  %v3675_v34 = vrot.slane %v7808_v2, 5  ;;  %v3900_v31 = vperm.slane %v3671_v62, 0  ;;  %v3032_v16 = vadd.f32 %v7699_v49, %v3031_v35 }
 0x3ba   : > { %4929 = vst [vmem:[#allocation1 + $0x1] ss:$4 sm:$0xff] %v4404_v19  ;;  %v3676_v24 = vrot.slane %v7808_v2, 6  ;;  %v3899_v60 = vperm.slane %v7808_v2, 0  ;;  %v3901_v54 = vperm.slane %v3672_v28, 0  ;;  %v3191_v48 = vrot.slane %v2950_v37, 1  ;;  %v2422_v59 = vpop.permute.xlu0 %2421 }
 0x3bb   : > { %4930 = vst [vmem:[#allocation1 + $0x2] ss:$4 sm:$0xff] %v4405_v11  ;;  %5285 = vxpose.xlu1.b32.cont [4/16] (narrow) %v7798_v1, 8  ;;  %v3677_v33 = vrot.slane %v7808_v2, 7  ;;  %v3902_v13 = vperm.slane %v3673_v0, 0  ;;  %v3192_v58 = vrot.slane %v2950_v37, 2  ;;  %v2879_v22 = vadd.f32 %v7699_v49, %v2878_v53 }
 0x3bc   : > { %v7829_v61 = vld.sshfl [vmem:[#allocation1 + $0x20] sm:$0xff pattern:$0x73625140]  ;;  %4931 = vst [vmem:[#allocation1 + $0x3] ss:$4 sm:$0xff] %v4406_v47  ;;  %v3903_v6 = vperm.slane %v3674_v29, 0  ;;  %v4412_v52 = vsel %vm717_vm2, %v3191_v48, %v3900_v31  ;;  %v4411_v57 = vsel %vm717_vm2, %v2950_v37, %v3899_v60  ;;  %v2615_v17 = vsel %vm2052_vm9, %v7476_v5, %v7731_v14  ;;  %v2454_v11 = vpop.permute.xlu1 %2453 }
 0x3bd   : > { %4932 = vst [vmem:[#allocation1 + $0x20] ss:$4 sm:$0xff] %v4407_v30  ;;  %v7841_v15 = vmax.f32 %v3032_v16, 0.0  ;;  %v3193_v9 = vrot.slane %v2950_v37, 3  ;;  %v3904_v1 = vperm.slane %v3675_v34, 0  ;;  %v3194_v56 = vrot.slane %v2950_v37, 4  ;;  %v2881_v4 = vpop.f32.mrf.mxu1  ;;  %v2486_v16 = vpop.permute.xlu2 %2485 }
 0x3be   : > { %4933 = vst [vmem:[#allocation1 + $0x21] ss:$4 sm:$0xff] %v4408_v25  ;;  %v3905_v40 = vperm.slane %v3676_v24, 0  ;;  %v4413_v10 = vsel %vm717_vm2, %v3192_v58, %v3901_v54  ;;  %v3195_v42 = vrot.slane %v2950_v37, 5  ;;  %v3906_v55 = vperm.slane %v3677_v33, 0 }
 0x3bf   : > { %4934 = vst [vmem:[#allocation1 + $0x22] ss:$4 sm:$0xff] %v4409_v7  ;;  %v4414_v38 = vsel %vm717_vm2, %v3193_v9, %v3902_v13  ;;  %v3196_v45 = vrot.slane %v2950_v37, 6  ;;  %v4415_v46 = vsel %vm717_vm2, %v3194_v56, %v3903_v6  ;;  %v3678_v39 = vrot.slane %v7841_v15, 1  ;;  %v3034_v44 = vpop.f32.mrf.mxu2 }
 0x3c0   : > { %4935 = vst [vmem:[#allocation1 + $0x23] ss:$4 sm:$0xff] %v4410_v32  ;;  %v3197_v2 = vrot.slane %v2950_v37, 7  ;;  %v7855_v21 = vmax.f32 %v2879_v22, 0.0  ;;  %v4416_v23 = vsel %vm717_vm2, %v3195_v42, %v3904_v1  ;;  %v3679_v50 = vrot.slane %v7841_v15, 2 }
 0x3c1   : > { %v4417_v14 = vsel %vm717_vm2, %v3196_v45, %v3905_v40  ;;  %v3680_v19 = vrot.slane %v7841_v15, 3  ;;  %v2647_v20 = vsel %vm2085_vm10, %v2615_v17, %v2389_v12  ;;  %v3681_v63 = vrot.slane %v7841_v15, 4 }
 0x3c2   : > { %v4418_v36 = vsel %vm717_vm2, %v3197_v2, %v3906_v55  ;;  %v2679_v51 = vsel %vm2118_vm11, %v2647_v20, %v2422_v59  ;;  %v3035_v3 = vadd.f32 %v7699_v49, %v3034_v44  ;;  %v3682_v8 = vrot.slane %v7841_v15, 5  ;;  %v2519_v29 = vpop.permute.xlu0 %2518 }
 0x3c3   : > { %v7845_v18 = vld.sshfl [vmem:[#allocation1] sm:$0xff pattern:$0x73625140]  ;;  %5286 = vxpose.xlu1.b32.cont [5/16] (narrow) %v7814_v43, 8  ;;  %v3908_v47 = vperm.slane %v3678_v39, 0  ;;  %v3683_v30 = vrot.slane %v7841_v15, 6  ;;  %v2711_v35 = vsel %vm2151_vm12, %v2679_v51, %v2454_v11  ;;  %v2882_v31 = vadd.f32 %v7699_v49, %v2881_v4 }
 0x3c4   : > { %4938 = vst [vmem:[#allocation1] ss:$4 sm:$0xff] %v4411_v57  ;;  %v3907_v62 = vperm.slane %v7841_v15, 0  ;;  %v3909_v27 = vperm.slane %v3679_v50, 0  ;;  %v3198_v37 = vrot.slane %v7855_v21, 1  ;;  %v3684_v25 = vrot.slane %v7841_v15, 7  ;;  %v2359_v39 = vpop.permute.xlu1 %2358 }
 0x3c5   : > { %4939 = vst [vmem:[#allocation1 + $0x1] ss:$4 sm:$0xff] %v4412_v52  ;;  %v3910_v28 = vperm.slane %v3680_v19, 0  ;;  %v3199_v43 = vrot.slane %v7855_v21, 2  ;;  %v3200_v7 = vrot.slane %v7855_v21, 3  ;;  %v3911_v0 = vperm.slane %v3681_v63, 0  ;;  %v2883_v44 = vpop.f32.mrf.mxu1 }
 0x3c6   : > { %4940 = vst [vmem:[#allocation1 + $0x2] ss:$4 sm:$0xff] %v4413_v10  ;;  %v7877_v32 = vmax.f32 %v3035_v3, 0.0  ;;  %v3201_v34 = vrot.slane %v7855_v21, 4  ;;  %v3912_v53 = vperm.slane %v3682_v8, 0  ;;  %v4420_v24 = vsel %vm717_vm2, %v3198_v37, %v3908_v47 }
 0x3c7   : > { %v7859_v5 = vld.sshfl [vmem:[#allocation1 + $0x20] sm:$0xff pattern:$0x73625140]  ;;  %4941 = vst [vmem:[#allocation1 + $0x3] ss:$4 sm:$0xff] %v4414_v38  ;;  %v3913_v54 = vperm.slane %v3683_v30, 0  ;;  %v4419_v48 = vsel %vm717_vm2, %v7855_v21, %v3907_v62  ;;  %v4421_v33 = vsel %vm717_vm2, %v3199_v43, %v3909_v27  ;;  %v2743_v13 = vsel %vm2184_vm13, %v2711_v35, %v2486_v16  ;;  %v3036_v59 = vpop.f32.mrf.mxu2  ;;  %v2391_v30 = vpop.permute.xlu2 %2390 }
 0x3c8   : > { %4942 = vst [vmem:[#allocation1 + $0x20] ss:$4 sm:$0xff] %v4415_v46  ;;  %v3202_v58 = vrot.slane %v7855_v21, 5  ;;  %v3914_v6 = vperm.slane %v3684_v25, 0  ;;  %v4422_v15 = vsel %vm717_vm2, %v3200_v7, %v3910_v28  ;;  %v2775_v9 = vsel %vm2217_vm14, %v2743_v13, %v2519_v29 }
 0x3c9   : > { %4943 = vst [vmem:[#allocation1 + $0x21] ss:$4 sm:$0xff] %v4416_v23  ;;  %v3203_v22 = vrot.slane %v7855_v21, 6  ;;  %v4423_v1 = vsel %vm717_vm2, %v3201_v34, %v3911_v0  ;;  %v3685_v52 = vrot.slane %v7877_v32, 1  ;;  %5639 = vmatmul.msk.bf16.gmra.mxu3 %vm2820_vm15, %v2775_v9  ;;  %v3204_v56 = vrot.slane %v7855_v21, 7 }
 0x3ca   : > { %4944 = vst [vmem:[#allocation1 + $0x22] ss:$4 sm:$0xff] %v4417_v14  ;;  %v2952_v12 = vmax.f32 %v2882_v31, 0.0  ;;  %v4424_v40 = vsel %vm717_vm2, %v3202_v58, %v3912_v53  ;;  %v3686_v57 = vrot.slane %v7877_v32, 2  ;;  %v3687_v17 = vrot.slane %v7877_v32, 3  ;;  %v2424_v47 = vpop.permute.xlu0 %2423 }
 0x3cb   : > { %4945 = vst [vmem:[#allocation1 + $0x23] ss:$4 sm:$0xff] %v4418_v36  ;;  %5287 = vxpose.xlu1.b32.cont [6/16] (narrow) %v7829_v61, 8  ;;  %v4425_v42 = vsel %vm717_vm2, %v3203_v22, %v3913_v54  ;;  %v4426_v55 = vsel %vm717_vm2, %v3204_v56, %v3914_v6  ;;  %v3688_v61 = vrot.slane %v7877_v32, 4  ;;  %v3037_v38 = vadd.f32 %v7699_v49, %v3036_v59 }
 0x3cc   : > { %v3689_v45 = vrot.slane %v7877_v32, 5  ;;  %v3916_v46 = vperm.slane %v3685_v52, 0  ;;  %v3690_v2 = vrot.slane %v7877_v32, 6  ;;  %v3915_v21 = vperm.slane %v7877_v32, 0  ;;  %v2456_v58 = vpop.permute.xlu1 %2455 }
 0x3cd   : > { %v3917_v23 = vperm.slane %v3686_v57, 0  ;;  %v3205_v50 = vrot.slane %v2952_v12, 1  ;;  %v3691_v14 = vrot.slane %v7877_v32, 7  ;;  %v3918_v19 = vperm.slane %v3687_v17, 0 }
 0x3ce   : > { %v7882_v60 = vld.sshfl [vmem:[#allocation1] sm:$0xff pattern:$0x73625140]  ;;  %v3206_v20 = vrot.slane %v2952_v12, 2  ;;  %v3919_v36 = vperm.slane %v3688_v61, 0  ;;  %v7910_v63 = vmax.f32 %v3037_v38, 0.0  ;;  %v2884_v51 = vadd.f32 %v7699_v49, %v2883_v44 }
 0x3cf   : > { %4948 = vst [vmem:[#allocation1] ss:$4 sm:$0xff] %v4419_v48  ;;  %v3207_v11 = vrot.slane %v2952_v12, 3  ;;  %v3920_v3 = vperm.slane %v3689_v45, 0  ;;  %v4428_v8 = vsel %vm717_vm2, %v3205_v50, %v3916_v46  ;;  %v3208_v4 = vrot.slane %v2952_v12, 4  ;;  %v3039_v29 = vpop.f32.mrf.mxu2  ;;  %v2488_v44 = vpop.permute.xlu2 %2487 }
 0x3d0   : > { %4949 = vst [vmem:[#allocation1 + $0x1] ss:$4 sm:$0xff] %v4420_v24  ;;  %v3921_v27 = vperm.slane %v3690_v2, 0  ;;  %v4427_v37 = vsel %vm717_vm2, %v2952_v12, %v3915_v21  ;;  %v4429_v25 = vsel %vm717_vm2, %v3206_v20, %v3917_v23  ;;  %v3209_v28 = vrot.slane %v2952_v12, 5 }
 0x3d1   : > { %4950 = vst [vmem:[#allocation1 + $0x2] ss:$4 sm:$0xff] %v4421_v33  ;;  %v3922_v35 = vperm.slane %v3691_v14, 0  ;;  %v4430_v43 = vsel %vm717_vm2, %v3207_v11, %v3918_v19  ;;  %v2617_v7 = vsel %vm2052_vm9, %v7425_v41, %v2359_v39  ;;  %v3210_v0 = vrot.slane %v2952_v12, 6 }
 0x3d2   : > { %v7899_v10 = vld.sshfl [vmem:[#allocation1 + $0x20] sm:$0xff pattern:$0x73625140]  ;;  %4951 = vst [vmem:[#allocation1 + $0x3] ss:$4 sm:$0xff] %v4422_v15  ;;  %v3692_v32 = vrot.slane %v7910_v63, 1  ;;  %v4432_v16 = vsel %vm717_vm2, %v3209_v28, %v3920_v3  ;;  %v2649_v48 = vsel %vm2085_vm10, %v2617_v7, %v2391_v30  ;;  %v3040_v15 = vadd.f32 %v7699_v49, %v3039_v29  ;;  %v2521_v45 = vpop.permute.xlu0 %2520 }
 0x3d3   : > { %4952 = vst [vmem:[#allocation1 + $0x20] ss:$4 sm:$0xff] %v4423_v1  ;;  %5288 = vxpose.xlu1.b32.cont [7/16] (narrow) %v7845_v18, 8  ;;  %v4431_v18 = vsel %vm717_vm2, %v3208_v4, %v3919_v36  ;;  %v3211_v34 = vrot.slane %v2952_v12, 7  ;;  %v7924_v31 = vmax.f32 %v2884_v51, 0.0  ;;  %v3693_v53 = vrot.slane %v7910_v63, 2  ;;  %v2886_v1 = vpop.f32.mrf.mxu1 }
 0x3d4   : > { %4953 = vst [vmem:[#allocation1 + $0x21] ss:$4 sm:$0xff] %v4424_v40  ;;  %v4433_v54 = vsel %vm717_vm2, %v3210_v0, %v3921_v27  ;;  %v3694_v41 = vrot.slane %v7910_v63, 3  ;;  %v3695_v13 = vrot.slane %v7910_v63, 4  ;;  %v2681_v6 = vsel %vm2118_vm11, %v2649_v48, %v2424_v47 }
 0x3d5   : > { %4954 = vst [vmem:[#allocation1 + $0x22] ss:$4 sm:$0xff] %v4425_v42  ;;  %v4434_v33 = vsel %vm717_vm2, %v3211_v34, %v3922_v35  ;;  %v3696_v9 = vrot.slane %v7910_v63, 5  ;;  %v3924_v22 = vperm.slane %v3692_v32, 0  ;;  %v3697_v52 = vrot.slane %v7910_v63, 6 }
 0x3d6   : > { %4955 = vst [vmem:[#allocation1 + $0x23] ss:$4 sm:$0xff] %v4426_v55  ;;  %v3923_v59 = vperm.slane %v7910_v63, 0  ;;  %v3925_v56 = vperm.slane %v3693_v53, 0  ;;  %v3212_v12 = vrot.slane %v7924_v31, 1  ;;  %v3698_v40 = vrot.slane %v7910_v63, 7 }
 0x3d7   : > { %v3926_v57 = vperm.slane %v3694_v41, 0  ;;  %v2713_v42 = vsel %vm2151_vm12, %v2681_v6, %v2456_v58  ;;  %v3213_v17 = vrot.slane %v7924_v31, 2  ;;  %v3214_v55 = vrot.slane %v7924_v31, 3  ;;  %v3041_v47 = vpop.f32.mrf.mxu2  ;;  %v2393_v6 = vpop.permute.xlu2 %2392 }
 0x3d8   : > { %v3927_v61 = vperm.slane %v3695_v13, 0  ;;  %v7946_v38 = vmax.f32 %v3040_v15, 0.0  ;;  %v3215_v46 = vrot.slane %v7924_v31, 4  ;;  %v2887_v39 = vadd.f32 %v7699_v49, %v2886_v1 }
 0x3d9   : > { %v7915_v62 = vld.sshfl [vmem:[#allocation1] sm:$0xff pattern:$0x73625140]  ;;  %v3928_v2 = vperm.slane %v3696_v9, 0  ;;  %v4436_v21 = vsel %vm717_vm2, %v3212_v12, %v3924_v22  ;;  %v3929_v50 = vperm.slane %v3697_v52, 0  ;;  %v4437_v14 = vsel %vm717_vm2, %v3213_v17, %v3925_v56 }
 0x3da   : > { %4958 = vst [vmem:[#allocation1] ss:$4 sm:$0xff] %v4427_v37  ;;  %v2745_v19 = vsel %vm2184_vm13, %v2713_v42, %v2488_v44  ;;  %v3216_v20 = vrot.slane %v7924_v31, 5  ;;  %v3930_v36 = vperm.slane %v3698_v40, 0  ;;  %v4438_v63 = vsel %vm717_vm2, %v3214_v55, %v3926_v57 }
 0x3db   : > { %4959 = vst [vmem:[#allocation1 + $0x1] ss:$4 sm:$0xff] %v4428_v8  ;;  %5289 = vxpose.xlu1.b32.cont [8/16] (narrow) %v7859_v5, 8  ;;  %v4435_v5 = vsel %vm717_vm2, %v7924_v31, %v3923_v59  ;;  %v2777_v11 = vsel %vm2217_vm14, %v2745_v19, %v2521_v45  ;;  %v3217_v51 = vrot.slane %v7924_v31, 6  ;;  %v4439_v3 = vsel %vm717_vm2, %v3215_v46, %v3927_v61  ;;  %v2888_v34 = vpop.f32.mrf.mxu1 }
 0x3dc   : > { %4960 = vst [vmem:[#allocation1 + $0x2] ss:$4 sm:$0xff] %v4429_v25  ;;  %v3699_v8 = vrot.slane %v7946_v38, 1  ;;  %5640 = vmatmul.msk.bf16.gmra.mxu3 %vm2820_vm15, %v2777_v11  ;;  %v3218_v4 = vrot.slane %v7924_v31, 7  ;;  %v7965_v30 = vmax.f32 %v2887_v39, 0.0  ;;  %v4440_v27 = vsel %vm717_vm2, %v3216_v20, %v3928_v2 }
 0x3dd   : > { %v7928_v24 = vld.sshfl [vmem:[#allocation1 + $0x20] sm:$0xff pattern:$0x73625140]  ;;  %4961 = vst [vmem:[#allocation1 + $0x3] ss:$4 sm:$0xff] %v4430_v43  ;;  %v3700_v37 = vrot.slane %v7946_v38, 2  ;;  %v4441_v28 = vsel %vm717_vm2, %v3217_v51, %v3929_v50  ;;  %v2361_v43 = vpop.permute.xlu1 %2360  ;;  %v2889_v22 = vadd.f32 %v7699_v49, %v2888_v34 }
 0x3de   : > { %4962 = vst [vmem:[#allocation1 + $0x20] ss:$4 sm:$0xff] %v4431_v18  ;;  %v3701_v35 = vrot.slane %v7946_v38, 3  ;;  %v4442_v7 = vsel %vm717_vm2, %v3218_v4, %v3930_v36  ;;  %v3702_v0 = vrot.slane %v7946_v38, 4  ;;  %v3042_v18 = vadd.f32 %v7699_v49, %v3041_v47 }
 0x3df   : > { %4963 = vst [vmem:[#allocation1 + $0x21] ss:$4 sm:$0xff] %v4432_v16  ;;  %v3703_v32 = vrot.slane %v7946_v38, 5  ;;  %v3932_v29 = vperm.slane %v3699_v8, 0  ;;  %v3704_v31 = vrot.slane %v7946_v38, 6  ;;  %v3931_v16 = vperm.slane %v7946_v38, 0  ;;  %v3044_v39 = vpop.f32.mrf.mxu2 }
 0x3e0   : > { %4964 = vst [vmem:[#allocation1 + $0x22] ss:$4 sm:$0xff] %v4433_v54  ;;  %v3933_v53 = vperm.slane %v3700_v37, 0  ;;  %v3219_v54 = vrot.slane %v7965_v30, 1  ;;  %v3705_v41 = vrot.slane %v7946_v38, 7  ;;  %v3934_v48 = vperm.slane %v3701_v35, 0  ;;  %v2490_v35 = vpop.permute.xlu2 %2489 }
 0x3e1   : > { %4965 = vst [vmem:[#allocation1 + $0x23] ss:$4 sm:$0xff] %v4434_v33  ;;  %v2426_v33 = vpop.permute.xlu0 %2425  ;;  %v3220_v13 = vrot.slane %v7965_v30, 2  ;;  %v3221_v58 = vrot.slane %v7965_v30, 3  ;;  %v3935_v15 = vperm.slane %v3702_v0, 0  ;;  %v7984_v9 = vmax.f32 %v3042_v18, 0.0 }
 0x3e2   : > { %v3936_v1 = vperm.slane %v3703_v32, 0  ;;  %v4444_v52 = vsel %vm717_vm2, %v3219_v54, %v3932_v29  ;;  %v2619_v59 = vsel %vm2052_vm9, %v7489_v26, %v2361_v43  ;;  %v3222_v56 = vrot.slane %v7965_v30, 4 }
 0x3e3   : > { %5290 = vxpose.xlu1.b32.cont [9/16] (narrow) %v7882_v60, 8  ;;  %v3937_v60 = vperm.slane %v3704_v31, 0  ;;  %v4443_v40 = vsel %vm717_vm2, %v7965_v30, %v3931_v16  ;;  %v4445_v57 = vsel %vm717_vm2, %v3220_v13, %v3933_v53  ;;  %v3223_v42 = vrot.slane %v7965_v30, 5  ;;  %v2891_v47 = vpop.f32.mrf.mxu1 }
 0x3e4   : > { %v7951_v23 = vld.sshfl [vmem:[#allocation1] sm:$0xff pattern:$0x73625140]  ;;  %v3224_v17 = vrot.slane %v7965_v30, 6  ;;  %v3938_v55 = vperm.slane %v3705_v41, 0  ;;  %v4446_v61 = vsel %vm717_vm2, %v3221_v58, %v3934_v48  ;;  %v3225_v26 = vrot.slane %v7965_v30, 7 }
 0x3e5   : > { %4968 = vst [vmem:[#allocation1] ss:$4 sm:$0xff] %v4435_v5  ;;  %v4447_v38 = vsel %vm717_vm2, %v3222_v56, %v3935_v15  ;;  %v3706_v45 = vrot.slane %v7984_v9, 1  ;;  %v2651_v46 = vsel %vm2085_vm10, %v2619_v59, %v2393_v6  ;;  %v8003_v44 = vmax.f32 %v2889_v22, 0.0  ;;  %v2458_v50 = vpop.permute.xlu1 %2457 }
 0x3e6   : > { %4969 = vst [vmem:[#allocation1 + $0x1] ss:$4 sm:$0xff] %v4436_v21  ;;  %v4448_v2 = vsel %vm717_vm2, %v3223_v42, %v3936_v1  ;;  %v3707_v21 = vrot.slane %v7984_v9, 2  ;;  %v2683_v5 = vsel %vm2118_vm11, %v2651_v46, %v2426_v33  ;;  %v4449_v19 = vsel %vm717_vm2, %v3224_v17, %v3937_v60 }
 0x3e7   : > { %4970 = vst [vmem:[#allocation1 + $0x2] ss:$4 sm:$0xff] %v4437_v14  ;;  %v3708_v20 = vrot.slane %v7984_v9, 3  ;;  %v4450_v36 = vsel %vm717_vm2, %v3225_v26, %v3938_v55  ;;  %v3045_v11 = vadd.f32 %v7699_v49, %v3044_v39  ;;  %v3710_v51 = vrot.slane %v7984_v9, 5 }
 0x3e8   : > { %v7969_v25 = vld.sshfl [vmem:[#allocation1 + $0x20] sm:$0xff pattern:$0x73625140]  ;;  %4971 = vst [vmem:[#allocation1 + $0x3] ss:$4 sm:$0xff] %v4438_v63  ;;  %v3709_v63 = vrot.slane %v7984_v9, 4  ;;  %v2715_v8 = vsel %vm2151_vm12, %v2683_v5, %v2458_v50 }
 0x3e9   : > { %4972 = vst [vmem:[#allocation1 + $0x20] ss:$4 sm:$0xff] %v4439_v3  ;;  %v3940_v3 = vperm.slane %v3706_v45, 0  ;;  %v3711_v4 = vrot.slane %v7984_v9, 6  ;;  %v3939_v30 = vperm.slane %v7984_v9, 0  ;;  %v2523_v37 = vpop.permute.xlu0 %2522  ;;  %v3227_v49 = vrot.slane %v8003_v44, 2 }
 0x3ea   : > { %4973 = vst [vmem:[#allocation1 + $0x21] ss:$4 sm:$0xff] %v4440_v27  ;;  %v3941_v27 = vperm.slane %v3707_v21, 0  ;;  %v3712_v43 = vrot.slane %v7984_v9, 7  ;;  %v3228_v0 = vrot.slane %v8003_v44, 3  ;;  %v3943_v18 = vperm.slane %v3709_v63, 0 }
 0x3eb   : > { %4974 = vst [vmem:[#allocation1 + $0x22] ss:$4 sm:$0xff] %v4441_v28  ;;  %5291 = vxpose.xlu1.b32.cont [10/16] (narrow) %v7899_v10, 8  ;;  %v3226_v28 = vrot.slane %v8003_v44, 1  ;;  %v8024_v32 = vmax.f32 %v3045_v11, 0.0  ;;  %v2747_v29 = vsel %vm2184_vm13, %v2715_v8, %v2490_v35  ;;  %v3944_v31 = vperm.slane %v3710_v51, 0  ;;  %v2893_v46 = vpop.f32.mrf.mxu1 }
 0x3ec   : > { %4975 = vst [vmem:[#allocation1 + $0x23] ss:$4 sm:$0xff] %v4442_v7  ;;  %v3942_v7 = vperm.slane %v3708_v20, 0  ;;  %v8030_v10 = vld [vmem:[%s8438_s6] ss:$0 sm:$0xff]  ;;  %v2779_v53 = vsel %vm2217_vm14, %v2747_v29, %v2523_v37  ;;  %v3229_v54 = vrot.slane %v8003_v44, 4  ;;  %v4451_v33 = vsel %vm717_vm2, %v8003_v44, %v3939_v30 }
 0x3ed   : > { %v2892_v34 = vadd.f32 %v8030_v10, %v2891_v47  ;;  %v4452_v16 = vsel %vm717_vm2, %v3226_v28, %v3940_v3  ;;  %v3945_v48 = vperm.slane %v3711_v4, 0  ;;  %v4453_v13 = vsel %vm717_vm2, %v3227_v49, %v3941_v27  ;;  %5641 = vmatmul.msk.bf16.gmra.mxu3 %vm2820_vm15, %v2779_v53 }
 0x3ee   : > { %v3230_v58 = vrot.slane %v8003_v44, 5  ;;  %v3946_v6 = vperm.slane %v3712_v43, 0  ;;  %v4454_v15 = vsel %vm717_vm2, %v3228_v0, %v3942_v7  ;;  %v3231_v9 = vrot.slane %v8003_v44, 6 }
 0x3ef   : > { %v7991_v12 = vld.sshfl [vmem:[#allocation1] sm:$0xff pattern:$0x73625140]  ;;  %v4455_v22 = vsel %vm717_vm2, %v3229_v54, %v3943_v18  ;;  %v3713_v1 = vrot.slane %v8024_v32, 1  ;;  %v3232_v59 = vrot.slane %v8003_v44, 7  ;;  %v2956_v56 = vmax.f32 %v2892_v34, 0.0 }
 0x3f0   : > { %4978 = vst [vmem:[#allocation1] ss:$4 sm:$0xff] %v4443_v40  ;;  %v4456_v60 = vsel %vm717_vm2, %v3230_v58, %v3944_v31  ;;  %v3714_v40 = vrot.slane %v8024_v32, 2  ;;  %v4457_v42 = vsel %vm717_vm2, %v3231_v9, %v3945_v48  ;;  %v3715_v17 = vrot.slane %v8024_v32, 3 }
 0x3f1   : > { %4979 = vst [vmem:[#allocation1 + $0x1] ss:$4 sm:$0xff] %v4444_v52  ;;  %v3046_v52 = vpop.f32.mrf.mxu2  ;;  %v4458_v55 = vsel %vm717_vm2, %v3232_v59, %v3946_v6  ;;  %v3948_v45 = vperm.slane %v3713_v1, 0  ;;  %v3718_v39 = vrot.slane %v8024_v32, 6  ;;  %v3947_v44 = vperm.slane %v8024_v32, 0 }
 0x3f2   : > { %4980 = vst [vmem:[#allocation1 + $0x2] ss:$4 sm:$0xff] %v4445_v57  ;;  %v3047_v26 = vadd.f32 %v8030_v10, %v3046_v52  ;;  %v3233_v21 = vrot.slane %v2956_v56, 1  ;;  %v3719_v50 = vrot.slane %v8024_v32, 7  ;;  %v3950_v5 = vperm.slane %v3715_v17, 0 }
 0x3f3   : > { %v8008_v14 = vld.sshfl [vmem:[#allocation1 + $0x20] sm:$0xff pattern:$0x73625140]  ;;  %4981 = vst [vmem:[#allocation1 + $0x3] ss:$4 sm:$0xff] %v4446_v61  ;;  %v3716_v61 = vrot.slane %v8024_v32, 4  ;;  %v2894_v11 = vadd.f32 %v8030_v10, %v2893_v46  ;;  %v4459_v4 = vsel %vm717_vm2, %v2956_v56, %v3947_v44 }
 0x3f4   : > { %4982 = vst [vmem:[#allocation1 + $0x20] ss:$4 sm:$0xff] %v4447_v38  ;;  %v3717_v38 = vrot.slane %v8024_v32, 5  ;;  %5292 = vxpose.xlu1.b32.cont [11/16] (narrow) %v7915_v62, 8  ;;  %v3235_v63 = vrot.slane %v2956_v56, 3  ;;  %v4460_v51 = vsel %vm717_vm2, %v3233_v21, %v3948_v45  ;;  %v3236_v3 = vrot.slane %v2956_v56, 4 }
 0x3f5   : > { %4983 = vst [vmem:[#allocation1 + $0x21] ss:$4 sm:$0xff] %v4448_v2  ;;  %v3949_v2 = vperm.slane %v3714_v40, 0  ;;  %v3951_v20 = vperm.slane %v3716_v61, 0  ;;  %v3953_v47 = vperm.slane %v3718_v39, 0  ;;  %v3237_v27 = vrot.slane %v2956_v56, 5 }
 0x3f6   : > { %4984 = vst [vmem:[#allocation1 + $0x22] ss:$4 sm:$0xff] %v4449_v19  ;;  %v3234_v19 = vrot.slane %v2956_v56, 2  ;;  %v3952_v62 = vperm.slane %v3717_v38, 0  ;;  %v3954_v37 = vperm.slane %v3719_v50, 0  ;;  %v4462_v28 = vsel %vm717_vm2, %v3235_v63, %v3950_v5 }
 0x3f7   : > { %4985 = vst [vmem:[#allocation1 + $0x23] ss:$4 sm:$0xff] %v4450_v36  ;;  %v3110_v36 = vmax.f32 %v3047_v26, 0.0  ;;  %v3238_v49 = vrot.slane %v2956_v56, 6  ;;  %v4463_v35 = vsel %vm717_vm2, %v3236_v3, %v3951_v20  ;;  %v3239_v0 = vrot.slane %v2956_v56, 7 }
 0x3f8   : > { %v4461_v30 = vsel %vm717_vm2, %v3234_v19, %v3949_v2  ;;  %v2957_v18 = vmax.f32 %v2894_v11, 0.0  ;;  %v4464_v32 = vsel %vm717_vm2, %v3237_v27, %v3952_v62  ;;  %v8081_v62 = vpop.f32.mrf.mxu3 }
 0x3f9   : > { %v3720_v43 = vrot.slane %v3110_v36, 1  ;;  %v3049_v7 = vpop.f32.mrf.mxu2  ;;  %v3721_v29 = vrot.slane %v3110_v36, 2  ;;  %v4465_v31 = vsel %vm717_vm2, %v3238_v49, %v3953_v47  ;;  %v4466_v53 = vsel %vm717_vm2, %v3239_v0, %v3954_v37 }
 0x3fa   : > { %v4986_v41 = vld.sshfl [vmem:[#allocation1] sm:$0xff pattern:$0x73625140]  ;;  %v3723_v54 = vrot.slane %v3110_v36, 4  ;;  %v3724_v48 = vrot.slane %v3110_v36, 5  ;;  %v3725_v58 = vrot.slane %v3110_v36, 6 }
 0x3fb   : > { %4988 = vst [vmem:[#allocation1] ss:$4 sm:$0xff] %v4451_v33  ;;  %5314 = vxpose.xlu2.b32.start [1/16] (narrow) %v4986_v41, 8  ;;  %v3050_v41 = vadd.f32 %v8030_v10, %v3049_v7  ;;  %v3956_v33 = vperm.slane %v3720_v43, 0  ;;  %v3955_v6 = vperm.slane %v3110_v36, 0  ;;  %v3240_v9 = vrot.slane %v2957_v18, 1 }
 0x3fc   : > { %4989 = vst [vmem:[#allocation1 + $0x1] ss:$4 sm:$0xff] %v4452_v16  ;;  %v3722_v16 = vrot.slane %v3110_v36, 3  ;;  %5293 = vxpose.xlu1.b32.cont [12/16] (narrow) %v7928_v24, 8  ;;  %v3241_v52 = vrot.slane %v2957_v18, 2  ;;  %v3959_v59 = vperm.slane %v3723_v54, 0 }
 0x3fd   : > { %4990 = vst [vmem:[#allocation1 + $0x2] ss:$4 sm:$0xff] %v4453_v13  ;;  %v2896_v13 = vpop.f32.mrf.mxu1  ;;  %v3111_v56 = vmax.f32 %v3050_v41, 0.0  ;;  %v3960_v24 = vperm.slane %v3724_v48, 0  ;;  %v4467_v61 = vsel %vm717_vm2, %v2957_v18, %v3955_v6  ;;  %v3244_v38 = vrot.slane %v2957_v18, 5 }
 0x3fe   : > { %v4987_v57 = vld.sshfl [vmem:[#allocation1 + $0x20] sm:$0xff pattern:$0x73625140]  ;;  %4991 = vst [vmem:[#allocation1 + $0x3] ss:$4 sm:$0xff] %v4454_v15  ;;  %v3957_v15 = vperm.slane %v3721_v29, 0  ;;  %v2897_v40 = vadd.f32 %v8030_v10, %v2896_v13 }
 0x3ff   : > { %4992 = vst [vmem:[#allocation1 + $0x20] ss:$4 sm:$0xff] %v4455_v22  ;;  %v3726_v22 = vrot.slane %v3110_v36, 7  ;;  %v3958_v1 = vperm.slane %v3722_v16, 0  ;;  %v3245_v39 = vrot.slane %v2957_v18, 6  ;;  %v3727_v2 = vrot.slane %v3111_v56, 1 }
 0x400   : > { %4993 = vst [vmem:[#allocation1 + $0x21] ss:$4 sm:$0xff] %v4456_v60  ;;  %v3242_v60 = vrot.slane %v2957_v18, 3  ;;  %v4469_v26 = vsel %vm717_vm2, %v3241_v52, %v3957_v15  ;;  %v3246_v50 = vrot.slane %v2957_v18, 7  ;;  %v2958_v5 = vmax.f32 %v2897_v40, 0.0 }
 0x401   : > { %4994 = vst [vmem:[#allocation1 + $0x22] ss:$4 sm:$0xff] %v4457_v42  ;;  %v3243_v42 = vrot.slane %v2957_v18, 4  ;;  %v3962_v45 = vperm.slane %v3726_v22, 0  ;;  %v3051_v21 = vpop.f32.mrf.mxu2  ;;  %v4472_v19 = vsel %vm717_vm2, %v3244_v38, %v3960_v24  ;;  %v3728_v20 = vrot.slane %v3111_v56, 2 }
 0x402   : > { %4995 = vst [vmem:[#allocation1 + $0x23] ss:$4 sm:$0xff] %v4458_v55  ;;  %v3961_v55 = vperm.slane %v3725_v58, 0  ;;  %v4470_v46 = vsel %vm717_vm2, %v3242_v60, %v3958_v1  ;;  %v3729_v11 = vrot.slane %v3111_v56, 3  ;;  %v3730_v3 = vrot.slane %v3111_v56, 4 }
 0x403   : > { %5315 = vxpose.xlu2.b32.cont [2/16] (narrow) %v4987_v57, 8  ;;  %v4468_v57 = vsel %vm717_vm2, %v3240_v9, %v3956_v33  ;;  %v4471_v44 = vsel %vm717_vm2, %v3243_v42, %v3959_v59  ;;  %v3731_v47 = vrot.slane %v3111_v56, 5  ;;  %v3732_v27 = vrot.slane %v3111_v56, 6 }
 0x404   : > { %v4473_v63 = vsel %vm717_vm2, %v3245_v39, %v3961_v55  ;;  %5294 = vxpose.xlu1.b32.cont [13/16] (narrow) %v7951_v23, 8  ;;  %v3963_v37 = vperm.slane %v3111_v56, 0  ;;  %v3247_v49 = vrot.slane %v2958_v5, 1  ;;  %v3966_v43 = vperm.slane %v3729_v11, 0 }
 0x405   : > { %v4996_v8 = vld.sshfl [vmem:[#allocation1] sm:$0xff pattern:$0x73625140]  ;;  %v3248_v7 = vrot.slane %v2958_v5, 2  ;;  %v3967_v0 = vperm.slane %v3730_v3, 0  ;;  %v3250_v16 = vrot.slane %v2958_v5, 4 }
 0x406   : > { %4998 = vst [vmem:[#allocation1] ss:$4 sm:$0xff] %v4459_v4  ;;  %v3964_v4 = vperm.slane %v3727_v2, 0  ;;  %v4475_v54 = vsel %vm717_vm2, %v2958_v5, %v3963_v37  ;;  %v3251_v48 = vrot.slane %v2958_v5, 5  ;;  %v3252_v58 = vrot.slane %v2958_v5, 6 }
 0x407   : > { %4999 = vst [vmem:[#allocation1 + $0x1] ss:$4 sm:$0xff] %v4460_v51  ;;  %v4474_v51 = vsel %vm717_vm2, %v3246_v50, %v3962_v45  ;;  %v4479_v6 = vsel %vm717_vm2, %v3250_v16, %v3967_v0  ;;  %v3253_v22 = vrot.slane %v2958_v5, 7 }
 0x408   : > { %5000 = vst [vmem:[#allocation1 + $0x2] ss:$4 sm:$0xff] %v4461_v30  ;;  %v2898_v30 = vpop.f32.mrf.mxu1 }
 0x409   : > { %v4997_v34 = vld.sshfl [vmem:[#allocation1 + $0x20] sm:$0xff pattern:$0x73625140]  ;;  %5001 = vst [vmem:[#allocation1 + $0x3] ss:$4 sm:$0xff] %v4462_v28  ;;  %v3965_v28 = vperm.slane %v3728_v20, 0  ;;  %v2899_v29 = vadd.f32 %v8030_v10, %v2898_v30  ;;  %v3054_v9 = vpop.f32.mrf.mxu2 }
 0x40a   : > { %5002 = vst [vmem:[#allocation1 + $0x20] ss:$4 sm:$0xff] %v4463_v35  ;;  %v3733_v35 = vrot.slane %v3111_v56, 7  ;;  %v8095_v56 = vpop.f32.mrf.mxu3  ;;  %v3055_v55 = vadd.f32 %v8030_v10, %v3054_v9 }
 0x40b   : > { %5003 = vst [vmem:[#allocation1 + $0x21] ss:$4 sm:$0xff] %v4464_v32  ;;  %5316 = vxpose.xlu2.b32.cont [3/16] (narrow) %v4996_v8, 8  ;;  %v3052_v8 = vadd.f32 %v8030_v10, %v3051_v21  ;;  %v3249_v32 = vrot.slane %v2958_v5, 3  ;;  %v4477_v41 = vsel %vm717_vm2, %v3248_v7, %v3965_v28  ;;  %v2959_v1 = vmax.f32 %v2899_v29, 0.0 }
 0x40c   : > { %5004 = vst [vmem:[#allocation1 + $0x22] ss:$4 sm:$0xff] %v4465_v31  ;;  %v3968_v31 = vperm.slane %v3731_v47, 0  ;;  %v3970_v33 = vperm.slane %v3733_v35, 0  ;;  %5295 = vxpose.xlu1.b32.cont [14/16] (narrow) %v7969_v25, 8 }
 0x40d   : > { %5005 = vst [vmem:[#allocation1 + $0x23] ss:$4 sm:$0xff] %v4466_v53  ;;  %v3112_v18 = vmax.f32 %v3052_v8, 0.0  ;;  %v3969_v53 = vperm.slane %v3732_v27, 0  ;;  %v4478_v13 = vsel %vm717_vm2, %v3249_v32, %v3966_v43  ;;  %v3255_v50 = vrot.slane %v2959_v1, 2 }
 0x40e   : > { %v4480_v52 = vsel %vm717_vm2, %v3251_v48, %v3968_v31  ;;  %v3256_v20 = vrot.slane %v2959_v1, 3  ;;  %v3257_v11 = vrot.slane %v2959_v1, 4  ;;  %v3259_v37 = vrot.slane %v2959_v1, 6 }
 0x40f   : > { %v3734_v15 = vrot.slane %v3112_v18, 1  ;;  %v3735_v59 = vrot.slane %v3112_v18, 2  ;;  %v4481_v40 = vsel %vm717_vm2, %v3252_v58, %v3969_v53  ;;  %v3736_v24 = vrot.slane %v3112_v18, 3 }
 0x410   : > { %v8071_v17 = vld.sshfl [vmem:[#allocation1] sm:$0xff pattern:$0x73625140]  ;;  %v3737_v42 = vrot.slane %v3112_v18, 4  ;;  %v2901_v38 = vpop.f32.mrf.mxu1  ;;  %v3739_v45 = vrot.slane %v3112_v18, 6  ;;  %v3740_v2 = vrot.slane %v3112_v18, 7 }
 0x411   : > { %5008 = vst [vmem:[#allocation1] ss:$4 sm:$0xff] %v4467_v61  ;;  %v3738_v61 = vrot.slane %v3112_v18, 5  ;;  %v3973_v39 = vperm.slane %v3735_v59, 0  ;;  %v3974_v21 = vperm.slane %v3736_v24, 0  ;;  %v3056_v35 = vpop.f32.mrf.mxu2  ;;  %v3260_v43 = vrot.slane %v2959_v1, 7 }
 0x412   : > { %5009 = vst [vmem:[#allocation1 + $0x1] ss:$4 sm:$0xff] %v4468_v57  ;;  %v4482_v57 = vsel %vm717_vm2, %v3253_v22, %v3970_v33  ;;  %v3975_v5 = vperm.slane %v3737_v42, 0  ;;  %v3977_v3 = vperm.slane %v3739_v45, 0  ;;  %v3978_v30 = vperm.slane %v3740_v2, 0  ;;  %v8112_v0 = vpop.f32.mrf.mxu3 }
 0x413   : > { %5010 = vst [vmem:[#allocation1 + $0x2] ss:$4 sm:$0xff] %v4469_v26  ;;  %5317 = vxpose.xlu2.b32.cont [4/16] (narrow) %v4997_v34, 8  ;;  %v4476_v34 = vsel %vm717_vm2, %v3247_v49, %v3964_v4  ;;  %v3972_v26 = vperm.slane %v3734_v15, 0  ;;  %v4485_v47 = vsel %vm717_vm2, %v3255_v50, %v3973_v39  ;;  %v3258_v4 = vrot.slane %v2959_v1, 5 }
 0x414   : > { %v8078_v36 = vld.sshfl [vmem:[#allocation1 + $0x20] sm:$0xff pattern:$0x73625140]  ;;  %5011 = vst [vmem:[#allocation1 + $0x3] ss:$4 sm:$0xff] %v4470_v46  ;;  %v3971_v46 = vperm.slane %v3112_v18, 0  ;;  %v4486_v27 = vsel %vm717_vm2, %v3256_v20, %v3974_v21  ;;  %v4487_v28 = vsel %vm717_vm2, %v3257_v11, %v3975_v5  ;;  %v4489_v31 = vsel %vm717_vm2, %v3259_v37, %v3977_v3 }
 0x415   : > { %5012 = vst [vmem:[#allocation1 + $0x20] ss:$4 sm:$0xff] %v4471_v44  ;;  %v3254_v44 = vrot.slane %v2959_v1, 1  ;;  %v4490_v16 = vsel %vm717_vm2, %v3260_v43, %v3978_v30  ;;  %5296 = vxpose.xlu1.b32.cont [15/16] (narrow) %v7991_v12, 8 }
 0x416   : > { %5013 = vst [vmem:[#allocation1 + $0x21] ss:$4 sm:$0xff] %v4472_v19  ;;  %v3113_v19 = vmax.f32 %v3055_v55, 0.0  ;;  %v4483_v8 = vsel %vm717_vm2, %v2959_v1, %v3971_v46 }
 0x417   : > { %5014 = vst [vmem:[#allocation1 + $0x22] ss:$4 sm:$0xff] %v4473_v63  ;;  %v3976_v63 = vperm.slane %v3738_v61, 0  ;;  %v4484_v25 = vsel %vm717_vm2, %v3254_v44, %v3972_v26 }
 0x418   : > { %5015 = vst [vmem:[#allocation1 + $0x23] ss:$4 sm:$0xff] %v4474_v51  ;;  %v3741_v49 = vrot.slane %v3113_v19, 1  ;;  %v3742_v32 = vrot.slane %v3113_v19, 2  ;;  %v3744_v53 = vrot.slane %v3113_v19, 4  ;;  %v2903_v33 = vpop.f32.mrf.mxu1  ;;  %v3979_v58 = vperm.slane %v3113_v19, 0 }
 0x419   : > { %v4488_v18 = vsel %vm717_vm2, %v3258_v4, %v3976_v63  ;;  %v3747_v9 = vrot.slane %v3113_v19, 7  ;;  %v3059_v5 = vpop.f32.mrf.mxu2 }
 0x41a   : > { %v3980_v48 = vperm.slane %v3741_v49, 0  ;;  %v8129_v2 = vpop.f32.mrf.mxu3 }
 0x41b   : > { %v8088_v23 = vld.sshfl [vmem:[#allocation1] sm:$0xff pattern:$0x73625140]  ;;  %5318 = vxpose.xlu2.b32.cont [5/16] (narrow) %v8071_v17, 8  ;;  %v2902_v17 = vadd.f32 %v8030_v10, %v2901_v38  ;;  %v3986_v45 = vperm.slane %v3747_v9, 0 }
 0x41c   : > { %5018 = vst [vmem:[#allocation1] ss:$4 sm:$0xff] %v4475_v54  ;;  %v3057_v54 = vadd.f32 %v8030_v10, %v3056_v35 }
 0x41d   : > { %5019 = vst [vmem:[#allocation1 + $0x1] ss:$4 sm:$0xff] %v4476_v34  ;;  %v2960_v7 = vmax.f32 %v2902_v17, 0.0  ;;  %v3743_v34 = vrot.slane %v3113_v19, 3  ;;  %5297 = vxpose.xlu1.b32.end [16/16] (narrow) %v8008_v14, 8 }
 0x41e   : > { %5020 = vst [vmem:[#allocation1 + $0x2] ss:$4 sm:$0xff] %v4477_v41  ;;  %v3745_v41 = vrot.slane %v3113_v19, 5  ;;  %v3114_v59 = vmax.f32 %v3057_v54, 0.0 }
 0x41f   : > { %v8097_v60 = vld.sshfl [vmem:[#allocation1 + $0x20] sm:$0xff pattern:$0x73625140]  ;;  %5021 = vst [vmem:[#allocation1 + $0x3] ss:$4 sm:$0xff] %v4478_v13  ;;  %v3746_v13 = vrot.slane %v3113_v19, 6  ;;  %v4491_v61 = vsel %vm717_vm2, %v2960_v7, %v3979_v58 }
 0x420   : > { %5022 = vst [vmem:[#allocation1 + $0x20] ss:$4 sm:$0xff] %v4479_v6  ;;  %v3981_v6 = vperm.slane %v3742_v32, 0  ;;  %v3261_v15 = vrot.slane %v2960_v7, 1  ;;  %v3982_v22 = vperm.slane %v3743_v34, 0  ;;  %v3262_v1 = vrot.slane %v2960_v7, 2 }
 0x421   : > { %5023 = vst [vmem:[#allocation1 + $0x21] ss:$4 sm:$0xff] %v4480_v52  ;;  %v3983_v52 = vperm.slane %v3744_v53, 0  ;;  %v3984_v24 = vperm.slane %v3745_v41, 0  ;;  %v3985_v55 = vperm.slane %v3746_v13, 0  ;;  %v3265_v38 = vrot.slane %v2960_v7, 5 }
 0x422   : > { %5024 = vst [vmem:[#allocation1 + $0x22] ss:$4 sm:$0xff] %v4481_v40  ;;  %v3263_v40 = vrot.slane %v2960_v7, 3  ;;  %v4492_v12 = vsel %vm717_vm2, %v3261_v15, %v3980_v48  ;;  %v4493_v26 = vsel %vm717_vm2, %v3262_v1, %v3981_v6  ;;  %v3266_v39 = vrot.slane %v2960_v7, 6  ;;  %v8146_v58 = vpop.f32.mrf.mxu3 }
 0x423   : > { %5025 = vst [vmem:[#allocation1 + $0x23] ss:$4 sm:$0xff] %v4482_v57  ;;  %5319 = vxpose.xlu2.b32.cont [6/16] (narrow) %v8078_v36, 8  ;;  %v2904_v36 = vadd.f32 %v8030_v10, %v2903_v33  ;;  %v3264_v57 = vrot.slane %v2960_v7, 4  ;;  %v3267_v44 = vrot.slane %v2960_v7, 7  ;;  %v3748_v50 = vrot.slane %v3114_v59, 1 }
 0x424   : > { %v4494_v46 = vsel %vm717_vm2, %v3263_v40, %v3982_v22  ;;  %v4496_v20 = vsel %vm717_vm2, %v3265_v38, %v3984_v24  ;;  %v3749_v17 = vrot.slane %v3114_v59, 2  ;;  %v3750_v63 = vrot.slane %v3114_v59, 3 }
 0x425   : > { %v4495_v21 = vsel %vm717_vm2, %v3264_v57, %v3983_v52  ;;  %v2961_v19 = vmax.f32 %v2904_v36, 0.0  ;;  %v4497_v11 = vsel %vm717_vm2, %v3266_v39, %v3985_v55  ;;  %v4498_v3 = vsel %vm717_vm2, %v3267_v44, %v3986_v45  ;;  %v3061_v52 = vpop.f32.mrf.mxu2 }
 0x426   : > { %v8106_v51 = vld.sshfl [vmem:[#allocation1] sm:$0xff pattern:$0x73625140]  ;;  %v3752_v4 = vrot.slane %v3114_v59, 5  ;;  %v3988_v30 = vperm.slane %v3748_v50, 0  ;;  %v3753_v37 = vrot.slane %v3114_v59, 6  ;;  %v3062_v38 = vadd.f32 %v8030_v10, %v3061_v52 }
 0x427   : > { %5028 = vst [vmem:[#allocation1] ss:$4 sm:$0xff] %v4483_v8  ;;  %v3751_v8 = vrot.slane %v3114_v59, 4  ;;  %v3989_v49 = vperm.slane %v3749_v17, 0  ;;  %v3268_v35 = vrot.slane %v2961_v19, 1  ;;  %v3754_v43 = vrot.slane %v3114_v59, 7 }
 0x428   : > { %5029 = vst [vmem:[#allocation1 + $0x1] ss:$4 sm:$0xff] %v4484_v25  ;;  %v3269_v7 = vrot.slane %v2961_v19, 2  ;;  %v3271_v53 = vrot.slane %v2961_v19, 4  ;;  %v3993_v41 = vperm.slane %v3753_v37, 0  ;;  %v3272_v13 = vrot.slane %v2961_v19, 5 }
 0x429   : > { %5030 = vst [vmem:[#allocation1 + $0x2] ss:$4 sm:$0xff] %v4485_v47  ;;  %v3060_v47 = vadd.f32 %v8030_v10, %v3059_v5  ;;  %v4500_v14 = vsel %vm717_vm2, %v3268_v35, %v3988_v30  ;;  %v3994_v6 = vperm.slane %v3754_v43, 0  ;;  %v3273_v9 = vrot.slane %v2961_v19, 6 }
 0x42a   : > { %v8115_v29 = vld.sshfl [vmem:[#allocation1 + $0x20] sm:$0xff pattern:$0x73625140]  ;;  %5031 = vst [vmem:[#allocation1 + $0x3] ss:$4 sm:$0xff] %v4486_v27  ;;  %v2906_v27 = vpop.f32.mrf.mxu1  ;;  %v4501_v33 = vsel %vm717_vm2, %v3269_v7, %v3989_v49  ;;  %v8160_v30 = vpop.f32.mrf.mxu3 }
 0x42b   : > { %5032 = vst [vmem:[#allocation1 + $0x20] ss:$4 sm:$0xff] %v4487_v28  ;;  %5320 = vxpose.xlu2.b32.cont [7/16] (narrow) %v8088_v23, 8  ;;  %v3987_v28 = vperm.slane %v3114_v59, 0  ;;  %v3990_v23 = vperm.slane %v3750_v63, 0  ;;  %v3115_v32 = vmax.f32 %v3060_v47, 0.0  ;;  %v2907_v34 = vadd.f32 %v8030_v10, %v2906_v27 }
 0x42c   : > { %5033 = vst [vmem:[#allocation1 + $0x21] ss:$4 sm:$0xff] %v4488_v18  ;;  %v3991_v18 = vperm.slane %v3751_v8, 0  ;;  %v3274_v59 = vrot.slane %v2961_v19, 7  ;;  %v4505_v57 = vsel %vm717_vm2, %v3273_v9, %v3993_v41  ;;  %v3116_v63 = vmax.f32 %v3062_v38, 0.0 }
 0x42d   : > { %5034 = vst [vmem:[#allocation1 + $0x22] ss:$4 sm:$0xff] %v4489_v31  ;;  %v3270_v31 = vrot.slane %v2961_v19, 3  ;;  %v4499_v48 = vsel %vm717_vm2, %v2961_v19, %v3987_v28  ;;  %v3755_v1 = vrot.slane %v3115_v32, 1  ;;  %v2962_v40 = vmax.f32 %v2907_v34, 0.0 }
 0x42e   : > { %5035 = vst [vmem:[#allocation1 + $0x23] ss:$4 sm:$0xff] %v4490_v16  ;;  %v3992_v16 = vperm.slane %v3752_v4, 0  ;;  %v4503_v22 = vsel %vm717_vm2, %v3271_v53, %v3991_v18  ;;  %v3756_v24 = vrot.slane %v3115_v32, 2  ;;  %v3757_v55 = vrot.slane %v3115_v32, 3 }
 0x42f   : > { %v4502_v15 = vsel %vm717_vm2, %v3270_v31, %v3990_v23  ;;  %v3996_v45 = vperm.slane %v3755_v1, 0  ;;  %v3760_v39 = vrot.slane %v3115_v32, 6  ;;  %v3995_v44 = vperm.slane %v3115_v32, 0 }
 0x430   : > { %v4504_v36 = vsel %vm717_vm2, %v3272_v13, %v3992_v16  ;;  %v3275_v50 = vrot.slane %v2962_v40, 1  ;;  %v3761_v5 = vrot.slane %v3115_v32, 7  ;;  %v3998_v19 = vperm.slane %v3757_v55, 0 }
 0x431   : > { %v8124_v42 = vld.sshfl [vmem:[#allocation1] sm:$0xff pattern:$0x73625140]  ;;  %v3278_v4 = vrot.slane %v2962_v40, 4  ;;  %v4001_v37 = vperm.slane %v3760_v39, 0  ;;  %v4507_v28 = vsel %vm717_vm2, %v2962_v40, %v3995_v44  ;;  %v3279_v35 = vrot.slane %v2962_v40, 5 }
 0x432   : > { %5038 = vst [vmem:[#allocation1] ss:$4 sm:$0xff] %v4491_v61  ;;  %v4506_v61 = vsel %vm717_vm2, %v3274_v59, %v3994_v6  ;;  %v4508_v47 = vsel %vm717_vm2, %v3275_v50, %v3996_v45  ;;  %v4002_v43 = vperm.slane %v3761_v5, 0  ;;  %v3280_v7 = vrot.slane %v2962_v40, 6 }
 0x433   : > { %5039 = vst [vmem:[#allocation1 + $0x1] ss:$4 sm:$0xff] %v4492_v12  ;;  %5321 = vxpose.xlu2.b32.cont [8/16] (narrow) %v8097_v60, 8  ;;  %v3759_v60 = vrot.slane %v3115_v32, 5  ;;  %v3281_v31 = vrot.slane %v2962_v40, 7  ;;  %v3765_v13 = vrot.slane %v3116_v63, 4 }
 0x434   : > { %5040 = vst [vmem:[#allocation1 + $0x2] ss:$4 sm:$0xff] %v4493_v26  ;;  %v3758_v26 = vrot.slane %v3115_v32, 4  ;;  %v3064_v32 = vpop.f32.mrf.mxu2  ;;  %v4513_v41 = vsel %vm717_vm2, %v3280_v7, %v4001_v37  ;;  %v3767_v1 = vrot.slane %v3116_v63, 6  ;;  %v4003_v52 = vperm.slane %v3116_v63, 0 }
 0x435   : > { %v8133_v25 = vld.sshfl [vmem:[#allocation1 + $0x20] sm:$0xff pattern:$0x73625140]  ;;  %5041 = vst [vmem:[#allocation1 + $0x3] ss:$4 sm:$0xff] %v4494_v46  ;;  %v2908_v46 = vpop.f32.mrf.mxu1  ;;  %v4000_v8 = vperm.slane %v3759_v60, 0  ;;  %v3065_v6 = vadd.f32 %v8030_v10, %v3064_v32  ;;  %v8176_v60 = vpop.f32.mrf.mxu3 }
 0x436   : > { %5042 = vst [vmem:[#allocation1 + $0x20] ss:$4 sm:$0xff] %v4495_v21  ;;  %v3997_v21 = vperm.slane %v3756_v24, 0  ;;  %v3999_v17 = vperm.slane %v3758_v26, 0  ;;  %v4007_v55 = vperm.slane %v3765_v13, 0 }
 0x437   : > { %5043 = vst [vmem:[#allocation1 + $0x21] ss:$4 sm:$0xff] %v4496_v20  ;;  %v3276_v20 = vrot.slane %v2962_v40, 2  ;;  %v4512_v16 = vsel %vm717_vm2, %v3279_v35, %v4000_v8 }
 0x438   : > { %5044 = vst [vmem:[#allocation1 + $0x22] ss:$4 sm:$0xff] %v4497_v11  ;;  %v3277_v11 = vrot.slane %v2962_v40, 3  ;;  %v4511_v18 = vsel %vm717_vm2, %v3278_v4, %v3999_v17 }
 0x439   : > { %5045 = vst [vmem:[#allocation1 + $0x23] ss:$4 sm:$0xff] %v4498_v3  ;;  %v2909_v3 = vadd.f32 %v8030_v10, %v2908_v46  ;;  %v4509_v49 = vsel %vm717_vm2, %v3276_v20, %v3997_v21  ;;  %v4009_v21 = vperm.slane %v3767_v1, 0 }
 0x43a   : > { %v4510_v23 = vsel %vm717_vm2, %v3277_v11, %v3998_v19 }
 0x43b   : > { %5322 = vxpose.xlu2.b32.cont [9/16] (narrow) %v8106_v51, 8  ;;  %v3762_v51 = vrot.slane %v3116_v63, 1  ;;  %v2963_v34 = vmax.f32 %v2909_v3, 0.0 }
 0x43c   : > { %v8142_v54 = vld.sshfl [vmem:[#allocation1] sm:$0xff pattern:$0x73625140]  ;;  %v3066_v3 = vpop.f32.mrf.mxu2 }
 0x43d   : > { %5048 = vst [vmem:[#allocation1] ss:$4 sm:$0xff] %v4499_v48  ;;  %v3764_v48 = vrot.slane %v3116_v63, 3  ;;  %v4004_v9 = vperm.slane %v3762_v51, 0  ;;  %v3282_v40 = vrot.slane %v2963_v34, 1  ;;  %v3284_v26 = vrot.slane %v2963_v34, 3  ;;  %v8188_v13 = vpop.f32.mrf.mxu3 }
 0x43e   : > { %5049 = vst [vmem:[#allocation1 + $0x1] ss:$4 sm:$0xff] %v4500_v14  ;;  %v3763_v14 = vrot.slane %v3116_v63, 2  ;;  %v3285_v39 = vrot.slane %v2963_v34, 4  ;;  %v4515_v50 = vsel %vm717_vm2, %v2963_v34, %v4003_v52  ;;  %v3286_v19 = vrot.slane %v2963_v34, 5 }
 0x43f   : > { %5050 = vst [vmem:[#allocation1 + $0x2] ss:$4 sm:$0xff] %v4501_v33  ;;  %v4514_v33 = vsel %vm717_vm2, %v3281_v31, %v4002_v43  ;;  %v4006_v24 = vperm.slane %v3764_v48, 0  ;;  %v4516_v46 = vsel %vm717_vm2, %v3282_v40, %v4004_v9  ;;  %v3287_v17 = vrot.slane %v2963_v34, 6 }
 0x440   : > { %v8152_v12 = vld.sshfl [vmem:[#allocation1 + $0x20] sm:$0xff pattern:$0x73625140]  ;;  %5051 = vst [vmem:[#allocation1 + $0x3] ss:$4 sm:$0xff] %v4502_v15  ;;  %v3766_v15 = vrot.slane %v3116_v63, 5  ;;  %v3067_v7 = vadd.f32 %v8030_v10, %v3066_v3 }
 0x441   : > { %5052 = vst [vmem:[#allocation1 + $0x20] ss:$4 sm:$0xff] %v4503_v22  ;;  %v2911_v22 = vpop.f32.mrf.mxu1  ;;  %v4005_v59 = vperm.slane %v3763_v14, 0  ;;  %v4518_v20 = vsel %vm717_vm2, %v3284_v26, %v4006_v24  ;;  %v3288_v8 = vrot.slane %v2963_v34, 7 }
 0x442   : > { %5053 = vst [vmem:[#allocation1 + $0x21] ss:$4 sm:$0xff] %v4504_v36  ;;  %v3768_v36 = vrot.slane %v3116_v63, 7  ;;  %v2912_v38 = vadd.f32 %v8030_v10, %v2911_v22  ;;  %v4008_v45 = vperm.slane %v3766_v15, 0  ;;  %v4519_v63 = vsel %vm717_vm2, %v3285_v39, %v4007_v55 }
 0x443   : > { %5054 = vst [vmem:[#allocation1 + $0x22] ss:$4 sm:$0xff] %v4505_v57  ;;  %5323 = vxpose.xlu2.b32.cont [10/16] (narrow) %v8115_v29, 8  ;;  %v3283_v57 = vrot.slane %v2963_v34, 2  ;;  %v3118_v15 = vmax.f32 %v3067_v7, 0.0 }
 0x444   : > { %5055 = vst [vmem:[#allocation1 + $0x23] ss:$4 sm:$0xff] %v4506_v61  ;;  %v3117_v61 = vmax.f32 %v3065_v6, 0.0  ;;  %v4010_v29 = vperm.slane %v3768_v36, 0  ;;  %v4520_v4 = vsel %vm717_vm2, %v3286_v19, %v4008_v45 }
 0x445   : > { %v4517_v5 = vsel %vm717_vm2, %v3283_v57, %v4005_v59  ;;  %v3776_v45 = vrot.slane %v3118_v15, 1 }
 0x446   : > { %v3769_v11 = vrot.slane %v3117_v61, 1  ;;  %v3770_v37 = vrot.slane %v3117_v61, 2  ;;  %v3771_v35 = vrot.slane %v3117_v61, 3  ;;  %v4522_v43 = vsel %vm717_vm2, %v3288_v8, %v4010_v29 }
 0x447   : > { %v8162_v27 = vld.sshfl [vmem:[#allocation1] sm:$0xff pattern:$0x73625140]  ;;  %v3774_v31 = vrot.slane %v3117_v61, 6  ;;  %v4011_v34 = vperm.slane %v3117_v61, 0  ;;  %v3778_v29 = vrot.slane %v3118_v15, 3 }
 0x448   : > { %5058 = vst [vmem:[#allocation1] ss:$4 sm:$0xff] %v4507_v28  ;;  %v4012_v51 = vperm.slane %v3769_v11, 0  ;;  %v4014_v48 = vperm.slane %v3771_v35, 0  ;;  %v3780_v11 = vrot.slane %v3118_v15, 5  ;;  %v4020_v3 = vperm.slane %v3776_v45, 0 }
 0x449   : > { %5059 = vst [vmem:[#allocation1 + $0x1] ss:$4 sm:$0xff] %v4508_v47  ;;  %v2964_v47 = vmax.f32 %v2912_v38, 0.0  ;;  %v2913_v32 = vpop.f32.mrf.mxu1  ;;  %v4017_v40 = vperm.slane %v3774_v31, 0  ;;  %v4022_v35 = vperm.slane %v3778_v29, 0 }
 0x44a   : > { %5060 = vst [vmem:[#allocation1 + $0x2] ss:$4 sm:$0xff] %v4509_v49  ;;  %v4521_v49 = vsel %vm717_vm2, %v3287_v17, %v4009_v21  ;;  %v2914_v22 = vadd.f32 %v8030_v10, %v2913_v32  ;;  %v3779_v17 = vrot.slane %v3118_v15, 4  ;;  %v4024_v32 = vperm.slane %v3780_v11, 0 }
 0x44b   : > { %v8169_v53 = vld.sshfl [vmem:[#allocation1 + $0x20] sm:$0xff pattern:$0x73625140]  ;;  %5061 = vst [vmem:[#allocation1 + $0x3] ss:$4 sm:$0xff] %v4510_v23  ;;  %v3772_v23 = vrot.slane %v3117_v61, 4  ;;  %v4523_v36 = vsel %vm717_vm2, %v2964_v47, %v4011_v34 }
 0x44c   : > { %5062 = vst [vmem:[#allocation1 + $0x20] ss:$4 sm:$0xff] %v4511_v18  ;;  %v3773_v18 = vrot.slane %v3117_v61, 5  ;;  %5324 = vxpose.xlu2.b32.cont [11/16] (narrow) %v8124_v42, 8  ;;  %v3289_v14 = vrot.slane %v2964_v47, 1  ;;  %v3291_v9 = vrot.slane %v2964_v47, 3 }
 0x44d   : > { %5063 = vst [vmem:[#allocation1 + $0x21] ss:$4 sm:$0xff] %v4512_v16  ;;  %v4013_v16 = vperm.slane %v3770_v37, 0  ;;  %v4015_v6 = vperm.slane %v3772_v23, 0  ;;  %v3292_v52 = vrot.slane %v2964_v47, 4  ;;  %v3293_v57 = vrot.slane %v2964_v47, 5 }
 0x44e   : > { %5064 = vst [vmem:[#allocation1 + $0x22] ss:$4 sm:$0xff] %v4513_v41  ;;  %v3775_v41 = vrot.slane %v3117_v61, 7  ;;  %v4016_v1 = vperm.slane %v3773_v18, 0  ;;  %v4524_v42 = vsel %vm717_vm2, %v3289_v14, %v4012_v51  ;;  %v4526_v61 = vsel %vm717_vm2, %v3291_v9, %v4014_v48 }
 0x44f   : > { %5065 = vst [vmem:[#allocation1 + $0x23] ss:$4 sm:$0xff] %v4514_v33  ;;  %v3290_v33 = vrot.slane %v2964_v47, 2  ;;  %v3294_v26 = vrot.slane %v2964_v47, 6  ;;  %v4527_v38 = vsel %vm717_vm2, %v3292_v52, %v4015_v6  ;;  %v3295_v39 = vrot.slane %v2964_v47, 7 }
 0x450   : > { %v4018_v55 = vperm.slane %v3775_v41, 0  ;;  %v4528_v21 = vsel %vm717_vm2, %v3293_v57, %v4016_v1  ;;  %v3781_v47 = vrot.slane %v3118_v15, 6  ;;  %v4023_v23 = vperm.slane %v3779_v17, 0 }
 0x451   : > { %v4525_v24 = vsel %vm717_vm2, %v3290_v33, %v4013_v16  ;;  %v4529_v19 = vsel %vm717_vm2, %v3294_v26, %v4017_v40  ;;  %v2916_v8 = vpop.f32.mrf.mxu1 }
 0x452   : > { %v5066_v44 = vld.sshfl [vmem:[#allocation1] sm:$0xff pattern:$0x73625140]  ;;  %v2917_v51 = vadd.f32 %v8030_v10, %v2916_v8  ;;  %v4025_v14 = vperm.slane %v3781_v47, 0 }
 0x453   : > { %5068 = vst [vmem:[#allocation1] ss:$4 sm:$0xff] %v4515_v50  ;;  %5346 = vxpose.xlu0.b32.start [1/16] (narrow) %v5066_v44, 8  ;;  %v2965_v44 = vmax.f32 %v2914_v22, 0.0  ;;  %v3777_v50 = vrot.slane %v3118_v15, 2 }
 0x454   : > { %5069 = vst [vmem:[#allocation1 + $0x1] ss:$4 sm:$0xff] %v4516_v46  ;;  %v3069_v46 = vpop.f32.mrf.mxu2  ;;  %5325 = vxpose.xlu2.b32.cont [12/16] (narrow) %v8133_v25, 8  ;;  %v2966_v52 = vmax.f32 %v2917_v51, 0.0 }
 0x455   : > { %5070 = vst [vmem:[#allocation1 + $0x2] ss:$4 sm:$0xff] %v4517_v5  ;;  %v4021_v25 = vperm.slane %v3777_v50, 0  ;;  %v3296_v37 = vrot.slane %v2965_v44, 1  ;;  %v3298_v18 = vrot.slane %v2965_v44, 3  ;;  %v3299_v34 = vrot.slane %v2965_v44, 4 }
 0x456   : > { %v5067_v28 = vld.sshfl [vmem:[#allocation1 + $0x20] sm:$0xff pattern:$0x73625140]  ;;  %5071 = vst [vmem:[#allocation1 + $0x3] ss:$4 sm:$0xff] %v4518_v20  ;;  %v4530_v20 = vsel %vm717_vm2, %v3295_v39, %v4018_v55  ;;  %v3300_v33 = vrot.slane %v2965_v44, 5 }
 0x457   : > { %5072 = vst [vmem:[#allocation1 + $0x20] ss:$4 sm:$0xff] %v4519_v63  ;;  %v3070_v63 = vadd.f32 %v8030_v10, %v3069_v46  ;;  %v4532_v31 = vsel %vm717_vm2, %v3296_v37, %v4020_v3  ;;  %v3301_v9 = vrot.slane %v2965_v44, 6  ;;  %v4535_v10 = vsel %vm717_vm2, %v3299_v34, %v4023_v23 }
 0x458   : > { %5073 = vst [vmem:[#allocation1 + $0x21] ss:$4 sm:$0xff] %v4520_v4  ;;  %v4019_v4 = vperm.slane %v3118_v15, 0  ;;  %v3304_v17 = vrot.slane %v2966_v52, 2 }
 0x459   : > { %5074 = vst [vmem:[#allocation1 + $0x22] ss:$4 sm:$0xff] %v4521_v49  ;;  %v3782_v49 = vrot.slane %v3118_v15, 7  ;;  %v3119_v7 = vmax.f32 %v3070_v63, 0.0  ;;  %v4534_v15 = vsel %vm717_vm2, %v3298_v18, %v4022_v35  ;;  %v2918_v46 = vpop.f32.mrf.mxu1 }
 0x45a   : > { %5075 = vst [vmem:[#allocation1 + $0x23] ss:$4 sm:$0xff] %v4522_v43  ;;  %v3297_v43 = vrot.slane %v2965_v44, 2  ;;  %v4531_v41 = vsel %vm717_vm2, %v2965_v44, %v4019_v4  ;;  %v3306_v4 = vrot.slane %v2966_v52, 4 }
 0x45b   : > { %5347 = vxpose.xlu0.b32.cont [2/16] (narrow) %v5067_v28, 8  ;;  %v8201_v28 = vpop.f32.mrf.mxu3  ;;  %v4026_v6 = vperm.slane %v3782_v49, 0  ;;  %v3783_v22 = vrot.slane %v3119_v7, 1  ;;  %v3784_v40 = vrot.slane %v3119_v7, 2  ;;  %v3786_v55 = vrot.slane %v3119_v7, 4 }
 0x45c   : > { %v4533_v48 = vsel %vm717_vm2, %v3297_v43, %v4021_v25  ;;  %5326 = vxpose.xlu2.b32.cont [13/16] (narrow) %v8142_v54, 8  ;;  %v3071_v1 = vpop.f32.mrf.mxu2  ;;  %v4537_v54 = vsel %vm717_vm2, %v3301_v9, %v4025_v14  ;;  %v3789_v29 = vrot.slane %v3119_v7, 7  ;;  %v3307_v43 = vrot.slane %v2966_v52, 5 }
 0x45d   : > { %v5076_v59 = vld.sshfl [vmem:[#allocation1] sm:$0xff pattern:$0x73625140]  ;;  %v4028_v45 = vperm.slane %v3783_v22, 0  ;;  %v4029_v50 = vperm.slane %v3784_v40, 0  ;;  %v4031_v63 = vperm.slane %v3786_v55, 0 }
 0x45e   : > { %5078 = vst [vmem:[#allocation1] ss:$4 sm:$0xff] %v4523_v36  ;;  %v4034_v23 = vperm.slane %v3789_v29, 0 }
 0x45f   : > { %5079 = vst [vmem:[#allocation1 + $0x1] ss:$4 sm:$0xff] %v4524_v42  ;;  %v3302_v42 = vrot.slane %v2965_v44, 7  ;;  %v3788_v44 = vrot.slane %v3119_v7, 6  ;;  %v4541_v35 = vsel %vm717_vm2, %v3304_v17, %v4029_v50  ;;  %v4543_v18 = vsel %vm717_vm2, %v3306_v4, %v4031_v63 }
 0x460   : > { %5080 = vst [vmem:[#allocation1 + $0x2] ss:$4 sm:$0xff] %v4525_v24  ;;  %v3785_v24 = vrot.slane %v3119_v7, 3 }
 0x461   : > { %v5077_v5 = vld.sshfl [vmem:[#allocation1 + $0x20] sm:$0xff pattern:$0x73625140]  ;;  %5081 = vst [vmem:[#allocation1 + $0x3] ss:$4 sm:$0xff] %v4526_v61  ;;  %v4538_v57 = vsel %vm717_vm2, %v3302_v42, %v4026_v6  ;;  %v4033_v37 = vperm.slane %v3788_v44, 0 }
 0x462   : > { %5082 = vst [vmem:[#allocation1 + $0x20] ss:$4 sm:$0xff] %v4527_v38  ;;  %v8218_v61 = vld [vmem:[%s8438_s6] ss:$0 sm:$0xff]  ;;  %v3787_v38 = vrot.slane %v3119_v7, 5 }
 0x463   : > { %5083 = vst [vmem:[#allocation1 + $0x21] ss:$4 sm:$0xff] %v4528_v21  ;;  %5348 = vxpose.xlu0.b32.cont [3/16] (narrow) %v5076_v59, 8  ;;  %v4536_v59 = vsel %vm717_vm2, %v3300_v33, %v4024_v32  ;;  %v3072_v26 = vadd.f32 %v8218_v61, %v3071_v1  ;;  %v8221_v39 = vpop.f32.mrf.mxu3  ;;  %v4027_v21 = vperm.slane %v3119_v7, 0  ;;  %v2919_v3 = vadd.f32 %v8218_v61, %v2918_v46 }
 0x464   : > { %5084 = vst [vmem:[#allocation1 + $0x22] ss:$4 sm:$0xff] %v4529_v19  ;;  %v3303_v19 = vrot.slane %v2966_v52, 1  ;;  %5327 = vxpose.xlu2.b32.cont [14/16] (narrow) %v8152_v12, 8  ;;  %v4032_v8 = vperm.slane %v3787_v38, 0  ;;  %v3308_v12 = vrot.slane %v2966_v52, 6  ;;  %v2922_v17 = vadd.f32 %v8218_v61, %v8081_v62 }
 0x465   : > { %5085 = vst [vmem:[#allocation1 + $0x23] ss:$4 sm:$0xff] %v4530_v20  ;;  %v4030_v20 = vperm.slane %v3785_v24, 0  ;;  %v3120_v11 = vmax.f32 %v3072_v26, 0.0  ;;  %v4539_v49 = vsel %vm717_vm2, %v2966_v52, %v4027_v21  ;;  %v3309_v32 = vrot.slane %v2966_v52, 7 }
 0x466   : > { %v4540_v47 = vsel %vm717_vm2, %v3303_v19, %v4028_v45  ;;  %v4544_v34 = vsel %vm717_vm2, %v3307_v43, %v4032_v8  ;;  %v4545_v33 = vsel %vm717_vm2, %v3308_v12, %v4033_v37  ;;  %v2968_v62 = vmax.f32 %v2922_v17, 0.0 }
 0x467   : > { %v3790_v51 = vrot.slane %v3120_v11, 1  ;;  %v3791_v14 = vrot.slane %v3120_v11, 2  ;;  %v3792_v6 = vrot.slane %v3120_v11, 3  ;;  %v3793_v9 = vrot.slane %v3120_v11, 4 }
 0x468   : > { %v5086_v16 = vld.sshfl [vmem:[#allocation1] sm:$0xff pattern:$0x73625140]  ;;  %v3795_v1 = vrot.slane %v3120_v11, 6  ;;  %v4035_v42 = vperm.slane %v3120_v11, 0  ;;  %v3796_v40 = vrot.slane %v3120_v11, 7 }
 0x469   : > { %5088 = vst [vmem:[#allocation1] ss:$4 sm:$0xff] %v4531_v41 }
 0x46a   : > { %5089 = vst [vmem:[#allocation1 + $0x1] ss:$4 sm:$0xff] %v4532_v31  ;;  %v2967_v31 = vmax.f32 %v2919_v3, 0.0  ;;  %v4041_v44 = vperm.slane %v3795_v1, 0  ;;  %v4042_v29 = vperm.slane %v3796_v40, 0 }
 0x46b   : > { %5090 = vst [vmem:[#allocation1 + $0x2] ss:$4 sm:$0xff] %v4533_v48  ;;  %5349 = vxpose.xlu0.b32.cont [4/16] (narrow) %v5077_v5, 8  ;;  %v3305_v5 = vrot.slane %v2966_v52, 3  ;;  %v3074_v48 = vpop.f32.mrf.mxu3  ;;  %v4037_v52 = vperm.slane %v3791_v14, 0 }
 0x46c   : > { %v8211_v36 = vld.sshfl [vmem:[#allocation1 + $0x20] sm:$0xff pattern:$0x73625140]  ;;  %5091 = vst [vmem:[#allocation1 + $0x3] ss:$4 sm:$0xff] %v4534_v15  ;;  %v4546_v15 = vsel %vm717_vm2, %v3309_v32, %v4034_v23  ;;  %5328 = vxpose.xlu2.b32.cont [15/16] (narrow) %v8162_v27, 8  ;;  %v3075_v22 = vadd.f32 %v8218_v61, %v3074_v48  ;;  %v4547_v21 = vsel %vm717_vm2, %v2967_v31, %v4035_v42 }
 0x46d   : > { %5092 = vst [vmem:[#allocation1 + $0x20] ss:$4 sm:$0xff] %v4535_v10  ;;  %v4542_v7 = vsel %vm717_vm2, %v3305_v5, %v4030_v20  ;;  %v3794_v10 = vrot.slane %v3120_v11, 5  ;;  %v3311_v24 = vrot.slane %v2967_v31, 2  ;;  %v3312_v55 = vrot.slane %v2967_v31, 3 }
 0x46e   : > { %5093 = vst [vmem:[#allocation1 + $0x21] ss:$4 sm:$0xff] %v4536_v59  ;;  %v3310_v59 = vrot.slane %v2967_v31, 1  ;;  %v3313_v26 = vrot.slane %v2967_v31, 4  ;;  %v3121_v27 = vmax.f32 %v3075_v22, 0.0  ;;  %v3314_v19 = vrot.slane %v2967_v31, 5 }
 0x46f   : > { %5094 = vst [vmem:[#allocation1 + $0x22] ss:$4 sm:$0xff] %v4537_v54  ;;  %v4038_v54 = vperm.slane %v3792_v6, 0  ;;  %v4040_v38 = vperm.slane %v3794_v10, 0  ;;  %v4549_v50 = vsel %vm717_vm2, %v3311_v24, %v4037_v52  ;;  %v3315_v63 = vrot.slane %v2967_v31, 6 }
 0x470   : > { %5095 = vst [vmem:[#allocation1 + $0x23] ss:$4 sm:$0xff] %v4538_v57  ;;  %v4039_v57 = vperm.slane %v3793_v9, 0  ;;  %v3797_v3 = vrot.slane %v3121_v27, 1  ;;  %v3798_v37 = vrot.slane %v3121_v27, 2  ;;  %v3800_v43 = vrot.slane %v3121_v27, 4 }
 0x471   : > { %v4550_v20 = vsel %vm717_vm2, %v3312_v55, %v4038_v54  ;;  %v4552_v5 = vsel %vm717_vm2, %v3314_v19, %v4040_v38  ;;  %v4553_v4 = vsel %vm717_vm2, %v3315_v63, %v4041_v44  ;;  %v4043_v23 = vperm.slane %v3121_v27, 0 }
 0x472   : > { %v4551_v11 = vsel %vm717_vm2, %v3313_v26, %v4039_v57  ;;  %v3801_v12 = vrot.slane %v3121_v27, 5  ;;  %v4045_v32 = vperm.slane %v3798_v37, 0  ;;  %v3318_v48 = vrot.slane %v2968_v62, 2 }
 0x473   : > { %v8226_v25 = vld.sshfl [vmem:[#allocation1] sm:$0xff pattern:$0x73625140]  ;;  %5350 = vxpose.xlu0.b32.cont [5/16] (narrow) %v5086_v16, 8  ;;  %v4036_v16 = vperm.slane %v3790_v51, 0  ;;  %v3802_v51 = vrot.slane %v3121_v27, 6  ;;  %v4555_v6 = vsel %vm717_vm2, %v2968_v62, %v4043_v23  ;;  %v2924_v22 = vadd.f32 %v8218_v61, %v8095_v56 }
 0x474   : > { %5098 = vst [vmem:[#allocation1] ss:$4 sm:$0xff] %v4539_v49  ;;  %5329 = vxpose.xlu2.b32.end [16/16] (narrow) %v8169_v53, 8  ;;  %v3319_v10 = vrot.slane %v2968_v62, 3  ;;  %v3320_v53 = vrot.slane %v2968_v62, 4  ;;  %v4557_v42 = vsel %vm717_vm2, %v3318_v48, %v4045_v32  ;;  %v3321_v52 = vrot.slane %v2968_v62, 5 }
 0x475   : > { %5099 = vst [vmem:[#allocation1 + $0x1] ss:$4 sm:$0xff] %v4540_v47  ;;  %v4548_v45 = vsel %vm717_vm2, %v3310_v59, %v4036_v16  ;;  %v3076_v47 = vpop.f32.mrf.mxu3  ;;  %v4048_v16 = vperm.slane %v3801_v12, 0  ;;  %v4049_v1 = vperm.slane %v3802_v51, 0  ;;  %v3322_v59 = vrot.slane %v2968_v62, 6 }
 0x476   : > { %5100 = vst [vmem:[#allocation1 + $0x2] ss:$4 sm:$0xff] %v4541_v35  ;;  %v3799_v35 = vrot.slane %v3121_v27, 3  ;;  %v3323_v38 = vrot.slane %v2968_v62, 7  ;;  %v2927_v12 = vadd.f32 %v8218_v61, %v8112_v0 }
 0x477   : > { %v8233_v41 = vld.sshfl [vmem:[#allocation1 + $0x20] sm:$0xff pattern:$0x73625140]  ;;  %5101 = vst [vmem:[#allocation1 + $0x3] ss:$4 sm:$0xff] %v4542_v7  ;;  %v3077_v7 = vadd.f32 %v8218_v61, %v3076_v47  ;;  %v4560_v56 = vsel %vm717_vm2, %v3321_v52, %v4048_v16  ;;  %v4561_v44 = vsel %vm717_vm2, %v3322_v59, %v4049_v1 }
 0x478   : > { %5102 = vst [vmem:[#allocation1 + $0x20] ss:$4 sm:$0xff] %v4543_v18  ;;  %v4044_v18 = vperm.slane %v3797_v3, 0  ;;  %v4046_v14 = vperm.slane %v3799_v35, 0 }
 0x479   : > { %5103 = vst [vmem:[#allocation1 + $0x21] ss:$4 sm:$0xff] %v4544_v34  ;;  %v3803_v34 = vrot.slane %v3121_v27, 7  ;;  %v2969_v27 = vmax.f32 %v2924_v22, 0.0 }
 0x47a   : > { %5104 = vst [vmem:[#allocation1 + $0x22] ss:$4 sm:$0xff] %v4545_v33  ;;  %v4047_v33 = vperm.slane %v3800_v43, 0  ;;  %v4558_v54 = vsel %vm717_vm2, %v3319_v10, %v4046_v14 }
 0x47b   : > { %5105 = vst [vmem:[#allocation1 + $0x23] ss:$4 sm:$0xff] %v4546_v15  ;;  %5351 = vxpose.xlu0.b32.cont [6/16] (narrow) %v8211_v36, 8  ;;  %v3316_v36 = vrot.slane %v2967_v31, 7  ;;  %v3317_v31 = vrot.slane %v2968_v62, 1  ;;  %v3122_v15 = vmax.f32 %v3077_v7, 0.0 }
 0x47c   : > { %v4050_v40 = vperm.slane %v3803_v34, 0  ;;  %v4559_v24 = vsel %vm717_vm2, %v3320_v53, %v4047_v33  ;;  %v3326_v35 = vrot.slane %v2969_v27, 3  ;;  %v3327_v7 = vrot.slane %v2969_v27, 4 }
 0x47d   : > { %v4554_v49 = vsel %vm717_vm2, %v3316_v36, %v4042_v29  ;;  %v3804_v57 = vrot.slane %v3122_v15, 1  ;;  %v3079_v26 = vpop.f32.mrf.mxu3  ;;  %v3807_v19 = vrot.slane %v3122_v15, 4  ;;  %v4051_v29 = vperm.slane %v3122_v15, 0 }
 0x47e   : > { %v8241_v46 = vld.sshfl [vmem:[#allocation1] sm:$0xff pattern:$0x73625140]  ;;  %v3808_v17 = vrot.slane %v3122_v15, 5  ;;  %v3810_v3 = vrot.slane %v3122_v15, 7  ;;  %v3328_v32 = vrot.slane %v2969_v27, 5 }
 0x47f   : > { %5108 = vst [vmem:[#allocation1] ss:$4 sm:$0xff] %v4547_v21  ;;  %v3806_v21 = vrot.slane %v3122_v15, 3  ;;  %v4052_v63 = vperm.slane %v3804_v57, 0  ;;  %v4055_v37 = vperm.slane %v3807_v19, 0  ;;  %v3330_v0 = vrot.slane %v2969_v27, 7 }
 0x480   : > { %5109 = vst [vmem:[#allocation1 + $0x1] ss:$4 sm:$0xff] %v4548_v45  ;;  %v3805_v45 = vrot.slane %v3122_v15, 2  ;;  %v4056_v43 = vperm.slane %v3808_v17, 0  ;;  %v4058_v34 = vperm.slane %v3810_v3, 0  ;;  %v2929_v17 = vadd.f32 %v8218_v61, %v8129_v2 }
 0x481   : > { %5110 = vst [vmem:[#allocation1 + $0x2] ss:$4 sm:$0xff] %v4549_v50  ;;  %v4562_v50 = vsel %vm717_vm2, %v3323_v38, %v4050_v40  ;;  %v4054_v47 = vperm.slane %v3806_v21, 0  ;;  %v4567_v48 = vsel %vm717_vm2, %v3327_v7, %v4055_v37 }
 0x482   : > { %v8250_v8 = vld.sshfl [vmem:[#allocation1 + $0x20] sm:$0xff pattern:$0x73625140]  ;;  %5111 = vst [vmem:[#allocation1 + $0x3] ss:$4 sm:$0xff] %v4550_v20  ;;  %v3080_v20 = vadd.f32 %v8218_v61, %v3079_v26  ;;  %v4053_v36 = vperm.slane %v3805_v45, 0  ;;  %v4568_v10 = vsel %vm717_vm2, %v3328_v32, %v4056_v43  ;;  %v4570_v1 = vsel %vm717_vm2, %v3330_v0, %v4058_v34 }
 0x483   : > { %5112 = vst [vmem:[#allocation1 + $0x20] ss:$4 sm:$0xff] %v4551_v11  ;;  %5352 = vxpose.xlu0.b32.cont [7/16] (narrow) %v8226_v25, 8  ;;  %v4556_v25 = vsel %vm717_vm2, %v3317_v31, %v4044_v18  ;;  %v3809_v11 = vrot.slane %v3122_v15, 6  ;;  %v3329_v31 = vrot.slane %v2969_v27, 6  ;;  %v4566_v14 = vsel %vm717_vm2, %v3326_v35, %v4054_v47 }
 0x484   : > { %5113 = vst [vmem:[#allocation1 + $0x21] ss:$4 sm:$0xff] %v4552_v5  ;;  %v3324_v5 = vrot.slane %v2969_v27, 1  ;;  %v3123_v62 = vmax.f32 %v3080_v20, 0.0  ;;  %v2971_v43 = vmax.f32 %v2929_v17, 0.0 }
 0x485   : > { %5114 = vst [vmem:[#allocation1 + $0x22] ss:$4 sm:$0xff] %v4553_v4  ;;  %v3325_v4 = vrot.slane %v2969_v27, 2  ;;  %v4057_v18 = vperm.slane %v3809_v11, 0  ;;  %v3081_v15 = vpop.f32.mrf.mxu3 }
 0x486   : > { %5115 = vst [vmem:[#allocation1 + $0x23] ss:$4 sm:$0xff] %v4554_v49  ;;  %v4563_v49 = vsel %vm717_vm2, %v2969_v27, %v4051_v29  ;;  %v4564_v23 = vsel %vm717_vm2, %v3324_v5, %v4052_v63  ;;  %v3812_v16 = vrot.slane %v3123_v62, 2  ;;  %v3813_v22 = vrot.slane %v3123_v62, 3 }
 0x487   : > { %v4565_v51 = vsel %vm717_vm2, %v3325_v4, %v4053_v36  ;;  %v4569_v53 = vsel %vm717_vm2, %v3329_v31, %v4057_v18  ;;  %v3082_v52 = vadd.f32 %v8218_v61, %v3081_v15  ;;  %v3815_v59 = vrot.slane %v3123_v62, 5 }
 0x488   : > { %v3817_v38 = vrot.slane %v3123_v62, 7 }
 0x489   : > { %v8258_v9 = vld.sshfl [vmem:[#allocation1] sm:$0xff pattern:$0x73625140]  ;;  %v3124_v21 = vmax.f32 %v3082_v52, 0.0  ;;  %v4064_v19 = vperm.slane %v3815_v59, 0  ;;  %v3341_v52 = vrot.slane %v2971_v43, 4 }
 0x48a   : > { %5118 = vst [vmem:[#allocation1] ss:$4 sm:$0xff] %v4555_v6  ;;  %v3811_v6 = vrot.slane %v3123_v62, 1  ;;  %v4066_v3 = vperm.slane %v3817_v38, 0 }
 0x48b   : > { %5119 = vst [vmem:[#allocation1 + $0x1] ss:$4 sm:$0xff] %v4556_v25  ;;  %5353 = vxpose.xlu0.b32.cont [8/16] (narrow) %v8233_v41, 8  ;;  %v2970_v25 = vmax.f32 %v2927_v12, 0.0  ;;  %v3818_v37 = vrot.slane %v3124_v21, 1  ;;  %v3819_v35 = vrot.slane %v3124_v21, 2 }
 0x48c   : > { %5120 = vst [vmem:[#allocation1 + $0x2] ss:$4 sm:$0xff] %v4557_v42  ;;  %v4059_v42 = vperm.slane %v3123_v62, 0  ;;  %v4060_v40 = vperm.slane %v3811_v6, 0  ;;  %v3820_v7 = vrot.slane %v3124_v21, 3  ;;  %v3821_v18 = vrot.slane %v3124_v21, 4 }
 0x48d   : > { %v8266_v55 = vld.sshfl [vmem:[#allocation1 + $0x20] sm:$0xff pattern:$0x73625140]  ;;  %5121 = vst [vmem:[#allocation1 + $0x3] ss:$4 sm:$0xff] %v4558_v54  ;;  %v3816_v54 = vrot.slane %v3123_v62, 6 }
 0x48e   : > { %5122 = vst [vmem:[#allocation1 + $0x20] ss:$4 sm:$0xff] %v4559_v24  ;;  %v4061_v24 = vperm.slane %v3812_v16, 0  ;;  %v3331_v57 = vrot.slane %v2970_v25, 1  ;;  %v3332_v26 = vrot.slane %v2970_v25, 2  ;;  %v4571_v27 = vsel %vm717_vm2, %v2970_v25, %v4059_v42 }
 0x48f   : > { %5123 = vst [vmem:[#allocation1 + $0x21] ss:$4 sm:$0xff] %v4560_v56  ;;  %v4062_v56 = vperm.slane %v3813_v22, 0  ;;  %v3334_v20 = vrot.slane %v2970_v25, 4  ;;  %v4065_v63 = vperm.slane %v3816_v54, 0  ;;  %v3335_v36 = vrot.slane %v2970_v25, 5 }
 0x490   : > { %5124 = vst [vmem:[#allocation1 + $0x22] ss:$4 sm:$0xff] %v4561_v44  ;;  %v4572_v29 = vsel %vm717_vm2, %v3331_v57, %v4060_v40  ;;  %v4573_v11 = vsel %vm717_vm2, %v3332_v26, %v4061_v24  ;;  %v3336_v5 = vrot.slane %v2970_v25, 6  ;;  %v3822_v31 = vrot.slane %v3124_v21, 5 }
 0x491   : > { %5125 = vst [vmem:[#allocation1 + $0x23] ss:$4 sm:$0xff] %v4562_v50  ;;  %v3333_v50 = vrot.slane %v2970_v25, 3  ;;  %v4576_v2 = vsel %vm717_vm2, %v3335_v36, %v4064_v19  ;;  %v4068_v34 = vperm.slane %v3818_v37, 0  ;;  %v3338_v6 = vrot.slane %v2971_v43, 1 }
 0x492   : > { %v3824_v15 = vrot.slane %v3124_v21, 7  ;;  %v4070_v0 = vperm.slane %v3820_v7, 0  ;;  %v4071_v16 = vperm.slane %v3821_v18, 0  ;;  %v3342_v54 = vrot.slane %v2971_v43, 5 }
 0x493   : > { %5354 = vxpose.xlu0.b32.cont [9/16] (narrow) %v8241_v46, 8  ;;  %v3814_v46 = vrot.slane %v3123_v62, 4  ;;  %v4574_v47 = vsel %vm717_vm2, %v3333_v50, %v4062_v56  ;;  %v3337_v62 = vrot.slane %v2970_v25, 7  ;;  %v4580_v42 = vsel %vm717_vm2, %v3338_v6, %v4068_v34 }
 0x494   : > { %v8274_v41 = vld.sshfl [vmem:[#allocation1] sm:$0xff pattern:$0x73625140]  ;;  %v3343_v24 = vrot.slane %v2971_v43, 6  ;;  %v4074_v57 = vperm.slane %v3824_v15, 0  ;;  %v4583_v38 = vsel %vm717_vm2, %v3341_v52, %v4071_v16 }
 0x495   : > { %5128 = vst [vmem:[#allocation1] ss:$4 sm:$0xff] %v4563_v49  ;;  %v4063_v45 = vperm.slane %v3814_v46, 0  ;;  %v3084_v49 = vpop.f32.mrf.mxu3  ;;  %v4578_v12 = vsel %vm717_vm2, %v3337_v62, %v4066_v3  ;;  %v4072_v46 = vperm.slane %v3822_v31, 0 }
 0x496   : > { %5129 = vst [vmem:[#allocation1 + $0x1] ss:$4 sm:$0xff] %v4564_v23  ;;  %v4577_v23 = vsel %vm717_vm2, %v3336_v5, %v4065_v63  ;;  %v3085_v32 = vadd.f32 %v8218_v61, %v3084_v49 }
 0x497   : > { %5130 = vst [vmem:[#allocation1 + $0x2] ss:$4 sm:$0xff] %v4565_v51  ;;  %v4067_v51 = vperm.slane %v3124_v21, 0  ;;  %v4584_v50 = vsel %vm717_vm2, %v3342_v54, %v4072_v46 }
 0x498   : > { %v8283_v33 = vld.sshfl [vmem:[#allocation1 + $0x20] sm:$0xff pattern:$0x73625140]  ;;  %5131 = vst [vmem:[#allocation1 + $0x3] ss:$4 sm:$0xff] %v4566_v14  ;;  %v3823_v14 = vrot.slane %v3124_v21, 6 }
 0x499   : > { %5132 = vst [vmem:[#allocation1 + $0x20] ss:$4 sm:$0xff] %v4567_v48  ;;  %v4069_v48 = vperm.slane %v3819_v35, 0  ;;  %v4579_v25 = vsel %vm717_vm2, %v2971_v43, %v4067_v51  ;;  %v3344_v21 = vrot.slane %v2971_v43, 7 }
 0x49a   : > { %5133 = vst [vmem:[#allocation1 + $0x21] ss:$4 sm:$0xff] %v4568_v10  ;;  %v3339_v10 = vrot.slane %v2971_v43, 2  ;;  %v4073_v59 = vperm.slane %v3823_v14, 0 }
 0x49b   : > { %5134 = vst [vmem:[#allocation1 + $0x22] ss:$4 sm:$0xff] %v4569_v53  ;;  %5355 = vxpose.xlu0.b32.cont [10/16] (narrow) %v8250_v8, 8  ;;  %v4575_v8 = vsel %vm717_vm2, %v3334_v20, %v4063_v45  ;;  %v3125_v53 = vmax.f32 %v3085_v32, 0.0  ;;  %v4586_v17 = vsel %vm717_vm2, %v3344_v21, %v4074_v57  ;;  %v2934_v32 = vadd.f32 %v8218_v61, %v8160_v30 }
 0x49c   : > { %5135 = vst [vmem:[#allocation1 + $0x23] ss:$4 sm:$0xff] %v4570_v1  ;;  %v3340_v1 = vrot.slane %v2971_v43, 3  ;;  %v4581_v40 = vsel %vm717_vm2, %v3339_v10, %v4069_v48 }
 0x49d   : > { %v3825_v56 = vrot.slane %v3125_v53, 1  ;;  %v3086_v45 = vpop.f32.mrf.mxu3  ;;  %v3827_v20 = vrot.slane %v3125_v53, 3  ;;  %v3828_v63 = vrot.slane %v3125_v53, 4  ;;  %v3829_v5 = vrot.slane %v3125_v53, 5 }
 0x49e   : > { %v4582_v26 = vsel %vm717_vm2, %v3340_v1, %v4070_v0  ;;  %v3087_v36 = vadd.f32 %v8218_v61, %v3086_v45  ;;  %v2973_v1 = vmax.f32 %v2934_v32, 0.0 }
 0x49f   : > { %v8290_v44 = vld.sshfl [vmem:[#allocation1] sm:$0xff pattern:$0x73625140]  ;;  %v4076_v3 = vperm.slane %v3825_v56, 0  ;;  %v4078_v49 = vperm.slane %v3827_v20, 0 }
 0x4a0   : > { %5138 = vst [vmem:[#allocation1] ss:$4 sm:$0xff] %v4571_v27  ;;  %v3126_v43 = vmax.f32 %v3087_v36, 0.0  ;;  %v3353_v45 = vrot.slane %v2973_v1, 2 }
 0x4a1   : > { %5139 = vst [vmem:[#allocation1 + $0x1] ss:$4 sm:$0xff] %v4572_v29  ;;  %v4585_v29 = vsel %vm717_vm2, %v3343_v24, %v4073_v59 }
 0x4a2   : > { %5140 = vst [vmem:[#allocation1 + $0x2] ss:$4 sm:$0xff] %v4573_v11  ;;  %v4075_v11 = vperm.slane %v3125_v53, 0  ;;  %v3832_v10 = vrot.slane %v3126_v43, 1  ;;  %v3834_v46 = vrot.slane %v3126_v43, 3  ;;  %v3835_v52 = vrot.slane %v3126_v43, 4 }
 0x4a3   : > { %v8299_v4 = vld.sshfl [vmem:[#allocation1 + $0x20] sm:$0xff pattern:$0x73625140]  ;;  %5141 = vst [vmem:[#allocation1 + $0x3] ss:$4 sm:$0xff] %v4574_v47  ;;  %5356 = vxpose.xlu0.b32.cont [11/16] (narrow) %v8258_v9, 8  ;;  %v2932_v9 = vadd.f32 %v8218_v61, %v8146_v58 }
 0x4a4   : > { %5142 = vst [vmem:[#allocation1 + $0x20] ss:$4 sm:$0xff] %v4575_v8  ;;  %v3826_v58 = vrot.slane %v3125_v53, 2  ;;  %v3830_v47 = vrot.slane %v3125_v53, 6  ;;  %v4084_v54 = vperm.slane %v3832_v10, 0  ;;  %v3837_v24 = vrot.slane %v3126_v43, 6 }
 0x4a5   : > { %5143 = vst [vmem:[#allocation1 + $0x21] ss:$4 sm:$0xff] %v4576_v2  ;;  %v2972_v19 = vmax.f32 %v2932_v9, 0.0  ;;  %v4079_v2 = vperm.slane %v3828_v63, 0  ;;  %v3089_v16 = vpop.f32.mrf.mxu3  ;;  %v4083_v9 = vperm.slane %v3126_v43, 0  ;;  %v4086_v56 = vperm.slane %v3834_v46, 0 }
 0x4a6   : > { %5144 = vst [vmem:[#allocation1 + $0x22] ss:$4 sm:$0xff] %v4577_v23  ;;  %v4077_v8 = vperm.slane %v3826_v58, 0  ;;  %v4081_v31 = vperm.slane %v3830_v47, 0  ;;  %v3090_v59 = vadd.f32 %v8218_v61, %v3089_v16  ;;  %v2937_v63 = vadd.f32 %v8218_v61, %v8176_v60 }
 0x4a7   : > { %5145 = vst [vmem:[#allocation1 + $0x23] ss:$4 sm:$0xff] %v4578_v12  ;;  %v3345_v37 = vrot.slane %v2972_v19, 1  ;;  %v3346_v62 = vrot.slane %v2972_v19, 2  ;;  %v4587_v35 = vsel %vm717_vm2, %v2972_v19, %v4075_v11  ;;  %v3347_v7 = vrot.slane %v2972_v19, 3 }
 0x4a8   : > { %v4080_v12 = vperm.slane %v3829_v5, 0  ;;  %v3348_v51 = vrot.slane %v2972_v19, 4  ;;  %v3349_v14 = vrot.slane %v2972_v19, 5  ;;  %v3350_v48 = vrot.slane %v2972_v19, 6 }
 0x4a9   : > { %v4588_v18 = vsel %vm717_vm2, %v3345_v37, %v4076_v3  ;;  %v4589_v34 = vsel %vm717_vm2, %v3346_v62, %v4077_v8  ;;  %v4590_v15 = vsel %vm717_vm2, %v3347_v7, %v4078_v49  ;;  %v4595_v21 = vsel %vm717_vm2, %v2973_v1, %v4083_v9 }
 0x4aa   : > { %v5146_v22 = vld.sshfl [vmem:[#allocation1] sm:$0xff pattern:$0x73625140]  ;;  %v4591_v0 = vsel %vm717_vm2, %v3348_v51, %v4079_v2  ;;  %v4592_v30 = vsel %vm717_vm2, %v3349_v14, %v4080_v12  ;;  %v4089_v11 = vperm.slane %v3837_v24, 0  ;;  %v3357_v5 = vrot.slane %v2973_v1, 6 }
 0x4ab   : > { %5378 = vxpose.xlu2.b32.start [1/16] (narrow) %v5146_v22, 8  ;;  %5148 = vst [vmem:[#allocation1] ss:$4 sm:$0xff] %v4579_v25  ;;  %5357 = vxpose.xlu0.b32.cont [12/16] (narrow) %v8266_v55, 8  ;;  %v3831_v55 = vrot.slane %v3125_v53, 7  ;;  %v3351_v53 = vrot.slane %v2972_v19, 7  ;;  %v2939_v46 = vadd.f32 %v8218_v61, %v8188_v13 }
 0x4ac   : > { %5149 = vst [vmem:[#allocation1 + $0x1] ss:$4 sm:$0xff] %v4580_v42  ;;  %v3833_v22 = vrot.slane %v3126_v43, 2  ;;  %v3354_v19 = vrot.slane %v2973_v1, 3  ;;  %v3358_v62 = vrot.slane %v2973_v1, 7 }
 0x4ad   : > { %5150 = vst [vmem:[#allocation1 + $0x2] ss:$4 sm:$0xff] %v4581_v40  ;;  %v4082_v6 = vperm.slane %v3831_v55, 0  ;;  %v3836_v40 = vrot.slane %v3126_v43, 5  ;;  %v3091_v8 = vpop.f32.mrf.mxu3 }
 0x4ae   : > { %5151 = vst [vmem:[#allocation1 + $0x3] ss:$4 sm:$0xff] %v4582_v26  ;;  %v5147_v27 = vld.sshfl [vmem:[#allocation1 + $0x20] sm:$0xff pattern:$0x73625140]  ;;  %v4085_v57 = vperm.slane %v3833_v22, 0  ;;  %v4598_v47 = vsel %vm717_vm2, %v3354_v19, %v4086_v56  ;;  %v3092_v7 = vadd.f32 %v8218_v61, %v3091_v8 }
 0x4af   : > { %5152 = vst [vmem:[#allocation1 + $0x20] ss:$4 sm:$0xff] %v4583_v38  ;;  %v4594_v42 = vsel %vm717_vm2, %v3351_v53, %v4082_v6  ;;  %v3352_v26 = vrot.slane %v2973_v1, 1  ;;  %v3838_v38 = vrot.slane %v3126_v43, 7  ;;  %v4601_v43 = vsel %vm717_vm2, %v3357_v5, %v4089_v11 }
 0x4b0   : > { %5153 = vst [vmem:[#allocation1 + $0x21] ss:$4 sm:$0xff] %v4584_v50  ;;  %v3127_v50 = vmax.f32 %v3090_v59, 0.0  ;;  %v4597_v36 = vsel %vm717_vm2, %v3353_v45, %v4085_v57  ;;  %v2975_v45 = vmax.f32 %v2939_v46, 0.0 }
 0x4b1   : > { %5154 = vst [vmem:[#allocation1 + $0x22] ss:$4 sm:$0xff] %v4585_v29  ;;  %v4088_v29 = vperm.slane %v3836_v40, 0  ;;  %v4596_v20 = vsel %vm717_vm2, %v3352_v26, %v4084_v54  ;;  %v4090_v3 = vperm.slane %v3838_v38, 0 }
 0x4b2   : > { %5155 = vst [vmem:[#allocation1 + $0x23] ss:$4 sm:$0xff] %v4586_v17  ;;  %v3355_v17 = vrot.slane %v2973_v1, 4  ;;  %v3839_v55 = vrot.slane %v3127_v50, 1  ;;  %v3840_v2 = vrot.slane %v3127_v50, 2  ;;  %v4091_v51 = vperm.slane %v3127_v50, 0 }
 0x4b3   : > { %5379 = vxpose.xlu2.b32.cont [2/16] (narrow) %v5147_v27, 8  ;;  %5358 = vxpose.xlu0.b32.cont [13/16] (narrow) %v8274_v41, 8  ;;  %v4593_v41 = vsel %vm717_vm2, %v3350_v48, %v4081_v31  ;;  %v4087_v27 = vperm.slane %v3835_v52, 0  ;;  %v4602_v12 = vsel %vm717_vm2, %v3358_v62, %v4090_v3  ;;  %v3843_v32 = vrot.slane %v3127_v50, 5 }
 0x4b4   : > { %v4092_v31 = vperm.slane %v3839_v55, 0  ;;  %v4093_v14 = vperm.slane %v3840_v2, 0  ;;  %v3845_v6 = vrot.slane %v3127_v50, 7  ;;  %v3366_v11 = vrot.slane %v2975_v45, 1 }
 0x4b5   : > { %v5156_v23 = vld.sshfl [vmem:[#allocation1] sm:$0xff pattern:$0x73625140]  ;;  %v4599_v37 = vsel %vm717_vm2, %v3355_v17, %v4087_v27  ;;  %v3094_v57 = vpop.f32.mrf.mxu3  ;;  %v3367_v5 = vrot.slane %v2975_v45, 2  ;;  %v3368_v55 = vrot.slane %v2975_v45, 3  ;;  %v2942_v2 = vadd.f32 %v8218_v61, %v8201_v28 }
 0x4b6   : > { %5158 = vst [vmem:[#allocation1] ss:$4 sm:$0xff] %v4587_v35  ;;  %v2974_v35 = vmax.f32 %v2937_v63, 0.0  ;;  %v4098_v59 = vperm.slane %v3845_v6, 0  ;;  %v3095_v19 = vadd.f32 %v8218_v61, %v3094_v57 }
 0x4b7   : > { %5159 = vst [vmem:[#allocation1 + $0x1] ss:$4 sm:$0xff] %v4588_v18  ;;  %v3842_v18 = vrot.slane %v3127_v50, 4  ;;  %v2976_v6 = vmax.f32 %v2942_v2, 0.0 }
 0x4b8   : > { %5160 = vst [vmem:[#allocation1 + $0x2] ss:$4 sm:$0xff] %v4589_v34  ;;  %v3844_v34 = vrot.slane %v3127_v50, 6  ;;  %v3359_v48 = vrot.slane %v2974_v35, 1  ;;  %v3360_v10 = vrot.slane %v2974_v35, 2  ;;  %v3362_v22 = vrot.slane %v2974_v35, 4 }
 0x4b9   : > { %5161 = vst [vmem:[#allocation1 + $0x3] ss:$4 sm:$0xff] %v4590_v15  ;;  %v5157_v25 = vld.sshfl [vmem:[#allocation1 + $0x20] sm:$0xff pattern:$0x73625140]  ;;  %v4095_v16 = vperm.slane %v3842_v18, 0 }
 0x4ba   : > { %5162 = vst [vmem:[#allocation1 + $0x20] ss:$4 sm:$0xff] %v4591_v0  ;;  %v8345_v0 = vmax.f32 %v3092_v7, 0.0  ;;  %v4605_v52 = vsel %vm717_vm2, %v3360_v10, %v4093_v14  ;;  %v3364_v9 = vrot.slane %v2974_v35, 6  ;;  %v3365_v13 = vrot.slane %v2974_v35, 7 }
 0x4bb   : > { %5380 = vxpose.xlu2.b32.cont [3/16] (narrow) %v5156_v23, 8  ;;  %5163 = vst [vmem:[#allocation1 + $0x21] ss:$4 sm:$0xff] %v4592_v30  ;;  %5359 = vxpose.xlu0.b32.cont [14/16] (narrow) %v8283_v33, 8  ;;  %v3356_v33 = vrot.slane %v2973_v1, 5  ;;  %v3841_v23 = vrot.slane %v3127_v50, 3  ;;  %v4604_v1 = vsel %vm717_vm2, %v3359_v48, %v4092_v31  ;;  %v4607_v24 = vsel %vm717_vm2, %v3362_v22, %v4095_v16 }
 0x4bc   : > { %5164 = vst [vmem:[#allocation1 + $0x22] ss:$4 sm:$0xff] %v4593_v41  ;;  %v3361_v30 = vrot.slane %v2974_v35, 3  ;;  %v3363_v41 = vrot.slane %v2974_v35, 5  ;;  %v3846_v54 = vrot.slane %v8345_v0, 1  ;;  %v3847_v56 = vrot.slane %v8345_v0, 2 }
 0x4bd   : > { %5165 = vst [vmem:[#allocation1 + $0x23] ss:$4 sm:$0xff] %v4594_v42  ;;  %v4600_v60 = vsel %vm717_vm2, %v3356_v33, %v4088_v29  ;;  %v4094_v15 = vperm.slane %v3841_v23, 0  ;;  %v4097_v42 = vperm.slane %v3844_v34, 0  ;;  %v4610_v50 = vsel %vm717_vm2, %v3365_v13, %v4098_v59  ;;  %v3096_v31 = vpop.f32.mrf.mxu3 }
 0x4be   : > { %v3850_v29 = vrot.slane %v8345_v0, 5  ;;  %v3851_v17 = vrot.slane %v8345_v0, 6  ;;  %v4101_v63 = vperm.slane %v3847_v56, 0  ;;  %v3129_v8 = vmax.f32 %v3095_v19, 0.0 }
 0x4bf   : > { %v4606_v40 = vsel %vm717_vm2, %v3361_v30, %v4094_v15  ;;  %v4609_v27 = vsel %vm717_vm2, %v3364_v9, %v4097_v42  ;;  %v3370_v23 = vrot.slane %v2975_v45, 5  ;;  %v3371_v7 = vrot.slane %v2975_v45, 6 }
 0x4c0   : > { %v5166_v58 = vld.sshfl [vmem:[#allocation1] sm:$0xff pattern:$0x73625140]  ;;  %v4104_v62 = vperm.slane %v3850_v29, 0  ;;  %v3372_v14 = vrot.slane %v2975_v45, 7  ;;  %v3854_v48 = vrot.slane %v3129_v8, 2  ;;  %v3097_v30 = vadd.f32 %v8218_v61, %v3096_v31 }
 0x4c1   : > { %5168 = vst [vmem:[#allocation1] ss:$4 sm:$0xff] %v4595_v21  ;;  %v3848_v21 = vrot.slane %v8345_v0, 3  ;;  %v3856_v16 = vrot.slane %v3129_v8, 4  ;;  %v3857_v22 = vrot.slane %v3129_v8, 5  ;;  %v3373_v46 = vrot.slane %v2976_v6, 1 }
 0x4c2   : > { %5169 = vst [vmem:[#allocation1 + $0x1] ss:$4 sm:$0xff] %v4596_v20  ;;  %v4100_v20 = vperm.slane %v3846_v54, 0  ;;  %v4616_v28 = vsel %vm717_vm2, %v3370_v23, %v4104_v62  ;;  %v2944_v56 = vadd.f32 %v8218_v61, %v8221_v39 }
 0x4c3   : > { %5381 = vxpose.xlu2.b32.cont [4/16] (narrow) %v5157_v25, 8  ;;  %5170 = vst [vmem:[#allocation1 + $0x2] ss:$4 sm:$0xff] %v4597_v36  ;;  %5360 = vxpose.xlu0.b32.cont [15/16] (narrow) %v8290_v44, 8  ;;  %v4603_v25 = vsel %vm717_vm2, %v2974_v35, %v4091_v51  ;;  %v4096_v44 = vperm.slane %v3843_v32, 0  ;;  %v3852_v36 = vrot.slane %v8345_v0, 7 }
 0x4c4   : > { %5171 = vst [vmem:[#allocation1 + $0x3] ss:$4 sm:$0xff] %v4598_v47  ;;  %v8338_v49 = vld.sshfl [vmem:[#allocation1 + $0x20] sm:$0xff pattern:$0x73625140]  ;;  %v4102_v33 = vperm.slane %v3848_v21, 0 }
 0x4c5   : > { %5172 = vst [vmem:[#allocation1 + $0x20] ss:$4 sm:$0xff] %v4599_v37  ;;  %v4608_v38 = vsel %vm717_vm2, %v3363_v41, %v4096_v44  ;;  %v4105_v35 = vperm.slane %v3851_v17, 0  ;;  %v3853_v32 = vrot.slane %v3129_v8, 1  ;;  %v4109_v41 = vperm.slane %v3854_v48, 0 }
 0x4c6   : > { %5173 = vst [vmem:[#allocation1 + $0x21] ss:$4 sm:$0xff] %v4600_v60  ;;  %v4612_v60 = vsel %vm717_vm2, %v3366_v11, %v4100_v20  ;;  %v4614_v18 = vsel %vm717_vm2, %v3368_v55, %v4102_v33  ;;  %v4111_v9 = vperm.slane %v3856_v16, 0  ;;  %v4112_v57 = vperm.slane %v3857_v22, 0  ;;  %v5298_v22 = vpop.trf.xlu1 }
 0x4c7   : > { %5174 = vst [vmem:[#allocation1 + $0x22] ss:$4 sm:$0xff] %v4601_v43  ;;  %v4613_v43 = vsel %vm717_vm2, %v3367_v5, %v4101_v63  ;;  %v4617_v15 = vsel %vm717_vm2, %v3371_v7, %v4105_v35  ;;  %v4108_v44 = vperm.slane %v3853_v32, 0  ;;  %v3377_v21 = vrot.slane %v2976_v6, 5 }
 0x4c8   : > { %5175 = vst [vmem:[#allocation1 + $0x23] ss:$4 sm:$0xff] %v4602_v12  ;;  %v4106_v12 = vperm.slane %v3852_v36, 0  ;;  %v3379_v17 = vrot.slane %v2976_v6, 7  ;;  %v2977_v63 = vmax.f32 %v2944_v56, 0.0 }
 0x4c9   : > { %v4620_v13 = vsel %vm717_vm2, %v3373_v46, %v4108_v44  ;;  %v4624_v61 = vsel %vm717_vm2, %v3377_v21, %v4112_v57  ;;  %5410 = vst [vmem:[%s443_s20] sm:$0xff] %v5298_v22 }
 0x4ca   : > { %v4618_v10 = vsel %vm717_vm2, %v3372_v14, %v4106_v12  ;;  %v3380_v62 = vrot.slane %v2977_v63, 1  ;;  %v3381_v2 = vrot.slane %v2977_v63, 2  ;;  %v3382_v7 = vrot.slane %v2977_v63, 3 }
 0x4cb   : > { %5382 = vxpose.xlu2.b32.cont [5/16] (narrow) %v5166_v58, 8  ;;  %v8348_v53 = vld.sshfl [vmem:[#allocation1] sm:$0xff pattern:$0x73625140]  ;;  %5361 = vxpose.xlu0.b32.end [16/16] (narrow) %v8299_v4, 8  ;;  %v3849_v58 = vrot.slane %v8345_v0, 4 }
 0x4cc   : > { %5178 = vst [vmem:[#allocation1] ss:$4 sm:$0xff] %v4603_v25  ;;  %v4099_v4 = vperm.slane %v8345_v0, 0  ;;  %v3855_v0 = vrot.slane %v3129_v8, 3  ;;  %v4107_v25 = vperm.slane %v3129_v8, 0  ;;  %v3384_v14 = vrot.slane %v2977_v63, 5 }
 0x4cd   : > { %5179 = vst [vmem:[#allocation1 + $0x1] ss:$4 sm:$0xff] %v4604_v1  ;;  %v4103_v3 = vperm.slane %v3849_v58, 0  ;;  %v3858_v1 = vrot.slane %v3129_v8, 6 }
 0x4ce   : > { %5180 = vst [vmem:[#allocation1 + $0x2] ss:$4 sm:$0xff] %v4605_v52  ;;  %v4611_v47 = vsel %vm717_vm2, %v2975_v45, %v4099_v4  ;;  %v4110_v42 = vperm.slane %v3855_v0, 0  ;;  %v3374_v52 = vrot.slane %v2976_v6, 2  ;;  %v4619_v59 = vsel %vm717_vm2, %v2976_v6, %v4107_v25 }
 0x4cf   : > { %5181 = vst [vmem:[#allocation1 + $0x3] ss:$4 sm:$0xff] %v4606_v40  ;;  %v8358_v26 = vld.sshfl [vmem:[#allocation1 + $0x20] sm:$0xff pattern:$0x73625140]  ;;  %v3130_v40 = vmax.f32 %v3097_v30, 0.0  ;;  %v5330_v30 = vpop.trf.xlu2 }
 0x4d0   : > { %5182 = vst [vmem:[#allocation1 + $0x20] ss:$4 sm:$0xff] %v4607_v24  ;;  %v3375_v24 = vrot.slane %v2976_v6, 3  ;;  %v3386_v0 = vrot.slane %v2977_v63, 7 }
 0x4d1   : > { %5183 = vst [vmem:[#allocation1 + $0x21] ss:$4 sm:$0xff] %v4608_v38  ;;  %v3376_v38 = vrot.slane %v2976_v6, 4  ;;  %v3860_v29 = vrot.slane %v3130_v40, 1  ;;  %v3861_v39 = vrot.slane %v3130_v40, 2  ;;  %v3862_v11 = vrot.slane %v3130_v40, 3 }
 0x4d2   : > { %5184 = vst [vmem:[#allocation1 + $0x22] ss:$4 sm:$0xff] %v4609_v27  ;;  %v4621_v27 = vsel %vm717_vm2, %v3374_v52, %v4109_v41  ;;  %v4622_v4 = vsel %vm717_vm2, %v3375_v24, %v4110_v42  ;;  %v3863_v33 = vrot.slane %v3130_v40, 4  ;;  %v4115_v5 = vperm.slane %v3130_v40, 0 }
 0x4d3   : > { %5383 = vxpose.xlu2.b32.cont [6/16] (narrow) %v8338_v49, 8  ;;  %5185 = vst [vmem:[#allocation1 + $0x23] ss:$4 sm:$0xff] %v4610_v50  ;;  %v3369_v49 = vrot.slane %v2975_v45, 4  ;;  %v4113_v45 = vperm.slane %v3858_v1, 0  ;;  %v3378_v50 = vrot.slane %v2976_v6, 6  ;;  %v4623_v19 = vsel %vm717_vm2, %v3376_v38, %v4111_v9 }
 0x4d4   : > { %v4117_v55 = vperm.slane %v3861_v39, 0  ;;  %v4119_v35 = vperm.slane %v3863_v33, 0  ;;  %5411 = vst [vmem:[%s443_s20 + $0x8] sm:$0xff] %v5330_v30 }
 0x4d5   : > { %v4615_v51 = vsel %vm717_vm2, %v3369_v49, %v4103_v3  ;;  %v3864_v3 = vrot.slane %v3130_v40, 5  ;;  %v4118_v49 = vperm.slane %v3862_v11, 0 }
 0x4d6   : > { %v8373_v37 = vld.sshfl [vmem:[#allocation1] sm:$0xff pattern:$0x73625140]  ;;  %v4629_v31 = vsel %vm717_vm2, %v3381_v2, %v4117_v55 }
 0x4d7   : > { %5188 = vst [vmem:[#allocation1] ss:$4 sm:$0xff] %v4611_v47  ;;  %v4116_v47 = vperm.slane %v3860_v29, 0  ;;  %v4120_v12 = vperm.slane %v3864_v3, 0 }
 0x4d8   : > { %5189 = vst [vmem:[#allocation1 + $0x1] ss:$4 sm:$0xff] %v4612_v60  ;;  %v3866_v60 = vrot.slane %v3130_v40, 7 }
 0x4d9   : > { %5190 = vst [vmem:[#allocation1 + $0x2] ss:$4 sm:$0xff] %v4613_v43  ;;  %v4627_v43 = vsel %vm717_vm2, %v2977_v63, %v4115_v5 }
 0x4da   : > { %5191 = vst [vmem:[#allocation1 + $0x3] ss:$4 sm:$0xff] %v4614_v18  ;;  %v8381_v34 = vld.sshfl [vmem:[#allocation1 + $0x20] sm:$0xff pattern:$0x73625140]  ;;  %v4628_v18 = vsel %vm717_vm2, %v3380_v62, %v4116_v47  ;;  %v4122_v48 = vperm.slane %v3866_v60, 0 }
 0x4db   : > { %5384 = vxpose.xlu2.b32.cont [7/16] (narrow) %v8348_v53, 8  ;;  %5192 = vst [vmem:[#allocation1 + $0x20] ss:$4 sm:$0xff] %v4615_v51  ;;  %v3859_v53 = vrot.slane %v3129_v8, 7  ;;  %v3865_v8 = vrot.slane %v3130_v40, 6  ;;  %v3383_v51 = vrot.slane %v2977_v63, 4 }
 0x4dc   : > { %5193 = vst [vmem:[#allocation1 + $0x21] ss:$4 sm:$0xff] %v4616_v28  ;;  %v3385_v28 = vrot.slane %v2977_v63, 6  ;;  %v4634_v25 = vsel %vm717_vm2, %v3386_v0, %v4122_v48 }
 0x4dd   : > { %5194 = vst [vmem:[#allocation1 + $0x22] ss:$4 sm:$0xff] %v4617_v15  ;;  %v4114_v58 = vperm.slane %v3859_v53, 0  ;;  %v4121_v32 = vperm.slane %v3865_v8, 0  ;;  %v4631_v6 = vsel %vm717_vm2, %v3383_v51, %v4119_v35 }
 0x4de   : > { %5195 = vst [vmem:[#allocation1 + $0x23] ss:$4 sm:$0xff] %v4618_v10  ;;  %v4632_v10 = vsel %vm717_vm2, %v3384_v14, %v4120_v12 }
 0x4df   : > { %v4626_v36 = vsel %vm717_vm2, %v3379_v17, %v4114_v58  ;;  %v4633_v16 = vsel %vm717_vm2, %v3385_v28, %v4121_v32 }
 0x4e1   : > { %v8389_v54 = vld.sshfl [vmem:[#allocation1] sm:$0xff pattern:$0x73625140] }
 0x4e2   : > { %5198 = vst [vmem:[#allocation1] ss:$4 sm:$0xff] %v4619_v59 }
 0x4e3   : > { %5385 = vxpose.xlu2.b32.cont [8/16] (narrow) %v8358_v26, 8  ;;  %5199 = vst [vmem:[#allocation1 + $0x1] ss:$4 sm:$0xff] %v4620_v13  ;;  %v4625_v26 = vsel %vm717_vm2, %v3378_v50, %v4113_v45 }
 0x4e4   : > { %5200 = vst [vmem:[#allocation1 + $0x2] ss:$4 sm:$0xff] %v4621_v27 }
 0x4e5   : > { %5201 = vst [vmem:[#allocation1 + $0x3] ss:$4 sm:$0xff] %v4622_v4  ;;  %v5197_v20 = vld.sshfl [vmem:[#allocation1 + $0x20] sm:$0xff pattern:$0x73625140] }
 0x4e6   : > { %5202 = vst [vmem:[#allocation1 + $0x20] ss:$4 sm:$0xff] %v4623_v19 }
 0x4e7   : > { %5203 = vst [vmem:[#allocation1 + $0x21] ss:$4 sm:$0xff] %v4624_v61 }
 0x4e8   : > { %5204 = vst [vmem:[#allocation1 + $0x22] ss:$4 sm:$0xff] %v4625_v26 }
 0x4e9   : > { %5205 = vst [vmem:[#allocation1 + $0x23] ss:$4 sm:$0xff] %v4626_v36 }
 0x4eb   : > { %5386 = vxpose.xlu2.b32.cont [9/16] (narrow) %v8373_v37, 8  ;;  %v4630_v37 = vsel %vm717_vm2, %v3382_v7, %v4118_v49 }
 0x4ec   : > { %v5206_v23 = vld.sshfl [vmem:[#allocation1] sm:$0xff pattern:$0x73625140] }
 0x4ed   : > { %5208 = vst [vmem:[#allocation1] ss:$4 sm:$0xff] %v4627_v43 }
 0x4ee   : > { %5209 = vst [vmem:[#allocation1 + $0x1] ss:$4 sm:$0xff] %v4628_v18 }
 0x4ef   : > { %5210 = vst [vmem:[#allocation1 + $0x2] ss:$4 sm:$0xff] %v4629_v31 }
 0x4f0   : > { %5211 = vst [vmem:[#allocation1 + $0x3] ss:$4 sm:$0xff] %v4630_v37  ;;  %v5207_v15 = vld.sshfl [vmem:[#allocation1 + $0x20] sm:$0xff pattern:$0x73625140] }
 0x4f1   : > { %5212 = vst [vmem:[#allocation1 + $0x20] ss:$4 sm:$0xff] %v4631_v6 }
 0x4f2   : > { %5213 = vst [vmem:[#allocation1 + $0x21] ss:$4 sm:$0xff] %v4632_v10 }
 0x4f3   : > { %5387 = vxpose.xlu2.b32.cont [10/16] (narrow) %v8381_v34, 8  ;;  %5214 = vst [vmem:[#allocation1 + $0x22] ss:$4 sm:$0xff] %v4633_v16 }
 0x4f4   : > { %5215 = vst [vmem:[#allocation1 + $0x23] ss:$4 sm:$0xff] %v4634_v25 }
 0x4f7   : > { %v5216_v34 = vld.sshfl [vmem:[#allocation1] sm:$0xff pattern:$0x73625140]  ;;  %v5362_v1 = vpop.trf.xlu0 }
 0x4f8   : > { %5412 = vst [vmem:[%s443_s20 + $0x10] sm:$0xff] %v5362_v1 }
 0x4fb   : > { %5388 = vxpose.xlu2.b32.cont [11/16] (narrow) %v8389_v54, 8  ;;  %v5217_v44 = vld.sshfl [vmem:[#allocation1 + $0x20] sm:$0xff pattern:$0x73625140] }
 0x503   : > { %5389 = vxpose.xlu2.b32.cont [12/16] (narrow) %v5197_v20, 8 }
 0x50b   : > { %5390 = vxpose.xlu2.b32.cont [13/16] (narrow) %v5206_v23, 8 }
 0x513   : > { %5391 = vxpose.xlu2.b32.cont [14/16] (narrow) %v5207_v15, 8 }
 0x51b   : > { %5392 = vxpose.xlu2.b32.cont [15/16] (narrow) %v5216_v34, 8 }
 0x523   : > { %5393 = vxpose.xlu2.b32.end [16/16] (narrow) %v5217_v44, 8 }
 0x544   : > { %v5394_v41 = vpop.trf.xlu2 }
 0x545   : > { %5413 = vst [vmem:[%s443_s20 + $0x18] sm:$0xff] %v5394_v41 }
 0x546 PF: > { %s17_s28 = sadd.s32 1, %s5751_s28   ;;  %s8684_s24 = smov %s5743_s26 }
 0x547   : > { %p14_p13 = scmp.ge.s32.totalorder %s17_s28, 6   ;;  %s8685_s25 = smov %s5747_s27 }
 0x548   : > { %s8686_s26 = smov %s8689_s29  ;;  %s8687_s27 = smov %s8693_s30 }
 0x549   :  { %16 = sbr.rel (!%p14_p13) target bundleno = 3 (0x3), region = 91 }

</bundles_post_ra>
